<compile_context>
chip_gen: v7x
topology: tpu7x:2x2x1
jax: 0.10.0
libtpu: 0.0.40
codegen_flags: <defaults>
</compile_context>

<pallas_src>
import jax
import jax.numpy as jnp
from jax.experimental import pallas as pl
from jax.experimental.pallas import tpu as pltpu

# ----------------------------- model constants -----------------------------
CATE_VOCABS = [55824, 5443, 13073, 13170, 3145, 33843, 14304, 11, 13601]
NUME_VOCABS = [64, 16, 128, 64, 128, 64, 512, 512]
EMB_DIM = 64
IN_FEATURES = (len(CATE_VOCABS) + len(NUME_VOCABS)) * EMB_DIM  # 1088
MLP_DIMS = [IN_FEATURES, 256, 256, 128, 1]
LEAKY_SLOPE = 0.01       # torch.nn.LeakyReLU default
DEFAULT_TILE_B = 512     # amortizes grid-step overhead; fits 48 MiB VMEM limit


def _leaky(h):
    return jnp.where(h >= 0, h, LEAKY_SLOPE * h)


def _round_up(x, m):
    return ((x + m - 1) // m) * m


# ------------------------------ Pallas kernel -------------------------------
def dcnv2_kernel(x0_ref, wt_ref, cb_ref,
                 w1_ref, b1_ref, w2_ref, b2_ref, w3_ref, b3_ref,
                 w4_ref, b4_ref, out_ref):
    """Fused 1-layer cross network + 4-layer MLP for one batch tile.

    x0_ref : [TILE_B, 1088] bf16   concatenated embeddings
    wt_ref : [1088, 1088]  bf16    cross weight, pre-transposed: (W@x)^T == x^T@wt
    cb_ref : [1, 1088]     f32     cross bias with the residual folded in (b+1)
    wK_ref : bf16 MLP weights stored [in, out]; bK f32 [1, out]
    w4_ref : [128, 1]      f32     last Linear as a column (VPU head)
    b4_ref : [1, 1]        f32
    out    : [1, 1, TILE_B] f32    logits packed along lanes
    """
    x0_bf = x0_ref[...]                                # bf16
    x0 = x0_bf.astype(jnp.float32)

    # cross layer: x_l = x0 * (W @ x0 + b) + x0  ==  x0 * (x0 @ W^T + (b + 1))
    xl_w = jnp.dot(x0_bf, wt_ref[...], preferred_element_type=jnp.float32)
    x_l = x0 * (xl_w + cb_ref[...])

    h = _leaky(jnp.dot(x_l.astype(jnp.bfloat16), w1_ref[...],
                       preferred_element_type=jnp.float32) + b1_ref[...])
    h = _leaky(jnp.dot(h.astype(jnp.bfloat16), w2_ref[...],
                       preferred_element_type=jnp.float32) + b2_ref[...])
    h = _leaky(jnp.dot(h.astype(jnp.bfloat16), w3_ref[...],
                       preferred_element_type=jnp.float32) + b3_ref[...])

    # Head 128 -> 1: transpose h (XLU, hidden under the MXU) so the logits land
    # lane-dense as a (1, TILE_B) row; multiply + sublane-reduce on the VPU.
    hT = h.T                                            # (128, TILE_B) f32
    logit = jnp.sum(hT * w4_ref[...], axis=0, keepdims=True) + b4_ref[...]
    out_ref[...] = logit[None]                          # (1, 1, TILE_B)


# ------------------------------ kernel wrapper -------------------------------
def dcnv2_pallas(x0_bf16, infer):
    """x0_bf16: [B, 1088] bfloat16. Returns logits [B, 1] float32."""
    B = x0_bf16.shape[0]
    # Cap tile at DEFAULT_TILE_B; for small/medium batches split into >=2 tiles
    # so the "parallel" batch axis shards across both TensorCores on v7x.
    tile_b = max(8, min(DEFAULT_TILE_B, _round_up(pl.cdiv(B, 2), 8)))
    num_tiles = pl.cdiv(B, tile_b)
    b_pad = num_tiles * tile_b
    if b_pad != B:
        x0_bf16 = jnp.pad(x0_bf16, ((0, b_pad - B), (0, 0)))

    def resident(shape):
        # Full-array block with a constant index_map -> DMA'd once and
        # VMEM-resident across the whole grid.
        return pl.BlockSpec(shape, lambda i: (0, 0))

    in_specs = [
        pl.BlockSpec((tile_b, IN_FEATURES), lambda i: (i, 0)),   # x0 tile (bf16)
        resident((IN_FEATURES, IN_FEATURES)),                    # cross W^T (bf16)
        resident((1, IN_FEATURES)),                              # cross bias (+1)
        resident((IN_FEATURES, MLP_DIMS[1])), resident((1, MLP_DIMS[1])),
        resident((MLP_DIMS[1], MLP_DIMS[2])), resident((1, MLP_DIMS[2])),
        resident((MLP_DIMS[2], MLP_DIMS[3])), resident((1, MLP_DIMS[3])),
        resident((MLP_DIMS[3], 1)),                              # w4 column (f32)
        resident((1, 1)),                                        # b4
    ]

    out = pl.pallas_call(
        dcnv2_kernel,
        out_shape=jax.ShapeDtypeStruct((num_tiles, 1, tile_b), jnp.float32),
        grid_spec=pltpu.PrefetchScalarGridSpec(
            num_scalar_prefetch=0,
            grid=(num_tiles,),
            in_specs=in_specs,
            out_specs=pl.BlockSpec((1, 1, tile_b), lambda i: (i, 0, 0)),
        ),
        compiler_params=pltpu.CompilerParams(
            dimension_semantics=("parallel",),      # shard batch over TCs (v7x)
            vmem_limit_bytes=48 << 20,              # safe on v5e/v6e/v7x
        ),
    )(x0_bf16, infer["cross_wt"], infer["cross_b1"],
      infer["w1"], infer["b1"], infer["w2"], infer["b2"],
      infer["w3"], infer["b3"], infer["w4_col"], infer["b4"])

    return out.reshape(b_pad, 1)[:B]


# ------------------------------ full forward --------------------------------
# TODO(synk): the embedding gather + concat could be pulled into the kernel via
# scalar-prefetched indices + manual make_async_copy row gather, eliminating
# the materialized [B, 1088] x0 array in HBM; kept in XLA for now.
@jax.jit
def dcnv2_forward(x_idx, emb, infer):
    """x_idx: int32 [B, 18] (cols 0..7 numeric, 8..16 categorical, 17 unused)."""
    nume = [emb["nume_emb"][i][x_idx[:, i]] for i in range(8)]
    # Matches the PyTorch reference exactly: categorical tables are gathered in
    # REVERSE order (table 8..0) paired with columns 16..8.
    cate = [emb["cate_emb"][8 - i][x_idx[:, -i - 2]] for i in range(9)]
    x0 = jnp.concatenate(nume + cate, axis=1).astype(jnp.bfloat16)  # [B, 1088]
    logits = dcnv2_pallas(x0, infer)
    return {"logits": logits}


# ------------------------------ parameter init -------------------------------
def init_params(key):
    keys = jax.random.split(key, 64)
    ki = iter(keys)
    params = {}
    params["cate_emb"] = [
        0.01 * jax.random.normal(next(ki), (v, EMB_DIM), jnp.float32)
        for v in CATE_VOCABS
    ]
    params["nume_emb"] = [
        0.01 * jax.random.normal(next(ki), (v, EMB_DIM), jnp.float32)
        for v in NUME_VOCABS
    ]
    # cross layer: torch.randn weight, zero bias
    params["cross_w"] = jax.random.normal(next(ki), (IN_FEATURES, IN_FEATURES),
                                          jnp.float32)
    params["cross_b"] = jnp.zeros((IN_FEATURES,), jnp.float32)
    # MLP linear layers, stored [in, out] (== torch Linear weight transposed)
    mlp_w, mlp_b = [], []
    for d_in, d_out in zip(MLP_DIMS[:-1], MLP_DIMS[1:]):
        bound = 1.0 / jnp.sqrt(d_in)
        mlp_w.append(jax.random.uniform(next(ki), (d_in, d_out), jnp.float32,
                                        -bound, bound))
        mlp_b.append(jax.random.uniform(next(ki), (d_out,), jnp.float32,
                                        -bound, bound))
    params["mlp_w"] = mlp_w
    params["mlp_b"] = mlp_b
    return params


def prepare_inference_params(params):
    """One-time layout/dtype prep: pre-transpose the cross weight, pre-cast
    MXU operands to bf16 (f32 accumulation in-kernel), fold the cross residual
    into the bias (+1), and lay out the head weight as a column for the VPU."""
    ws, bs = params["mlp_w"], params["mlp_b"]
    return {
        "cross_wt": params["cross_w"].T.astype(jnp.bfloat16),
        "cross_b1": (params["cross_b"] + 1.0).reshape(1, IN_FEATURES)
                    .astype(jnp.float32),
        "w1": ws[0].astype(jnp.bfloat16), "b1": bs[0].reshape(1, -1).astype(jnp.float32),
        "w2": ws[1].astype(jnp.bfloat16), "b2": bs[1].reshape(1, -1).astype(jnp.float32),
        "w3": ws[2].astype(jnp.bfloat16), "b3": bs[2].reshape(1, -1).astype(jnp.float32),
        "w4_col": ws[3].reshape(MLP_DIMS[3], 1).astype(jnp.float32),
        "b4": bs[3].reshape(1, 1).astype(jnp.float32),
    }


# ----------------------------------- main ------------------------------------
if __name__ == "__main__":
    key = jax.random.PRNGKey(0)
    pkey, xkey = jax.random.split(key)
    params = init_params(pkey)
    infer = prepare_inference_params(params)
    emb = {"nume_emb": params["nume_emb"], "cate_emb": params["cate_emb"]}

    B = 8
    # integer index input [B, 18]: 8 numeric cols, 9 categorical cols, 1 unused
    cols = []
    xkeys = jax.random.split(xkey, 18)
    for i, v in enumerate(NUME_VOCABS):
        cols.append(jax.random.randint(xkeys[i], (B, 1), 0, v, jnp.int32))
    for j, v in enumerate(CATE_VOCABS):
        cols.append(jax.random.randint(xkeys[8 + j], (B, 1), 0, v, jnp.int32))
    cols.append(jnp.zeros((B, 1), jnp.int32))  # trailing unused column (label)
    x = jnp.concatenate(cols, axis=1)          # [8, 18]

    out = dcnv2_forward(x, emb, infer)
    logits = jax.block_until_ready(out["logits"])
    assert logits.shape == (B, 1) and logits.dtype == jnp.float32
    assert bool(jnp.all(jnp.isfinite(logits)))
    print("KERNEL_OK")
</pallas_src>

<mosaic_0001>
module attributes {stable_mosaic.version = 11 : i64} {
  func.func @dcnv2_kernel(%arg0: i32, %arg1: memref<8x1088xbf16, #tpu.memory_space<vmem>>, %arg2: memref<1088x1088xbf16, #tpu.memory_space<vmem>>, %arg3: memref<1x1088xf32, #tpu.memory_space<vmem>>, %arg4: memref<1088x256xbf16, #tpu.memory_space<vmem>>, %arg5: memref<1x256xf32, #tpu.memory_space<vmem>>, %arg6: memref<256x256xbf16, #tpu.memory_space<vmem>>, %arg7: memref<1x256xf32, #tpu.memory_space<vmem>>, %arg8: memref<256x128xbf16, #tpu.memory_space<vmem>>, %arg9: memref<1x128xf32, #tpu.memory_space<vmem>>, %arg10: memref<128x1xf32, #tpu.memory_space<vmem>>, %arg11: memref<1x1xf32, #tpu.memory_space<vmem>>, %arg12: memref<1x1x8xf32, #tpu.memory_space<vmem>>) attributes {dimension_semantics = [#tpu.dimension_semantics<parallel>], iteration_bounds = array<i64: 1>, scalar_prefetch = 0 : i64, scratch_operands = 0 : i64, tpu.core_type = #tpu.core_type<tc>, window_params = [{transform_indices = @transform_0, window_bounds = array<i64: 8, 1088>}, {pipeline_mode = #tpu.pipeline_mode<synchronous>, transform_indices = @transform_1, window_bounds = array<i64: 1088, 1088>}, {pipeline_mode = #tpu.pipeline_mode<synchronous>, transform_indices = @transform_2, window_bounds = array<i64: 1, 1088>}, {pipeline_mode = #tpu.pipeline_mode<synchronous>, transform_indices = @transform_3, window_bounds = array<i64: 1088, 256>}, {pipeline_mode = #tpu.pipeline_mode<synchronous>, transform_indices = @transform_4, window_bounds = array<i64: 1, 256>}, {pipeline_mode = #tpu.pipeline_mode<synchronous>, transform_indices = @transform_5, window_bounds = array<i64: 256, 256>}, {pipeline_mode = #tpu.pipeline_mode<synchronous>, transform_indices = @transform_6, window_bounds = array<i64: 1, 256>}, {pipeline_mode = #tpu.pipeline_mode<synchronous>, transform_indices = @transform_7, window_bounds = array<i64: 256, 128>}, {pipeline_mode = #tpu.pipeline_mode<synchronous>, transform_indices = @transform_8, window_bounds = array<i64: 1, 128>}, {pipeline_mode = #tpu.pipeline_mode<synchronous>, transform_indices = @transform_9, window_bounds = array<i64: 128, 1>}, {pipeline_mode = #tpu.pipeline_mode<synchronous>, transform_indices = @transform_10, window_bounds = array<i64: 1, 1>}, {transform_indices = @transform_11, window_bounds = array<i64: 1, 1, 8>}]} {
    %c0 = arith.constant 0 : index
    %c0_0 = arith.constant 0 : index
    %0 = vector.load %arg1[%c0, %c0_0] : memref<8x1088xbf16, #tpu.memory_space<vmem>>, vector<8x1088xbf16>
    %1 = arith.extf %0 : vector<8x1088xbf16> to vector<8x1088xf32>
    %c0_1 = arith.constant 0 : index
    %c0_2 = arith.constant 0 : index
    %2 = vector.load %arg2[%c0_1, %c0_2] : memref<1088x1088xbf16, #tpu.memory_space<vmem>>, vector<1088x1088xbf16>
    %cst = arith.constant dense<0.000000e+00> : vector<8x1088xf32>
    %3 = tpu.matmul %0, %2, %cst {dimension_numbers = #tpu.dot_dimension_numbers<[1], [0], [0], [1], [0, 0, 1, 1], [], []>} : vector<8x1088xbf16>, vector<1088x1088xbf16>, vector<8x1088xf32> -> vector<8x1088xf32>
    %c0_3 = arith.constant 0 : index
    %c0_4 = arith.constant 0 : index
    %4 = vector.load %arg3[%c0_3, %c0_4] : memref<1x1088xf32, #tpu.memory_space<vmem>>, vector<1x1088xf32>
    %5 = vector.broadcast %4 : vector<1x1088xf32> to vector<8x1088xf32>
    %6 = arith.addf %3, %5 : vector<8x1088xf32>
    %7 = arith.mulf %1, %6 : vector<8x1088xf32>
    %8 = arith.truncf %7 : vector<8x1088xf32> to vector<8x1088xbf16>
    %c0_5 = arith.constant 0 : index
    %c0_6 = arith.constant 0 : index
    %9 = vector.load %arg4[%c0_5, %c0_6] : memref<1088x256xbf16, #tpu.memory_space<vmem>>, vector<1088x256xbf16>
    %cst_7 = arith.constant dense<0.000000e+00> : vector<8x256xf32>
    %10 = tpu.matmul %8, %9, %cst_7 {dimension_numbers = #tpu.dot_dimension_numbers<[1], [0], [0], [1], [0, 0, 1, 1], [], []>} : vector<8x1088xbf16>, vector<1088x256xbf16>, vector<8x256xf32> -> vector<8x256xf32>
    %c0_8 = arith.constant 0 : index
    %c0_9 = arith.constant 0 : index
    %11 = vector.load %arg5[%c0_8, %c0_9] : memref<1x256xf32, #tpu.memory_space<vmem>>, vector<1x256xf32>
    %12 = vector.broadcast %11 : vector<1x256xf32> to vector<8x256xf32>
    %13 = arith.addf %10, %12 : vector<8x256xf32>
    %cst_10 = arith.constant 0.000000e+00 : f32
    %14 = vector.broadcast %cst_10 : f32 to vector<8x256xf32>
    %15 = arith.cmpf oge, %13, %14 : vector<8x256xf32>
    %cst_11 = arith.constant 0.00999999977 : f32
    %16 = vector.broadcast %cst_11 : f32 to vector<8x256xf32>
    %17 = arith.mulf %16, %13 : vector<8x256xf32>
    %18 = arith.select %15, %13, %17 : vector<8x256xi1>, vector<8x256xf32>
    %19 = arith.truncf %18 : vector<8x256xf32> to vector<8x256xbf16>
    %c0_12 = arith.constant 0 : index
    %c0_13 = arith.constant 0 : index
    %20 = vector.load %arg6[%c0_12, %c0_13] : memref<256x256xbf16, #tpu.memory_space<vmem>>, vector<256x256xbf16>
    %cst_14 = arith.constant dense<0.000000e+00> : vector<8x256xf32>
    %21 = tpu.matmul %19, %20, %cst_14 {dimension_numbers = #tpu.dot_dimension_numbers<[1], [0], [0], [1], [0, 0, 1, 1], [], []>} : vector<8x256xbf16>, vector<256x256xbf16>, vector<8x256xf32> -> vector<8x256xf32>
    %c0_15 = arith.constant 0 : index
    %c0_16 = arith.constant 0 : index
    %22 = vector.load %arg7[%c0_15, %c0_16] : memref<1x256xf32, #tpu.memory_space<vmem>>, vector<1x256xf32>
    %23 = vector.broadcast %22 : vector<1x256xf32> to vector<8x256xf32>
    %24 = arith.addf %21, %23 : vector<8x256xf32>
    %cst_17 = arith.constant 0.000000e+00 : f32
    %25 = vector.broadcast %cst_17 : f32 to vector<8x256xf32>
    %26 = arith.cmpf oge, %24, %25 : vector<8x256xf32>
    %cst_18 = arith.constant 0.00999999977 : f32
    %27 = vector.broadcast %cst_18 : f32 to vector<8x256xf32>
    %28 = arith.mulf %27, %24 : vector<8x256xf32>
    %29 = arith.select %26, %24, %28 : vector<8x256xi1>, vector<8x256xf32>
    %30 = arith.truncf %29 : vector<8x256xf32> to vector<8x256xbf16>
    %c0_19 = arith.constant 0 : index
    %c0_20 = arith.constant 0 : index
    %31 = vector.load %arg8[%c0_19, %c0_20] : memref<256x128xbf16, #tpu.memory_space<vmem>>, vector<256x128xbf16>
    %cst_21 = arith.constant dense<0.000000e+00> : vector<8x128xf32>
    %32 = tpu.matmul %30, %31, %cst_21 {dimension_numbers = #tpu.dot_dimension_numbers<[1], [0], [0], [1], [0, 0, 1, 1], [], []>} : vector<8x256xbf16>, vector<256x128xbf16>, vector<8x128xf32> -> vector<8x128xf32>
    %c0_22 = arith.constant 0 : index
    %c0_23 = arith.constant 0 : index
    %33 = vector.load %arg9[%c0_22, %c0_23] : memref<1x128xf32, #tpu.memory_space<vmem>>, vector<1x128xf32>
    %34 = vector.broadcast %33 : vector<1x128xf32> to vector<8x128xf32>
    %35 = arith.addf %32, %34 : vector<8x128xf32>
    %cst_24 = arith.constant 0.000000e+00 : f32
    %36 = vector.broadcast %cst_24 : f32 to vector<8x128xf32>
    %37 = arith.cmpf oge, %35, %36 : vector<8x128xf32>
    %cst_25 = arith.constant 0.00999999977 : f32
    %38 = vector.broadcast %cst_25 : f32 to vector<8x128xf32>
    %39 = arith.mulf %38, %35 : vector<8x128xf32>
    %40 = arith.select %37, %35, %39 : vector<8x128xi1>, vector<8x128xf32>
    %41 = tpu.transpose %40, [1, 0] : vector<8x128xf32> -> vector<128x8xf32>
    %c0_26 = arith.constant 0 : index
    %c0_27 = arith.constant 0 : index
    %42 = vector.load %arg10[%c0_26, %c0_27] : memref<128x1xf32, #tpu.memory_space<vmem>>, vector<128x1xf32>
    %43 = vector.broadcast %42 : vector<128x1xf32> to vector<128x8xf32>
    %44 = arith.mulf %41, %43 : vector<128x8xf32>
    %cst_28 = arith.constant dense<0.000000e+00> : vector<8xf32>
    %45 = vector.multi_reduction <add>, %44, %cst_28 [0] : vector<128x8xf32> to vector<8xf32>
    %46 = vector.shape_cast %45 : vector<8xf32> to vector<1x8xf32>
    %c0_29 = arith.constant 0 : index
    %c0_30 = arith.constant 0 : index
    %47 = vector.load %arg11[%c0_29, %c0_30] : memref<1x1xf32, #tpu.memory_space<vmem>>, vector<1x1xf32>
    %48 = vector.broadcast %47 : vector<1x1xf32> to vector<1x8xf32>
    %49 = arith.addf %46, %48 : vector<1x8xf32>
    %50 = vector.shape_cast %49 : vector<1x8xf32> to vector<1x1x8xf32>
    %c0_31 = arith.constant 0 : index
    %c0_32 = arith.constant 0 : index
    %c0_33 = arith.constant 0 : index
    %51 = vector.load %arg12[%c0_31, %c0_32, %c0_33] : memref<1x1x8xf32, #tpu.memory_space<vmem>>, vector<1x1x8xf32>
    tpu.vector_store %arg12[%c0_31, %c0_32, %c0_33], %50 {strides = array<i32>} : memref<1x1x8xf32, #tpu.memory_space<vmem>>, vector<1x1x8xf32>,
    return
  }
  func.func @transform_0(%arg0: i32) -> (i32, i32) {
    %c0_i32 = arith.constant 0 : i32
    %c0_i32_0 = arith.constant 0 : i32
    return %arg0, %c0_i32 : i32, i32
  }
  func.func @transform_1(%arg0: i32) -> (i32, i32) {
    %c0_i32 = arith.constant 0 : i32
    %c0_i32_0 = arith.constant 0 : i32
    %c0_i32_1 = arith.constant 0 : i32
    return %c0_i32, %c0_i32_0 : i32, i32
  }
  func.func @transform_2(%arg0: i32) -> (i32, i32) {
    %c0_i32 = arith.constant 0 : i32
    %c0_i32_0 = arith.constant 0 : i32
    %c0_i32_1 = arith.constant 0 : i32
    return %c0_i32, %c0_i32_0 : i32, i32
  }
  func.func @transform_3(%arg0: i32) -> (i32, i32) {
    %c0_i32 = arith.constant 0 : i32
    %c0_i32_0 = arith.constant 0 : i32
    %c0_i32_1 = arith.constant 0 : i32
    return %c0_i32, %c0_i32_0 : i32, i32
  }
  func.func @transform_4(%arg0: i32) -> (i32, i32) {
    %c0_i32 = arith.constant 0 : i32
    %c0_i32_0 = arith.constant 0 : i32
    %c0_i32_1 = arith.constant 0 : i32
    return %c0_i32, %c0_i32_0 : i32, i32
  }
  func.func @transform_5(%arg0: i32) -> (i32, i32) {
    %c0_i32 = arith.constant 0 : i32
    %c0_i32_0 = arith.constant 0 : i32
    %c0_i32_1 = arith.constant 0 : i32
    return %c0_i32, %c0_i32_0 : i32, i32
  }
  func.func @transform_6(%arg0: i32) -> (i32, i32) {
    %c0_i32 = arith.constant 0 : i32
    %c0_i32_0 = arith.constant 0 : i32
    %c0_i32_1 = arith.constant 0 : i32
    return %c0_i32, %c0_i32_0 : i32, i32
  }
  func.func @transform_7(%arg0: i32) -> (i32, i32) {
    %c0_i32 = arith.constant 0 : i32
    %c0_i32_0 = arith.constant 0 : i32
    %c0_i32_1 = arith.constant 0 : i32
    return %c0_i32, %c0_i32_0 : i32, i32
  }
  func.func @transform_8(%arg0: i32) -> (i32, i32) {
    %c0_i32 = arith.constant 0 : i32
    %c0_i32_0 = arith.constant 0 : i32
    %c0_i32_1 = arith.constant 0 : i32
    return %c0_i32, %c0_i32_0 : i32, i32
  }
  func.func @transform_9(%arg0: i32) -> (i32, i32) {
    %c0_i32 = arith.constant 0 : i32
    %c0_i32_0 = arith.constant 0 : i32
    %c0_i32_1 = arith.constant 0 : i32
    return %c0_i32, %c0_i32_0 : i32, i32
  }
  func.func @transform_10(%arg0: i32) -> (i32, i32) {
    %c0_i32 = arith.constant 0 : i32
    %c0_i32_0 = arith.constant 0 : i32
    %c0_i32_1 = arith.constant 0 : i32
    return %c0_i32, %c0_i32_0 : i32, i32
  }
  func.func @transform_11(%arg0: i32) -> (i32, i32, i32) {
    %c0_i32 = arith.constant 0 : i32
    %c0_i32_0 = arith.constant 0 : i32
    %c0_i32_1 = arith.constant 0 : i32
    return %arg0, %c0_i32, %c0_i32_0 : i32, i32, i32
  }
}

</mosaic_0001>

<bundles_post_ra>
// kernel: dcnv2_forward.1
= control target key start
LH: loop header
LB: loop body
LE: loop exit
PB: predicated region body
PF: predicated region fallthrough
CT: control target
= control target key end

     0   :  { %s11629_s0 = inlined_call_operand.vmem [shape: bf16[8,1088], index: 0, kind: input, shape index: {}]   ;;  %s11630_s1 = inlined_call_operand.vmem [shape: bf16[1088,1088], index: 1, kind: input, shape index: {}]   ;;  %s11631_s2 = inlined_call_operand.vmem [shape: f32[1,1088], index: 2, kind: input, shape index: {}]   ;;  %s11632_s3 = inlined_call_operand.vmem [shape: bf16[1088,256], index: 3, kind: input, shape index: {}]   ;;  %s11633_s4 = inlined_call_operand.vmem [shape: f32[1,256], index: 4, kind: input, shape index: {}]   ;;  %s11634_s5 = inlined_call_operand.vmem [shape: bf16[256,256], index: 5, kind: input, shape index: {}]   ;;  %s11635_s6 = inlined_call_operand.vmem [shape: f32[1,256], index: 6, kind: input, shape index: {}]   ;;  %s11636_s7 = inlined_call_operand.vmem [shape: bf16[256,128], index: 7, kind: input, shape index: {}]   ;;  %s11637_s8 = inlined_call_operand.vmem [shape: f32[1,128], index: 8, kind: input, shape index: {}]   ;;  %s11638_s9 = inlined_call_operand.vmem [shape: f32[128,1], index: 9, kind: input, shape index: {}]   ;;  %s11639_s10 = inlined_call_operand.<no memory space> [shape: f32[1,1], index: 10, kind: input, shape index: {}]   ;;  %s11640_s11 = inlined_call_operand.hbm [shape: f32[1,1,8], index: 11, kind: output, shape index: {}]  }
   0x1   :  { %v16_v0 = vstv %s11639_s10 }
   0x2   :  { %17 = vst [vmem:[#allocation2] sm:$0x1] %v16_v0 }
   0x3   :  { %v7702_v1 = vld [vmem:[%s11630_s1 + $0x4] ss:$36 sps:$4 sm:$0xff]   ;;  %v7704_v2 = vld [vmem:[%s11630_s1 + $0x48c] ss:$36 sps:$4 sm:$0xff]   ;;  %v7710_v6 = vld [vmem:[%s11630_s1 + $0x4d4] ss:$36 sps:$4 sm:$0xff]  }
   0x4   :  { %3948 = vmatprep.subr.bf16.mxu0 %v7702_v1  ;;  %v7706_v3 = vld [vmem:[%s11630_s1] ss:$36 sps:$4 sm:$0xff]   ;;  %v7707_v4 = vld [vmem:[%s11630_s1 + $0x488] ss:$36 sps:$4 sm:$0xff]   ;;  %4194 = vmatprep.subr.bf16.mxu1 %v7704_v2  ;;  %v7713_v8 = vld [vmem:[%s11630_s1 + $0x4d0] ss:$36 sps:$4 sm:$0xff]  }
   0x5   :  { %v7708_v5 = vld [vmem:[%s11630_s1 + $0x4c] ss:$36 sps:$4 sm:$0xff]   ;;  %3949 = vmatpush1.bf16.msra.mxu0 %v7706_v3  ;;  %4195 = vmatpush1.bf16.msra.mxu1 %v7707_v4  ;;  %v7714_v9 = vld [vmem:[%s11630_s1 + $0x94] ss:$36 sps:$4 sm:$0xff]   ;;  %v7716_v10 = vld [vmem:[%s11630_s1 + $0x51c] ss:$36 sps:$4 sm:$0xff]  }
   0x6   :  { %v7712_v7 = vld [vmem:[%s11630_s1 + $0x48] ss:$36 sps:$4 sm:$0xff]   ;;  %3950 = vmatprep.subr.bf16.mxu0 %v7708_v5  ;;  %4196 = vmatprep.subr.bf16.mxu1 %v7710_v6  ;;  %v7718_v11 = vld [vmem:[%s11630_s1 + $0x90] ss:$36 sps:$4 sm:$0xff]   ;;  %v7719_v12 = vld [vmem:[%s11630_s1 + $0x518] ss:$36 sps:$4 sm:$0xff]  }
   0x7   :  { %v7720_v13 = vld [vmem:[%s11630_s1 + $0xdc] ss:$36 sps:$4 sm:$0xff]   ;;  %v7722_v14 = vld [vmem:[%s11630_s1 + $0x564] ss:$36 sps:$4 sm:$0xff]   ;;  %v7728_v18 = vld [vmem:[%s11630_s1 + $0x5ac] ss:$36 sps:$4 sm:$0xff]  }
   0x8   :  { %v7724_v15 = vld [vmem:[%s11630_s1 + $0xd8] ss:$36 sps:$4 sm:$0xff]   ;;  %v7725_v16 = vld [vmem:[%s11630_s1 + $0x560] ss:$36 sps:$4 sm:$0xff]   ;;  %v7731_v20 = vld [vmem:[%s11630_s1 + $0x5a8] ss:$36 sps:$4 sm:$0xff]  }
   0x9   :  { %3951 = vmatpush1.bf16.msra.mxu0 %v7712_v7  ;;  %4197 = vmatpush1.bf16.msra.mxu1 %v7713_v8  ;;  %v7726_v17 = vld [vmem:[%s11630_s1 + $0x124] ss:$36 sps:$4 sm:$0xff]   ;;  %v7732_v21 = vld [vmem:[%s11630_s1 + $0x16c] ss:$36 sps:$4 sm:$0xff]   ;;  %v7734_v22 = vld [vmem:[%s11630_s1 + $0x5f4] ss:$36 sps:$4 sm:$0xff]  }
   0xa   :  { %3952 = vmatprep.subr.bf16.mxu0 %v7714_v9  ;;  %4198 = vmatprep.subr.bf16.mxu1 %v7716_v10  ;;  %v7730_v19 = vld [vmem:[%s11630_s1 + $0x120] ss:$36 sps:$4 sm:$0xff]   ;;  %v7736_v23 = vld [vmem:[%s11630_s1 + $0x168] ss:$36 sps:$4 sm:$0xff]   ;;  %v7737_v24 = vld [vmem:[%s11630_s1 + $0x5f0] ss:$36 sps:$4 sm:$0xff]  }
   0xb   :  { %v7738_v25 = vld [vmem:[%s11630_s1 + $0x1b4] ss:$36 sps:$4 sm:$0xff]   ;;  %v7740_v26 = vld [vmem:[%s11630_s1 + $0x63c] ss:$36 sps:$4 sm:$0xff]   ;;  %v7746_v30 = vld [vmem:[%s11630_s1 + $0x684] ss:$36 sps:$4 sm:$0xff]  }
   0xc   :  { %v7742_v27 = vld [vmem:[%s11630_s1 + $0x1b0] ss:$36 sps:$4 sm:$0xff]   ;;  %v7743_v28 = vld [vmem:[%s11630_s1 + $0x638] ss:$36 sps:$4 sm:$0xff]   ;;  %v7749_v32 = vld [vmem:[%s11630_s1 + $0x680] ss:$36 sps:$4 sm:$0xff]  }
   0xd   :  { %3953 = vmatpush1.bf16.msra.mxu0 %v7718_v11  ;;  %4199 = vmatpush1.bf16.msra.mxu1 %v7719_v12  ;;  %v7744_v29 = vld [vmem:[%s11630_s1 + $0x1fc] ss:$36 sps:$4 sm:$0xff]   ;;  %v7750_v33 = vld [vmem:[%s11630_s1 + $0x244] ss:$36 sps:$4 sm:$0xff]   ;;  %v7752_v34 = vld [vmem:[%s11630_s1 + $0x6cc] ss:$36 sps:$4 sm:$0xff]  }
   0xe   :  { %3954 = vmatprep.subr.bf16.mxu0 %v7720_v13  ;;  %4200 = vmatprep.subr.bf16.mxu1 %v7722_v14  ;;  %v7748_v31 = vld [vmem:[%s11630_s1 + $0x1f8] ss:$36 sps:$4 sm:$0xff]   ;;  %v7754_v35 = vld [vmem:[%s11630_s1 + $0x240] ss:$36 sps:$4 sm:$0xff]   ;;  %v7755_v36 = vld [vmem:[%s11630_s1 + $0x6c8] ss:$36 sps:$4 sm:$0xff]  }
   0xf   :  { %v7756_v37 = vld [vmem:[%s11630_s1 + $0x28c] ss:$36 sps:$4 sm:$0xff]   ;;  %v7758_v38 = vld [vmem:[%s11630_s1 + $0x714] ss:$36 sps:$4 sm:$0xff]   ;;  %v7764_v42 = vld [vmem:[%s11630_s1 + $0x75c] ss:$36 sps:$4 sm:$0xff]  }
  0x10   :  { %v7760_v39 = vld [vmem:[%s11630_s1 + $0x288] ss:$36 sps:$4 sm:$0xff]   ;;  %v7761_v40 = vld [vmem:[%s11630_s1 + $0x710] ss:$36 sps:$4 sm:$0xff]   ;;  %v7767_v44 = vld [vmem:[%s11630_s1 + $0x758] ss:$36 sps:$4 sm:$0xff]  }
  0x11   :  { %3955 = vmatpush1.bf16.msra.mxu0 %v7724_v15  ;;  %4201 = vmatpush1.bf16.msra.mxu1 %v7725_v16  ;;  %v7762_v41 = vld [vmem:[%s11630_s1 + $0x2d4] ss:$36 sps:$4 sm:$0xff]   ;;  %v7768_v45 = vld [vmem:[%s11630_s1 + $0x31c] ss:$36 sps:$4 sm:$0xff]   ;;  %v7770_v46 = vld [vmem:[%s11630_s1 + $0x7a4] ss:$36 sps:$4 sm:$0xff]  }
  0x12   :  { %3956 = vmatprep.subr.bf16.mxu0 %v7726_v17  ;;  %4202 = vmatprep.subr.bf16.mxu1 %v7728_v18  ;;  %v7766_v43 = vld [vmem:[%s11630_s1 + $0x2d0] ss:$36 sps:$4 sm:$0xff]   ;;  %v42_v47 = vld [vmem:[%s11629_s0] sm:$0xff]  ;;  %v7772_v48 = vld [vmem:[%s11630_s1 + $0x318] ss:$36 sps:$4 sm:$0xff]   ;;  %vm3944_vm0 = vcmask 523264  }
  0x13   :  { %v9104_v49 = vcombine.high %v42_v47, %v42_v47  ;;  %v7773_v50 = vld [vmem:[%s11630_s1 + $0x7a0] ss:$36 sps:$4 sm:$0xff]   ;;  %v43_v51 = vld [vmem:[%s11629_s0 + $0x8] sm:$0xff]  ;;  %v7782_v58 = vld [vmem:[%s11630_s1 + $0x834] ss:$36 sps:$4 sm:$0xff]   ;;  %v9170_v7 = vcombine.low %v42_v47, %v42_v47 }
  0x14   :  { %v7774_v52 = vld [vmem:[%s11630_s1 + $0x364] ss:$36 sps:$4 sm:$0xff]   ;;  %v7776_v53 = vld [vmem:[%s11630_s1 + $0x7ec] ss:$36 sps:$4 sm:$0xff]   ;;  %v9118_v54 = vcombine.high %v43_v51, %v43_v51  ;;  %v7786_v61 = vld [vmem:[%s11630_s1 + $0x3f4] ss:$36 sps:$4 sm:$0xff]   ;;  %v9172_v8 = vcombine.low %v43_v51, %v43_v51 }
  0x15   :  { %3957 = vmatpush1.bf16.msra.mxu0 %v7730_v19  ;;  %4203 = vmatpush1.bf16.msra.mxu1 %v7731_v20  ;;  %v7778_v55 = vld [vmem:[%s11630_s1 + $0x360] ss:$36 sps:$4 sm:$0xff]   ;;  %v7779_v56 = vld [vmem:[%s11630_s1 + $0x7e8] ss:$36 sps:$4 sm:$0xff]   ;;  %v7785_v60 = vld [vmem:[%s11630_s1 + $0x830] ss:$36 sps:$4 sm:$0xff]  }
  0x16   :  { %3958 = vmatprep.subr.bf16.mxu0 %v7732_v21  ;;  %4204 = vmatprep.subr.bf16.mxu1 %v7734_v22  ;;  %v7780_v57 = vld [vmem:[%s11630_s1 + $0x3ac] ss:$36 sps:$4 sm:$0xff]   ;;  %v7788_v62 = vld [vmem:[%s11630_s1 + $0x87c] ss:$36 sps:$4 sm:$0xff]   ;;  %v7794_v2 = vld [vmem:[%s11630_s1 + $0x8c4] ss:$36 sps:$4 sm:$0xff]  }
  0x17   :  { %3980 = vmatprep.mubr.bf16.mxu0 %v9104_v49  ;;  %4226 = vmatprep.mubr.bf16.mxu1 %v9118_v54  ;;  %v7784_v59 = vld [vmem:[%s11630_s1 + $0x3a8] ss:$36 sps:$4 sm:$0xff]   ;;  %v7790_v63 = vld [vmem:[%s11630_s1 + $0x3f0] ss:$36 sps:$4 sm:$0xff]   ;;  %v7791_v0 = vld [vmem:[%s11630_s1 + $0x878] ss:$36 sps:$4 sm:$0xff]  }
  0x18   :  { %v7792_v1 = vld [vmem:[%s11630_s1 + $0x43c] ss:$36 sps:$4 sm:$0xff]   ;;  %v7801_v5 = vld [vmem:[%s11630_s1 + $0x484] ss:$36 sps:$4 sm:$0xff]   ;;  %v7805_v6 = vld [vmem:[%s11630_s1 + $0x90c] ss:$36 sps:$4 sm:$0xff]  }
  0x19   :  { %3959 = vmatpush1.bf16.msra.mxu0 %v7736_v23  ;;  %4205 = vmatpush1.bf16.msra.mxu1 %v7737_v24  ;;  %v7796_v3 = vld [vmem:[%s11630_s1 + $0x438] ss:$36 sps:$4 sm:$0xff]   ;;  %v7797_v4 = vld [vmem:[%s11630_s1 + $0x8c0] ss:$36 sps:$4 sm:$0xff]   ;;  %v7803_v10 = vld [vmem:[%s11630_s1 + $0x908] ss:$36 sps:$4 sm:$0xff]  }
  0x1a   :  { %3960 = vmatprep.subr.bf16.mxu0 %v7738_v25  ;;  %4206 = vmatprep.subr.bf16.mxu1 %v7740_v26  ;;  %v7799_v9 = vld [vmem:[%s11630_s1 + $0x480] ss:$36 sps:$4 sm:$0xff]   ;;  %v7810_v11 = vld [vmem:[%s11630_s1 + $0x4cc] ss:$36 sps:$4 sm:$0xff]   ;;  %v7813_v12 = vld [vmem:[%s11630_s1 + $0x954] ss:$36 sps:$4 sm:$0xff]  }
  0x1b   :  { %v7808_v13 = vld [vmem:[%s11630_s1 + $0x4c8] ss:$36 sps:$4 sm:$0xff]   ;;  %v7811_v14 = vld [vmem:[%s11630_s1 + $0x950] ss:$36 sps:$4 sm:$0xff]   ;;  %v7819_v16 = vld [vmem:[%s11630_s1 + $0x99c] ss:$36 sps:$4 sm:$0xff]  }
  0x1c   :  { %v7816_v15 = vld [vmem:[%s11630_s1 + $0x514] ss:$36 sps:$4 sm:$0xff]   ;;  %v7822_v19 = vld [vmem:[%s11630_s1 + $0x55c] ss:$36 sps:$4 sm:$0xff]   ;;  %v7825_v20 = vld [vmem:[%s11630_s1 + $0x9e4] ss:$36 sps:$4 sm:$0xff]  }
  0x1d   :  { %3961 = vmatpush1.bf16.msra.mxu0 %v7742_v27  ;;  %4207 = vmatpush1.bf16.msra.mxu1 %v7743_v28  ;;  %v7814_v17 = vld [vmem:[%s11630_s1 + $0x510] ss:$36 sps:$4 sm:$0xff]   ;;  %v7817_v18 = vld [vmem:[%s11630_s1 + $0x998] ss:$36 sps:$4 sm:$0xff]   ;;  %v7823_v22 = vld [vmem:[%s11630_s1 + $0x9e0] ss:$36 sps:$4 sm:$0xff]  }
  0x1e   :  { %3962 = vmatprep.subr.bf16.mxu0 %v7744_v29  ;;  %4208 = vmatprep.subr.bf16.mxu1 %v7746_v30  ;;  %v7820_v21 = vld [vmem:[%s11630_s1 + $0x558] ss:$36 sps:$4 sm:$0xff]   ;;  %v7828_v23 = vld [vmem:[%s11630_s1 + $0x5a4] ss:$36 sps:$4 sm:$0xff]   ;;  %v7831_v24 = vld [vmem:[%s11630_s1 + $0xa2c] ss:$36 sps:$4 sm:$0xff]  }
  0x1f   :  { %v7826_v25 = vld [vmem:[%s11630_s1 + $0x5a0] ss:$36 sps:$4 sm:$0xff]   ;;  %v7829_v26 = vld [vmem:[%s11630_s1 + $0xa28] ss:$36 sps:$4 sm:$0xff]   ;;  %v7837_v28 = vld [vmem:[%s11630_s1 + $0xa74] ss:$36 sps:$4 sm:$0xff]  }
  0x20   :  { %v7834_v27 = vld [vmem:[%s11630_s1 + $0x5ec] ss:$36 sps:$4 sm:$0xff]   ;;  %v7867_v51 = vld [vmem:[%s11630_s1 + $0xbdc] ss:$36 sps:$4 sm:$0xff]  }
  0x21   :  { %3963 = vmatpush1.bf16.msra.mxu0 %v7748_v31  ;;  %4209 = vmatpush1.bf16.msra.mxu1 %v7749_v32  ;;  %v7832_v29 = vld [vmem:[%s11630_s1 + $0x5e8] ss:$36 sps:$4 sm:$0xff]   ;;  %v7835_v30 = vld [vmem:[%s11630_s1 + $0xa70] ss:$36 sps:$4 sm:$0xff]   ;;  %v7843_v32 = vld [vmem:[%s11630_s1 + $0xabc] ss:$36 sps:$4 sm:$0xff]  }
  0x22   :  { %3964 = vmatprep.subr.bf16.mxu0 %v7750_v33  ;;  %4210 = vmatprep.subr.bf16.mxu1 %v7752_v34  ;;  %v7840_v31 = vld [vmem:[%s11630_s1 + $0x634] ss:$36 sps:$4 sm:$0xff]   ;;  %v7856_v47 = vld [vmem:[%s11630_s1 + $0x708] ss:$36 sps:$4 sm:$0xff]  }
  0x23   :  { %v7838_v33 = vld [vmem:[%s11630_s1 + $0x630] ss:$36 sps:$4 sm:$0xff]  }
  0x24   :  { %v9255_v34 = vld [vmem:[%s11629_s0 + $0x10] sm:$0xff] }
  0x25   :  { %3965 = vmatpush1.bf16.msra.mxu0 %v7754_v35  ;;  %4211 = vmatpush1.bf16.msra.mxu1 %v7755_v36  ;;  %v7841_v35 = vld [vmem:[%s11630_s1 + $0xab8] ss:$36 sps:$4 sm:$0xff]  }
  0x26   :  { %3966 = vmatprep.subr.bf16.mxu0 %v7756_v37  ;;  %4212 = vmatprep.subr.bf16.mxu1 %v7758_v38  ;;  %v7846_v36 = vld [vmem:[%s11630_s1 + $0x67c] ss:$36 sps:$4 sm:$0xff]   ;;  %v9265_v37 = vcombine.high %v9255_v34, %v9255_v34  ;;  %v7849_v38 = vld [vmem:[%s11630_s1 + $0xb04] ss:$36 sps:$4 sm:$0xff]  }
  0x29   :  { %3967 = vmatpush1.bf16.msra.mxu0 %v7760_v39  ;;  %4213 = vmatpush1.bf16.msra.mxu1 %v7761_v40  ;;  %v7844_v39 = vld [vmem:[%s11630_s1 + $0x678] ss:$36 sps:$4 sm:$0xff]   ;;  %v7847_v40 = vld [vmem:[%s11630_s1 + $0xb00] ss:$36 sps:$4 sm:$0xff]  }
  0x2a   :  { %3968 = vmatprep.subr.bf16.mxu0 %v7762_v41  ;;  %4214 = vmatprep.subr.bf16.mxu1 %v7764_v42  ;;  %v7852_v41 = vld [vmem:[%s11630_s1 + $0x6c4] ss:$36 sps:$4 sm:$0xff]   ;;  %v7855_v42 = vld [vmem:[%s11630_s1 + $0xb4c] ss:$36 sps:$4 sm:$0xff]  }
  0x2d   :  { %3969 = vmatpush1.bf16.msra.mxu0 %v7766_v43  ;;  %4215 = vmatpush1.bf16.msra.mxu1 %v7767_v44  ;;  %v7850_v43 = vld [vmem:[%s11630_s1 + $0x6c0] ss:$36 sps:$4 sm:$0xff]   ;;  %v7853_v44 = vld [vmem:[%s11630_s1 + $0xb48] ss:$36 sps:$4 sm:$0xff]  }
  0x2e   :  { %3970 = vmatprep.subr.bf16.mxu0 %v7768_v45  ;;  %4216 = vmatprep.subr.bf16.mxu1 %v7770_v46  ;;  %v7858_v45 = vld [vmem:[%s11630_s1 + $0x70c] ss:$36 sps:$4 sm:$0xff]   ;;  %v7861_v46 = vld [vmem:[%s11630_s1 + $0xb94] ss:$36 sps:$4 sm:$0xff]  }
  0x31   :  { %3971 = vmatpush1.bf16.msra.mxu0 %v7772_v48  ;;  %4217 = vmatpush1.bf16.msra.mxu1 %v7773_v50  ;;  %v7859_v48 = vld [vmem:[%s11630_s1 + $0xb90] ss:$36 sps:$4 sm:$0xff]  }
  0x32   :  { %3972 = vmatprep.subr.bf16.mxu0 %v7774_v52  ;;  %4218 = vmatprep.subr.bf16.mxu1 %v7776_v53  ;;  %v7864_v50 = vld [vmem:[%s11630_s1 + $0x754] ss:$36 sps:$4 sm:$0xff]  }
  0x33   :  { %v7862_v52 = vld [vmem:[%s11630_s1 + $0x750] ss:$36 sps:$4 sm:$0xff]   ;;  %v7865_v53 = vld [vmem:[%s11630_s1 + $0xbd8] ss:$36 sps:$4 sm:$0xff]  }
  0x35   :  { %3973 = vmatpush1.bf16.msra.mxu0 %v7778_v55  ;;  %4219 = vmatpush1.bf16.msra.mxu1 %v7779_v56  ;;  %v7870_v55 = vld [vmem:[%s11630_s1 + $0x79c] ss:$36 sps:$4 sm:$0xff]   ;;  %v7873_v56 = vld [vmem:[%s11630_s1 + $0xc24] ss:$36 sps:$4 sm:$0xff]  }
  0x36   :  { %3974 = vmatprep.subr.bf16.mxu0 %v7780_v57  ;;  %4220 = vmatprep.subr.bf16.mxu1 %v7782_v58  ;;  %v7868_v57 = vld [vmem:[%s11630_s1 + $0x798] ss:$36 sps:$4 sm:$0xff]   ;;  %v7871_v58 = vld [vmem:[%s11630_s1 + $0xc20] ss:$36 sps:$4 sm:$0xff]  }
  0x39   :  { %3975 = vmatpush1.bf16.msra.mxu0 %v7784_v59  ;;  %4221 = vmatpush1.bf16.msra.mxu1 %v7785_v60  ;;  %v7876_v59 = vld [vmem:[%s11630_s1 + $0x7e4] ss:$36 sps:$4 sm:$0xff]   ;;  %v7879_v60 = vld [vmem:[%s11630_s1 + $0xc6c] ss:$36 sps:$4 sm:$0xff]  }
  0x3a   :  { %3976 = vmatprep.subr.bf16.mxu0 %v7786_v61  ;;  %4222 = vmatprep.subr.bf16.mxu1 %v7788_v62  ;;  %v7874_v61 = vld [vmem:[%s11630_s1 + $0x7e0] ss:$36 sps:$4 sm:$0xff]   ;;  %v7877_v62 = vld [vmem:[%s11630_s1 + $0xc68] ss:$36 sps:$4 sm:$0xff]  }
  0x3d   :  { %3977 = vmatpush1.bf16.msra.mxu0 %v7790_v63  ;;  %4223 = vmatpush1.bf16.msra.mxu1 %v7791_v0  ;;  %v7882_v63 = vld [vmem:[%s11630_s1 + $0x82c] ss:$36 sps:$4 sm:$0xff]   ;;  %v7885_v0 = vld [vmem:[%s11630_s1 + $0xcb4] ss:$36 sps:$4 sm:$0xff]  }
  0x3e   :  { %3978 = vmatprep.subr.bf16.mxu0 %v7792_v1  ;;  %4224 = vmatprep.subr.bf16.mxu1 %v7794_v2  ;;  %v7880_v1 = vld [vmem:[%s11630_s1 + $0x828] ss:$36 sps:$4 sm:$0xff]   ;;  %v7883_v2 = vld [vmem:[%s11630_s1 + $0xcb0] ss:$36 sps:$4 sm:$0xff]  }
  0x41   :  { %3979 = vmatpush1.bf16.msra.mxu0 %v7796_v3  ;;  %4225 = vmatpush1.bf16.msra.mxu1 %v7797_v4  ;;  %v7888_v3 = vld [vmem:[%s11630_s1 + $0x874] ss:$36 sps:$4 sm:$0xff]   ;;  %v7891_v4 = vld [vmem:[%s11630_s1 + $0xcfc] ss:$36 sps:$4 sm:$0xff]  }
  0x42   :  { %3989 = vmatprep.subr.bf16.mxu0 %v7801_v5  ;;  %4235 = vmatprep.subr.bf16.mxu1 %v7805_v6  ;;  %v7886_v5 = vld [vmem:[%s11630_s1 + $0x870] ss:$36 sps:$4 sm:$0xff]   ;;  %v7889_v6 = vld [vmem:[%s11630_s1 + $0xcf8] ss:$36 sps:$4 sm:$0xff]  }
  0x44   :  { %3981 = vmatmul.mubr.bf16.vlgmr.msra.gmra.mrb[0].mxu0 %v9170_v7  ;;  %4227 = vmatmul.mubr.bf16.vlgmr.msra.gmra.mrb[0].mxu1 %v9172_v8 }
  0x45   :  { %3990 = vmatpush1.bf16.msra.mxu0 %v7799_v9  ;;  %4236 = vmatpush1.bf16.msra.mxu1 %v7803_v10  ;;  %v7894_v9 = vld [vmem:[%s11630_s1 + $0x8bc] ss:$36 sps:$4 sm:$0xff]   ;;  %v7897_v10 = vld [vmem:[%s11630_s1 + $0xd44] ss:$36 sps:$4 sm:$0xff]  }
  0x46   :  { %3991 = vmatprep.subr.bf16.mxu0 %v7810_v11  ;;  %4237 = vmatprep.subr.bf16.mxu1 %v7813_v12  ;;  %v7892_v11 = vld [vmem:[%s11630_s1 + $0x8b8] ss:$36 sps:$4 sm:$0xff]   ;;  %v7895_v12 = vld [vmem:[%s11630_s1 + $0xd40] ss:$36 sps:$4 sm:$0xff]  }
  0x47   :  { %4021 = vmatprep.mubr.bf16.mxu0 %v9118_v54  ;;  %4267 = vmatprep.mubr.bf16.mxu1 %v9265_v37 }
  0x49   :  { %3992 = vmatpush1.bf16.msra.mxu0 %v7808_v13  ;;  %4238 = vmatpush1.bf16.msra.mxu1 %v7811_v14  ;;  %v7900_v13 = vld [vmem:[%s11630_s1 + $0x904] ss:$36 sps:$4 sm:$0xff]   ;;  %v7904_v14 = vld [vmem:[%s11630_s1 + $0xd8c] ss:$36 sps:$4 sm:$0xff]  }
  0x4a   :  { %3993 = vmatprep.subr.bf16.mxu0 %v7816_v15  ;;  %4239 = vmatprep.subr.bf16.mxu1 %v7819_v16  ;;  %v7898_v15 = vld [vmem:[%s11630_s1 + $0x900] ss:$36 sps:$4 sm:$0xff]   ;;  %v7902_v16 = vld [vmem:[%s11630_s1 + $0xd88] ss:$36 sps:$4 sm:$0xff]  }
  0x4d   :  { %3994 = vmatpush1.bf16.msra.mxu0 %v7814_v17  ;;  %4240 = vmatpush1.bf16.msra.mxu1 %v7817_v18  ;;  %v9387_v17 = vcombine.low %v9255_v34, %v9255_v34  ;;  %v7908_v18 = vld [vmem:[%s11630_s1 + $0x94c] ss:$36 sps:$4 sm:$0xff]   ;;  %v7924_v34 = vld [vmem:[%s11630_s1 + $0xa20] ss:$36 sps:$4 sm:$0xff]  }
  0x4e   :  { %3995 = vmatprep.subr.bf16.mxu0 %v7822_v19  ;;  %4241 = vmatprep.subr.bf16.mxu1 %v7825_v20  ;;  %v7911_v19 = vld [vmem:[%s11630_s1 + $0xdd4] ss:$36 sps:$4 sm:$0xff]  }
  0x4f   :  { %v9398_v20 = vld [vmem:[%s11629_s0 + $0x18] sm:$0xff] }
  0x51   :  { %3996 = vmatpush1.bf16.msra.mxu0 %v7820_v21  ;;  %4242 = vmatpush1.bf16.msra.mxu1 %v7823_v22  ;;  %v9402_v21 = vcombine.high %v9398_v20, %v9398_v20  ;;  %v7906_v22 = vld [vmem:[%s11630_s1 + $0x948] ss:$36 sps:$4 sm:$0xff]  }
  0x52   :  { %3997 = vmatprep.subr.bf16.mxu0 %v7828_v23  ;;  %4243 = vmatprep.subr.bf16.mxu1 %v7831_v24  ;;  %v7909_v23 = vld [vmem:[%s11630_s1 + $0xdd0] ss:$36 sps:$4 sm:$0xff]  }
  0x53   :  { %v7914_v24 = vld [vmem:[%s11630_s1 + $0x994] ss:$36 sps:$4 sm:$0xff]  }
  0x55   :  { %3998 = vmatpush1.bf16.msra.mxu0 %v7826_v25  ;;  %4244 = vmatpush1.bf16.msra.mxu1 %v7829_v26  ;;  %v7917_v25 = vld [vmem:[%s11630_s1 + $0xe1c] ss:$36 sps:$4 sm:$0xff]   ;;  %v7912_v26 = vld [vmem:[%s11630_s1 + $0x990] ss:$36 sps:$4 sm:$0xff]  }
  0x56   :  { %3999 = vmatprep.subr.bf16.mxu0 %v7834_v27  ;;  %4245 = vmatprep.subr.bf16.mxu1 %v7837_v28  ;;  %v7915_v27 = vld [vmem:[%s11630_s1 + $0xe18] ss:$36 sps:$4 sm:$0xff]  }
  0x57   :  { %v7920_v28 = vld [vmem:[%s11630_s1 + $0x9dc] ss:$36 sps:$4 sm:$0xff]  }
  0x59   :  { %4000 = vmatpush1.bf16.msra.mxu0 %v7832_v29  ;;  %4246 = vmatpush1.bf16.msra.mxu1 %v7835_v30  ;;  %v7923_v29 = vld [vmem:[%s11630_s1 + $0xe64] ss:$36 sps:$4 sm:$0xff]   ;;  %v7918_v30 = vld [vmem:[%s11630_s1 + $0x9d8] ss:$36 sps:$4 sm:$0xff]  }
  0x5a   :  { %4001 = vmatprep.subr.bf16.mxu0 %v7840_v31  ;;  %4247 = vmatprep.subr.bf16.mxu1 %v7843_v32  ;;  %v7921_v31 = vld [vmem:[%s11630_s1 + $0xe60] ss:$36 sps:$4 sm:$0xff]  }
  0x5b   :  { %v7926_v32 = vld [vmem:[%s11630_s1 + $0xa24] ss:$36 sps:$4 sm:$0xff]  }
  0x5d   :  { %4002 = vmatpush1.bf16.msra.mxu0 %v7838_v33  ;;  %4248 = vmatpush1.bf16.msra.mxu1 %v7841_v35  ;;  %v7929_v33 = vld [vmem:[%s11630_s1 + $0xeac] ss:$36 sps:$4 sm:$0xff]  }
  0x5e   :  { %4003 = vmatprep.subr.bf16.mxu0 %v7846_v36  ;;  %4249 = vmatprep.subr.bf16.mxu1 %v7849_v38  ;;  %v7927_v35 = vld [vmem:[%s11630_s1 + $0xea8] ss:$36 sps:$4 sm:$0xff]   ;;  %v7935_v38 = vld [vmem:[%s11630_s1 + $0xef4] ss:$36 sps:$4 sm:$0xff]  }
  0x5f   :  { %v7932_v36 = vld [vmem:[%s11630_s1 + $0xa6c] ss:$36 sps:$4 sm:$0xff]  }
  0x61   :  { %4004 = vmatpush1.bf16.msra.mxu0 %v7844_v39  ;;  %4250 = vmatpush1.bf16.msra.mxu1 %v7847_v40  ;;  %v8893_v39 = vmov 0   ;;  %v7930_v40 = vld [vmem:[%s11630_s1 + $0xa68] ss:$36 sps:$4 sm:$0xff]  }
  0x62   :  { %4005 = vmatprep.subr.bf16.mxu0 %v7852_v41  ;;  %4251 = vmatprep.subr.bf16.mxu1 %v7855_v42  ;;  %v7933_v41 = vld [vmem:[%s11630_s1 + $0xef0] ss:$36 sps:$4 sm:$0xff]  }
  0x63   :  { %7701 = vset.pattern.permute.xlu1 %v8893_v39  ;;  %v7938_v42 = vld [vmem:[%s11630_s1 + $0xab4] ss:$36 sps:$4 sm:$0xff]  }
  0x65   :  { %4006 = vmatpush1.bf16.msra.mxu0 %v7850_v43  ;;  %4252 = vmatpush1.bf16.msra.mxu1 %v7853_v44  ;;  %v7941_v43 = vld [vmem:[%s11630_s1 + $0xf3c] ss:$36 sps:$4 sm:$0xff]   ;;  %v7936_v44 = vld [vmem:[%s11630_s1 + $0xab0] ss:$36 sps:$4 sm:$0xff]  }
  0x66   :  { %4007 = vmatprep.subr.bf16.mxu0 %v7858_v45  ;;  %4253 = vmatprep.subr.bf16.mxu1 %v7861_v46  ;;  %v7939_v45 = vld [vmem:[%s11630_s1 + $0xf38] ss:$36 sps:$4 sm:$0xff]  }
  0x67   :  { %v7944_v46 = vld [vmem:[%s11630_s1 + $0xafc] ss:$36 sps:$4 sm:$0xff]  }
  0x69   :  { %4008 = vmatpush1.bf16.msra.mxu0 %v7856_v47  ;;  %4254 = vmatpush1.bf16.msra.mxu1 %v7859_v48  ;;  %v7947_v47 = vld [vmem:[%s11630_s1 + $0xf84] ss:$36 sps:$4 sm:$0xff]   ;;  %v7942_v48 = vld [vmem:[%s11630_s1 + $0xaf8] ss:$36 sps:$4 sm:$0xff]  }
  0x6a   :  { %4009 = vmatprep.subr.bf16.mxu0 %v7864_v50  ;;  %4255 = vmatprep.subr.bf16.mxu1 %v7867_v51  ;;  %v7945_v50 = vld [vmem:[%s11630_s1 + $0xf80] ss:$36 sps:$4 sm:$0xff]  }
  0x6b   :  { %v7950_v51 = vld [vmem:[%s11630_s1 + $0xb44] ss:$36 sps:$4 sm:$0xff]  }
  0x6d   :  { %4010 = vmatpush1.bf16.msra.mxu0 %v7862_v52  ;;  %4256 = vmatpush1.bf16.msra.mxu1 %v7865_v53  ;;  %v7953_v52 = vld [vmem:[%s11630_s1 + $0xfcc] ss:$36 sps:$4 sm:$0xff]   ;;  %v7948_v53 = vld [vmem:[%s11630_s1 + $0xb40] ss:$36 sps:$4 sm:$0xff]  }
  0x6e   :  { %4011 = vmatprep.subr.bf16.mxu0 %v7870_v55  ;;  %4257 = vmatprep.subr.bf16.mxu1 %v7873_v56  ;;  %v7951_v55 = vld [vmem:[%s11630_s1 + $0xfc8] ss:$36 sps:$4 sm:$0xff]  }
  0x6f   :  { %v7956_v56 = vld [vmem:[%s11630_s1 + $0xb8c] ss:$36 sps:$4 sm:$0xff]  }
  0x71   :  { %4012 = vmatpush1.bf16.msra.mxu0 %v7868_v57  ;;  %4258 = vmatpush1.bf16.msra.mxu1 %v7871_v58  ;;  %v7959_v57 = vld [vmem:[%s11630_s1 + $0x1014] ss:$36 sps:$4 sm:$0xff]   ;;  %v7954_v58 = vld [vmem:[%s11630_s1 + $0xb88] ss:$36 sps:$4 sm:$0xff]  }
  0x72   :  { %4013 = vmatprep.subr.bf16.mxu0 %v7876_v59  ;;  %4259 = vmatprep.subr.bf16.mxu1 %v7879_v60  ;;  %v7957_v59 = vld [vmem:[%s11630_s1 + $0x1010] ss:$36 sps:$4 sm:$0xff]  }
  0x73   :  { %v7962_v60 = vld [vmem:[%s11630_s1 + $0xbd4] ss:$36 sps:$4 sm:$0xff]  }
  0x75   :  { %4014 = vmatpush1.bf16.msra.mxu0 %v7874_v61  ;;  %4260 = vmatpush1.bf16.msra.mxu1 %v7877_v62  ;;  %v7965_v61 = vld [vmem:[%s11630_s1 + $0x105c] ss:$36 sps:$4 sm:$0xff]   ;;  %v7960_v62 = vld [vmem:[%s11630_s1 + $0xbd0] ss:$36 sps:$4 sm:$0xff]  }
  0x76   :  { %4015 = vmatprep.subr.bf16.mxu0 %v7882_v63  ;;  %4261 = vmatprep.subr.bf16.mxu1 %v7885_v0  ;;  %v7963_v63 = vld [vmem:[%s11630_s1 + $0x1058] ss:$36 sps:$4 sm:$0xff]  }
  0x77   :  { %v7968_v0 = vld [vmem:[%s11630_s1 + $0xc1c] ss:$36 sps:$4 sm:$0xff]  }
  0x79   :  { %4016 = vmatpush1.bf16.msra.mxu0 %v7880_v1  ;;  %4262 = vmatpush1.bf16.msra.mxu1 %v7883_v2  ;;  %v7971_v1 = vld [vmem:[%s11630_s1 + $0x10a4] ss:$36 sps:$4 sm:$0xff]   ;;  %v7966_v2 = vld [vmem:[%s11630_s1 + $0xc18] ss:$36 sps:$4 sm:$0xff]  }
  0x7a   :  { %4017 = vmatprep.subr.bf16.mxu0 %v7888_v3  ;;  %4263 = vmatprep.subr.bf16.mxu1 %v7891_v4  ;;  %v7969_v3 = vld [vmem:[%s11630_s1 + $0x10a0] ss:$36 sps:$4 sm:$0xff]  }
  0x7b   :  { %v7974_v4 = vld [vmem:[%s11630_s1 + $0xc64] ss:$36 sps:$4 sm:$0xff]  }
  0x7d   :  { %4018 = vmatpush1.bf16.msra.mxu0 %v7886_v5  ;;  %4264 = vmatpush1.bf16.msra.mxu1 %v7889_v6  ;;  %v7977_v5 = vld [vmem:[%s11630_s1 + $0x10ec] ss:$36 sps:$4 sm:$0xff]   ;;  %v7972_v6 = vld [vmem:[%s11630_s1 + $0xc60] ss:$36 sps:$4 sm:$0xff]  }
  0x7e   :  { %4019 = vmatprep.subr.bf16.mxu0 %v7894_v9  ;;  %4265 = vmatprep.subr.bf16.mxu1 %v7897_v10  ;;  %v7975_v9 = vld [vmem:[%s11630_s1 + $0x10e8] ss:$36 sps:$4 sm:$0xff]  }
  0x7f   :  { %v7980_v10 = vld [vmem:[%s11630_s1 + $0xcac] ss:$36 sps:$4 sm:$0xff]  }
  0x81   :  { %4020 = vmatpush1.bf16.msra.mxu0 %v7892_v11  ;;  %4266 = vmatpush1.bf16.msra.mxu1 %v7895_v12  ;;  %v7983_v11 = vld [vmem:[%s11630_s1 + $0x1134] ss:$36 sps:$4 sm:$0xff]   ;;  %v7978_v12 = vld [vmem:[%s11630_s1 + $0xca8] ss:$36 sps:$4 sm:$0xff]  }
  0x82   :  { %4030 = vmatprep.subr.bf16.mxu0 %v7900_v13  ;;  %4276 = vmatprep.subr.bf16.mxu1 %v7904_v14  ;;  %v7981_v13 = vld [vmem:[%s11630_s1 + $0x1130] ss:$36 sps:$4 sm:$0xff]  }
  0x83   :  { %v7986_v14 = vld [vmem:[%s11630_s1 + $0xcf4] ss:$36 sps:$4 sm:$0xff]  }
  0x84   :  { %4022 = vmatmul.mubr.bf16.vlgmr.msra.gmra.mrb[0].mxu0 %v9172_v8  ;;  %4268 = vmatmul.mubr.bf16.vlgmr.msra.gmra.mrb[0].mxu1 %v9387_v17 }
  0x85   :  { %4031 = vmatpush1.bf16.msra.mxu0 %v7898_v15  ;;  %4277 = vmatpush1.bf16.msra.mxu1 %v7902_v16  ;;  %v7989_v15 = vld [vmem:[%s11630_s1 + $0x117c] ss:$36 sps:$4 sm:$0xff]   ;;  %v7984_v16 = vld [vmem:[%s11630_s1 + $0xcf0] ss:$36 sps:$4 sm:$0xff]  }
  0x86   :  { %4032 = vmatprep.subr.bf16.mxu0 %v7908_v18  ;;  %4278 = vmatprep.subr.bf16.mxu1 %v7911_v19  ;;  %v7987_v18 = vld [vmem:[%s11630_s1 + $0x1178] ss:$36 sps:$4 sm:$0xff]  }
  0x87   :  { %4308 = vmatprep.mubr.bf16.mxu1 %v9402_v21  ;;  %4062 = vmatprep.mubr.bf16.mxu0 %v9265_v37  ;;  %v7992_v19 = vld [vmem:[%s11630_s1 + $0xd3c] ss:$36 sps:$4 sm:$0xff]  }
  0x89   :  { %4033 = vmatpush1.bf16.msra.mxu0 %v7906_v22  ;;  %4279 = vmatpush1.bf16.msra.mxu1 %v7909_v23  ;;  %v7995_v22 = vld [vmem:[%s11630_s1 + $0x11c4] ss:$36 sps:$4 sm:$0xff]   ;;  %v7990_v23 = vld [vmem:[%s11630_s1 + $0xd38] ss:$36 sps:$4 sm:$0xff]  }
  0x8a   :  { %4034 = vmatprep.subr.bf16.mxu0 %v7914_v24  ;;  %4280 = vmatprep.subr.bf16.mxu1 %v7917_v25  ;;  %v7993_v24 = vld [vmem:[%s11630_s1 + $0x11c0] ss:$36 sps:$4 sm:$0xff]  }
  0x8b   :  { %v7999_v25 = vld [vmem:[%s11630_s1 + $0xd84] ss:$36 sps:$4 sm:$0xff]  }
  0x8d   :  { %4035 = vmatpush1.bf16.msra.mxu0 %v7912_v26  ;;  %4281 = vmatpush1.bf16.msra.mxu1 %v7915_v27  ;;  %v8003_v26 = vld [vmem:[%s11630_s1 + $0x1c] ss:$36 sps:$4 sm:$0xff]  }
  0x8e   :  { %4036 = vmatprep.subr.bf16.mxu0 %v7920_v28  ;;  %4282 = vmatprep.subr.bf16.mxu1 %v7923_v29  ;;  %v7997_v27 = vld [vmem:[%s11630_s1 + $0xd80] ss:$36 sps:$4 sm:$0xff]   ;;  %v9594_v28 = vcombine.low %v9398_v20, %v9398_v20  ;;  %v8001_v29 = vld [vmem:[%s11630_s1 + $0x18] ss:$36 sps:$4 sm:$0xff]   ;;  %v8004_v20 = vld [vmem:[%s11630_s1 + $0xdc8] ss:$36 sps:$4 sm:$0xff]  }
  0x91   :  { %4037 = vmatpush1.bf16.msra.mxu0 %v7918_v30  ;;  %4283 = vmatpush1.bf16.msra.mxu1 %v7921_v31  ;;  %v8006_v30 = vld [vmem:[%s11630_s1 + $0xdcc] ss:$36 sps:$4 sm:$0xff]   ;;  %v8009_v31 = vld [vmem:[%s11630_s1 + $0x64] ss:$36 sps:$4 sm:$0xff]  }
  0x92   :  { %4038 = vmatprep.subr.bf16.mxu0 %v7926_v32  ;;  %4284 = vmatprep.subr.bf16.mxu1 %v7929_v33  ;;  %v8007_v32 = vld [vmem:[%s11630_s1 + $0x60] ss:$36 sps:$4 sm:$0xff]   ;;  %v8012_v33 = vld [vmem:[%s11630_s1 + $0xe14] ss:$36 sps:$4 sm:$0xff]  }
  0x95   :  { %4039 = vmatpush1.bf16.msra.mxu0 %v7924_v34  ;;  %4285 = vmatpush1.bf16.msra.mxu1 %v7927_v35  ;;  %v8015_v34 = vld [vmem:[%s11630_s1 + $0xac] ss:$36 sps:$4 sm:$0xff]  }
  0x96   :  { %4040 = vmatprep.subr.bf16.mxu0 %v7932_v36  ;;  %4286 = vmatprep.subr.bf16.mxu1 %v7935_v38  ;;  %v8010_v35 = vld [vmem:[%s11630_s1 + $0xe10] ss:$36 sps:$4 sm:$0xff]   ;;  %v8013_v36 = vld [vmem:[%s11630_s1 + $0xa8] ss:$36 sps:$4 sm:$0xff]   ;;  %v8018_v38 = vld [vmem:[%s11630_s1 + $0xe5c] ss:$36 sps:$4 sm:$0xff]  }
  0x99   :  { %4041 = vmatpush1.bf16.msra.mxu0 %v7930_v40  ;;  %4287 = vmatpush1.bf16.msra.mxu1 %v7933_v41  ;;  %v8021_v40 = vld [vmem:[%s11630_s1 + $0xf4] ss:$36 sps:$4 sm:$0xff]  }
  0x9a   :  { %4042 = vmatprep.subr.bf16.mxu0 %v7938_v42  ;;  %4288 = vmatprep.subr.bf16.mxu1 %v7941_v43  ;;  %v8016_v41 = vld [vmem:[%s11630_s1 + $0xe58] ss:$36 sps:$4 sm:$0xff]   ;;  %v8019_v42 = vld [vmem:[%s11630_s1 + $0xf0] ss:$36 sps:$4 sm:$0xff]   ;;  %v8024_v43 = vld [vmem:[%s11630_s1 + $0xea4] ss:$36 sps:$4 sm:$0xff]  }
  0x9d   :  { %4043 = vmatpush1.bf16.msra.mxu0 %v7936_v44  ;;  %4289 = vmatpush1.bf16.msra.mxu1 %v7939_v45  ;;  %v8027_v44 = vld [vmem:[%s11630_s1 + $0x13c] ss:$36 sps:$4 sm:$0xff]  }
  0x9e   :  { %4044 = vmatprep.subr.bf16.mxu0 %v7944_v46  ;;  %4290 = vmatprep.subr.bf16.mxu1 %v7947_v47  ;;  %v8022_v45 = vld [vmem:[%s11630_s1 + $0xea0] ss:$36 sps:$4 sm:$0xff]   ;;  %v8025_v46 = vld [vmem:[%s11630_s1 + $0x138] ss:$36 sps:$4 sm:$0xff]   ;;  %v8030_v47 = vld [vmem:[%s11630_s1 + $0xeec] ss:$36 sps:$4 sm:$0xff]  }
  0xa1   :  { %4045 = vmatpush1.bf16.msra.mxu0 %v7942_v48  ;;  %4291 = vmatpush1.bf16.msra.mxu1 %v7945_v50  ;;  %v8033_v48 = vld [vmem:[%s11630_s1 + $0x184] ss:$36 sps:$4 sm:$0xff]  }
  0xa2   :  { %4046 = vmatprep.subr.bf16.mxu0 %v7950_v51  ;;  %4292 = vmatprep.subr.bf16.mxu1 %v7953_v52  ;;  %v8028_v50 = vld [vmem:[%s11630_s1 + $0xee8] ss:$36 sps:$4 sm:$0xff]   ;;  %v8031_v51 = vld [vmem:[%s11630_s1 + $0x180] ss:$36 sps:$4 sm:$0xff]   ;;  %v8036_v52 = vld [vmem:[%s11630_s1 + $0xf34] ss:$36 sps:$4 sm:$0xff]  }
  0xa5   :  { %4047 = vmatpush1.bf16.msra.mxu0 %v7948_v53  ;;  %4293 = vmatpush1.bf16.msra.mxu1 %v7951_v55  ;;  %v8039_v53 = vld [vmem:[%s11630_s1 + $0x1cc] ss:$36 sps:$4 sm:$0xff]  }
  0xa6   :  { %4048 = vmatprep.subr.bf16.mxu0 %v7956_v56  ;;  %4294 = vmatprep.subr.bf16.mxu1 %v7959_v57  ;;  %v8034_v55 = vld [vmem:[%s11630_s1 + $0xf30] ss:$36 sps:$4 sm:$0xff]   ;;  %v8037_v56 = vld [vmem:[%s11630_s1 + $0x1c8] ss:$36 sps:$4 sm:$0xff]   ;;  %v8042_v57 = vld [vmem:[%s11630_s1 + $0xf7c] ss:$36 sps:$4 sm:$0xff]  }
  0xa9   :  { %4049 = vmatpush1.bf16.msra.mxu0 %v7954_v58  ;;  %4295 = vmatpush1.bf16.msra.mxu1 %v7957_v59  ;;  %v8045_v58 = vld [vmem:[%s11630_s1 + $0x214] ss:$36 sps:$4 sm:$0xff]  }
  0xaa   :  { %4050 = vmatprep.subr.bf16.mxu0 %v7962_v60  ;;  %4296 = vmatprep.subr.bf16.mxu1 %v7965_v61  ;;  %v8040_v59 = vld [vmem:[%s11630_s1 + $0xf78] ss:$36 sps:$4 sm:$0xff]   ;;  %v8043_v60 = vld [vmem:[%s11630_s1 + $0x210] ss:$36 sps:$4 sm:$0xff]   ;;  %v8048_v61 = vld [vmem:[%s11630_s1 + $0xfc4] ss:$36 sps:$4 sm:$0xff]  }
  0xad   :  { %4051 = vmatpush1.bf16.msra.mxu0 %v7960_v62  ;;  %4297 = vmatpush1.bf16.msra.mxu1 %v7963_v63  ;;  %v8051_v62 = vld [vmem:[%s11630_s1 + $0x25c] ss:$36 sps:$4 sm:$0xff]  }
  0xae   :  { %4052 = vmatprep.subr.bf16.mxu0 %v7968_v0  ;;  %4298 = vmatprep.subr.bf16.mxu1 %v7971_v1  ;;  %v8046_v63 = vld [vmem:[%s11630_s1 + $0xfc0] ss:$36 sps:$4 sm:$0xff]   ;;  %v8049_v0 = vld [vmem:[%s11630_s1 + $0x258] ss:$36 sps:$4 sm:$0xff]   ;;  %v8054_v1 = vld [vmem:[%s11630_s1 + $0x100c] ss:$36 sps:$4 sm:$0xff]  }
  0xb1   :  { %4053 = vmatpush1.bf16.msra.mxu0 %v7966_v2  ;;  %4299 = vmatpush1.bf16.msra.mxu1 %v7969_v3  ;;  %v8057_v2 = vld [vmem:[%s11630_s1 + $0x2a4] ss:$36 sps:$4 sm:$0xff]  }
  0xb2   :  { %4054 = vmatprep.subr.bf16.mxu0 %v7974_v4  ;;  %4300 = vmatprep.subr.bf16.mxu1 %v7977_v5  ;;  %v8052_v3 = vld [vmem:[%s11630_s1 + $0x1008] ss:$36 sps:$4 sm:$0xff]   ;;  %v8055_v4 = vld [vmem:[%s11630_s1 + $0x2a0] ss:$36 sps:$4 sm:$0xff]   ;;  %v8060_v5 = vld [vmem:[%s11630_s1 + $0x1054] ss:$36 sps:$4 sm:$0xff]  }
  0xb5   :  { %4055 = vmatpush1.bf16.msra.mxu0 %v7972_v6  ;;  %4301 = vmatpush1.bf16.msra.mxu1 %v7975_v9  ;;  %v8063_v6 = vld [vmem:[%s11630_s1 + $0x2ec] ss:$36 sps:$4 sm:$0xff]  }
  0xb6   :  { %4056 = vmatprep.subr.bf16.mxu0 %v7980_v10  ;;  %4302 = vmatprep.subr.bf16.mxu1 %v7983_v11  ;;  %v8058_v9 = vld [vmem:[%s11630_s1 + $0x1050] ss:$36 sps:$4 sm:$0xff]   ;;  %v8061_v10 = vld [vmem:[%s11630_s1 + $0x2e8] ss:$36 sps:$4 sm:$0xff]   ;;  %v8066_v11 = vld [vmem:[%s11630_s1 + $0x109c] ss:$36 sps:$4 sm:$0xff]  }
  0xb9   :  { %4057 = vmatpush1.bf16.msra.mxu0 %v7978_v12  ;;  %4303 = vmatpush1.bf16.msra.mxu1 %v7981_v13  ;;  %v8069_v12 = vld [vmem:[%s11630_s1 + $0x334] ss:$36 sps:$4 sm:$0xff]  }
  0xba   :  { %4058 = vmatprep.subr.bf16.mxu0 %v7986_v14  ;;  %4304 = vmatprep.subr.bf16.mxu1 %v7989_v15  ;;  %v8064_v13 = vld [vmem:[%s11630_s1 + $0x1098] ss:$36 sps:$4 sm:$0xff]   ;;  %v8067_v14 = vld [vmem:[%s11630_s1 + $0x330] ss:$36 sps:$4 sm:$0xff]   ;;  %v8072_v15 = vld [vmem:[%s11630_s1 + $0x10e4] ss:$36 sps:$4 sm:$0xff]  }
  0xbd   :  { %4059 = vmatpush1.bf16.msra.mxu0 %v7984_v16  ;;  %4305 = vmatpush1.bf16.msra.mxu1 %v7987_v18  ;;  %v8075_v16 = vld [vmem:[%s11630_s1 + $0x37c] ss:$36 sps:$4 sm:$0xff]  }
  0xbe   :  { %4060 = vmatprep.subr.bf16.mxu0 %v7992_v19  ;;  %4306 = vmatprep.subr.bf16.mxu1 %v7995_v22  ;;  %v8070_v18 = vld [vmem:[%s11630_s1 + $0x10e0] ss:$36 sps:$4 sm:$0xff]   ;;  %v8073_v19 = vld [vmem:[%s11630_s1 + $0x378] ss:$36 sps:$4 sm:$0xff]   ;;  %v8078_v22 = vld [vmem:[%s11630_s1 + $0x112c] ss:$36 sps:$4 sm:$0xff]  }
  0xc1   :  { %4061 = vmatpush1.bf16.msra.mxu0 %v7990_v23  ;;  %4307 = vmatpush1.bf16.msra.mxu1 %v7993_v24  ;;  %v8081_v23 = vld [vmem:[%s11630_s1 + $0x3c4] ss:$36 sps:$4 sm:$0xff]  }
  0xc2   :  { %4071 = vmatprep.subr.bf16.mxu0 %v7999_v25  ;;  %4563 = vmatprep.subr.bf16.mxu1 %v8003_v26  ;;  %v8076_v24 = vld [vmem:[%s11630_s1 + $0x1128] ss:$36 sps:$4 sm:$0xff]   ;;  %v8079_v25 = vld [vmem:[%s11630_s1 + $0x3c0] ss:$36 sps:$4 sm:$0xff]   ;;  %v8084_v26 = vld [vmem:[%s11630_s1 + $0x1174] ss:$36 sps:$4 sm:$0xff]  }
  0xc4   :  { %4309 = vmatmul.mubr.bf16.vlgmr.msra.gmra.mrb[0].mxu1 %v9594_v28  ;;  %4063 = vmatmul.mubr.bf16.vlgmr.msra.gmra.mrb[0].mxu0 %v9387_v17 }
  0xc5   :  { %4072 = vmatpush1.bf16.msra.mxu0 %v7997_v27  ;;  %4564 = vmatpush1.bf16.msra.mxu1 %v8001_v29  ;;  %v8087_v27 = vld [vmem:[%s11630_s1 + $0x40c] ss:$36 sps:$4 sm:$0xff]  }
  0xc6   :  { %4073 = vmatprep.subr.bf16.mxu0 %v8006_v30  ;;  %4565 = vmatprep.subr.bf16.mxu1 %v8009_v31  ;;  %v8082_v29 = vld [vmem:[%s11630_s1 + $0x1170] ss:$36 sps:$4 sm:$0xff]   ;;  %v8085_v30 = vld [vmem:[%s11630_s1 + $0x408] ss:$36 sps:$4 sm:$0xff]   ;;  %v8090_v31 = vld [vmem:[%s11630_s1 + $0x11bc] ss:$36 sps:$4 sm:$0xff]  }
  0xc7   :  { %4103 = vmatprep.mubr.bf16.mxu0 %v9402_v21  ;;  %4595 = vmatprep.mubr.bf16.mxu1 %v9104_v49 }
  0xc9   :  { %4074 = vmatpush1.bf16.msra.mxu0 %v8004_v20  ;;  %4566 = vmatpush1.bf16.msra.mxu1 %v8007_v32  ;;  %v8093_v20 = vld [vmem:[%s11630_s1 + $0x454] ss:$36 sps:$4 sm:$0xff]  }
  0xca   :  { %4075 = vmatprep.subr.bf16.mxu0 %v8012_v33  ;;  %4567 = vmatprep.subr.bf16.mxu1 %v8015_v34  ;;  %v8088_v32 = vld [vmem:[%s11630_s1 + $0x11b8] ss:$36 sps:$4 sm:$0xff]   ;;  %v8091_v33 = vld [vmem:[%s11630_s1 + $0x450] ss:$36 sps:$4 sm:$0xff]   ;;  %v8096_v34 = vld [vmem:[%s11630_s1 + $0x1204] ss:$36 sps:$4 sm:$0xff]  }
  0xcd   :  { %4076 = vmatpush1.bf16.msra.mxu0 %v8010_v35  ;;  %4568 = vmatpush1.bf16.msra.mxu1 %v8013_v36  ;;  %v8099_v35 = vld [vmem:[%s11630_s1 + $0x49c] ss:$36 sps:$4 sm:$0xff]  }
  0xce   :  { %4077 = vmatprep.subr.bf16.mxu0 %v8018_v38  ;;  %4569 = vmatprep.subr.bf16.mxu1 %v8021_v40  ;;  %v8094_v36 = vld [vmem:[%s11630_s1 + $0x1200] ss:$36 sps:$4 sm:$0xff]   ;;  %v8097_v38 = vld [vmem:[%s11630_s1 + $0x498] ss:$36 sps:$4 sm:$0xff]   ;;  %v8102_v40 = vld [vmem:[%s11630_s1 + $0x124c] ss:$36 sps:$4 sm:$0xff]  }
  0xd1   :  { %4078 = vmatpush1.bf16.msra.mxu0 %v8016_v41  ;;  %4570 = vmatpush1.bf16.msra.mxu1 %v8019_v42  ;;  %v8105_v41 = vld [vmem:[%s11630_s1 + $0x4e4] ss:$36 sps:$4 sm:$0xff]  }
  0xd2   :  { %4079 = vmatprep.subr.bf16.mxu0 %v8024_v43  ;;  %4571 = vmatprep.subr.bf16.mxu1 %v8027_v44  ;;  %v8100_v42 = vld [vmem:[%s11630_s1 + $0x1248] ss:$36 sps:$4 sm:$0xff]   ;;  %v8103_v43 = vld [vmem:[%s11630_s1 + $0x4e0] ss:$36 sps:$4 sm:$0xff]   ;;  %v8108_v44 = vld [vmem:[%s11630_s1 + $0x1294] ss:$36 sps:$4 sm:$0xff]  }
  0xd5   :  { %4080 = vmatpush1.bf16.msra.mxu0 %v8022_v45  ;;  %4572 = vmatpush1.bf16.msra.mxu1 %v8025_v46  ;;  %v8111_v45 = vld [vmem:[%s11630_s1 + $0x52c] ss:$36 sps:$4 sm:$0xff]  }
  0xd6   :  { %4081 = vmatprep.subr.bf16.mxu0 %v8030_v47  ;;  %4573 = vmatprep.subr.bf16.mxu1 %v8033_v48  ;;  %v8106_v46 = vld [vmem:[%s11630_s1 + $0x1290] ss:$36 sps:$4 sm:$0xff]   ;;  %v8109_v47 = vld [vmem:[%s11630_s1 + $0x528] ss:$36 sps:$4 sm:$0xff]   ;;  %v8114_v48 = vld [vmem:[%s11630_s1 + $0x12dc] ss:$36 sps:$4 sm:$0xff]  }
  0xd9   :  { %4082 = vmatpush1.bf16.msra.mxu0 %v8028_v50  ;;  %4574 = vmatpush1.bf16.msra.mxu1 %v8031_v51  ;;  %v8117_v50 = vld [vmem:[%s11630_s1 + $0x574] ss:$36 sps:$4 sm:$0xff]  }
  0xda   :  { %4083 = vmatprep.subr.bf16.mxu0 %v8036_v52  ;;  %4575 = vmatprep.subr.bf16.mxu1 %v8039_v53  ;;  %v8112_v51 = vld [vmem:[%s11630_s1 + $0x12d8] ss:$36 sps:$4 sm:$0xff]   ;;  %v8115_v52 = vld [vmem:[%s11630_s1 + $0x570] ss:$36 sps:$4 sm:$0xff]   ;;  %v46_v53 = vld [vmem:[%s11629_s0 + $0x20] sm:$0xf] }
  0xdd   :  { %4084 = vmatpush1.bf16.msra.mxu0 %v8034_v55  ;;  %4576 = vmatpush1.bf16.msra.mxu1 %v8037_v56  ;;  %v8121_v55 = vld [vmem:[%s11630_s1 + $0xc] ss:$36 sps:$4 sm:$0xff]   ;;  %v8124_v56 = vld [vmem:[%s11630_s1 + $0x5bc] ss:$36 sps:$4 sm:$0xff]  }
  0xde   :  { %4085 = vmatprep.subr.bf16.mxu0 %v8042_v57  ;;  %4577 = vmatprep.subr.bf16.mxu1 %v8045_v58  ;;  %v9844_v57 = vcombine.low %v46_v53, %v46_v53  ;;  %v8119_v58 = vld [vmem:[%s11630_s1 + $0x8] ss:$36 sps:$4 sm:$0xff]  }
  0xdf   :  { %v8202_v53 = vld [vmem:[%s11630_s1 + $0x964] ss:$36 sps:$4 sm:$0xff]  }
  0xe1   :  { %4086 = vmatpush1.bf16.msra.mxu0 %v8040_v59  ;;  %4578 = vmatpush1.bf16.msra.mxu1 %v8043_v60  ;;  %v8122_v59 = vld [vmem:[%s11630_s1 + $0x5b8] ss:$36 sps:$4 sm:$0xff]  }
  0xe2   :  { %4087 = vmatprep.subr.bf16.mxu0 %v8048_v61  ;;  %4579 = vmatprep.subr.bf16.mxu1 %v8051_v62  ;;  %v8127_v60 = vld [vmem:[%s11630_s1 + $0x54] ss:$36 sps:$4 sm:$0xff]   ;;  %v8130_v61 = vld [vmem:[%s11630_s1 + $0x604] ss:$36 sps:$4 sm:$0xff]  }
  0xe3   :  { %v8125_v62 = vld [vmem:[%s11630_s1 + $0x50] ss:$36 sps:$4 sm:$0xff]  }
  0xe5   :  { %4088 = vmatpush1.bf16.msra.mxu0 %v8046_v63  ;;  %4580 = vmatpush1.bf16.msra.mxu1 %v8049_v0  ;;  %v8128_v63 = vld [vmem:[%s11630_s1 + $0x600] ss:$36 sps:$4 sm:$0xff]  }
  0xe6   :  { %4089 = vmatprep.subr.bf16.mxu0 %v8054_v1  ;;  %4581 = vmatprep.subr.bf16.mxu1 %v8057_v2  ;;  %v8133_v0 = vld [vmem:[%s11630_s1 + $0x9c] ss:$36 sps:$4 sm:$0xff]   ;;  %v8136_v1 = vld [vmem:[%s11630_s1 + $0x64c] ss:$36 sps:$4 sm:$0xff]  }
  0xe7   :  { %v8131_v2 = vld [vmem:[%s11630_s1 + $0x98] ss:$36 sps:$4 sm:$0xff]  }
  0xe9   :  { %4090 = vmatpush1.bf16.msra.mxu0 %v8052_v3  ;;  %4582 = vmatpush1.bf16.msra.mxu1 %v8055_v4  ;;  %v8134_v3 = vld [vmem:[%s11630_s1 + $0x648] ss:$36 sps:$4 sm:$0xff]  }
  0xea   :  { %4091 = vmatprep.subr.bf16.mxu0 %v8060_v5  ;;  %4583 = vmatprep.subr.bf16.mxu1 %v8063_v6  ;;  %v8139_v4 = vld [vmem:[%s11630_s1 + $0xe4] ss:$36 sps:$4 sm:$0xff]   ;;  %v8142_v5 = vld [vmem:[%s11630_s1 + $0x694] ss:$36 sps:$4 sm:$0xff]  }
  0xeb   :  { %v8137_v6 = vld [vmem:[%s11630_s1 + $0xe0] ss:$36 sps:$4 sm:$0xff]  }
  0xed   :  { %4092 = vmatpush1.bf16.msra.mxu0 %v8058_v9  ;;  %4584 = vmatpush1.bf16.msra.mxu1 %v8061_v10  ;;  %v8140_v9 = vld [vmem:[%s11630_s1 + $0x690] ss:$36 sps:$4 sm:$0xff]  }
  0xee   :  { %4093 = vmatprep.subr.bf16.mxu0 %v8066_v11  ;;  %4585 = vmatprep.subr.bf16.mxu1 %v8069_v12  ;;  %v8145_v10 = vld [vmem:[%s11630_s1 + $0x12c] ss:$36 sps:$4 sm:$0xff]   ;;  %v8148_v11 = vld [vmem:[%s11630_s1 + $0x6dc] ss:$36 sps:$4 sm:$0xff]  }
  0xef   :  { %v8143_v12 = vld [vmem:[%s11630_s1 + $0x128] ss:$36 sps:$4 sm:$0xff]  }
  0xf1   :  { %4094 = vmatpush1.bf16.msra.mxu0 %v8064_v13  ;;  %4586 = vmatpush1.bf16.msra.mxu1 %v8067_v14  ;;  %v8146_v13 = vld [vmem:[%s11630_s1 + $0x6d8] ss:$36 sps:$4 sm:$0xff]  }
  0xf2   :  { %4095 = vmatprep.subr.bf16.mxu0 %v8072_v15  ;;  %4587 = vmatprep.subr.bf16.mxu1 %v8075_v16  ;;  %v8151_v14 = vld [vmem:[%s11630_s1 + $0x174] ss:$36 sps:$4 sm:$0xff]   ;;  %v8154_v15 = vld [vmem:[%s11630_s1 + $0x724] ss:$36 sps:$4 sm:$0xff]  }
  0xf3   :  { %v8149_v16 = vld [vmem:[%s11630_s1 + $0x170] ss:$36 sps:$4 sm:$0xff]  }
  0xf5   :  { %4096 = vmatpush1.bf16.msra.mxu0 %v8070_v18  ;;  %4588 = vmatpush1.bf16.msra.mxu1 %v8073_v19  ;;  %v8152_v18 = vld [vmem:[%s11630_s1 + $0x720] ss:$36 sps:$4 sm:$0xff]  }
  0xf6   :  { %4097 = vmatprep.subr.bf16.mxu0 %v8078_v22  ;;  %4589 = vmatprep.subr.bf16.mxu1 %v8081_v23  ;;  %v8157_v19 = vld [vmem:[%s11630_s1 + $0x1bc] ss:$36 sps:$4 sm:$0xff]   ;;  %v8160_v22 = vld [vmem:[%s11630_s1 + $0x76c] ss:$36 sps:$4 sm:$0xff]  }
  0xf7   :  { %v8155_v23 = vld [vmem:[%s11630_s1 + $0x1b8] ss:$36 sps:$4 sm:$0xff]  }
  0xf9   :  { %4098 = vmatpush1.bf16.msra.mxu0 %v8076_v24  ;;  %4590 = vmatpush1.bf16.msra.mxu1 %v8079_v25  ;;  %v8158_v24 = vld [vmem:[%s11630_s1 + $0x768] ss:$36 sps:$4 sm:$0xff]  }
  0xfa   :  { %4099 = vmatprep.subr.bf16.mxu0 %v8084_v26  ;;  %4591 = vmatprep.subr.bf16.mxu1 %v8087_v27  ;;  %v8163_v25 = vld [vmem:[%s11630_s1 + $0x204] ss:$36 sps:$4 sm:$0xff]   ;;  %v8166_v26 = vld [vmem:[%s11630_s1 + $0x7b4] ss:$36 sps:$4 sm:$0xff]  }
  0xfb   :  { %v8161_v27 = vld [vmem:[%s11630_s1 + $0x200] ss:$36 sps:$4 sm:$0xff]  }
  0xfd   :  { %4100 = vmatpush1.bf16.msra.mxu0 %v8082_v29  ;;  %4592 = vmatpush1.bf16.msra.mxu1 %v8085_v30  ;;  %v8164_v29 = vld [vmem:[%s11630_s1 + $0x7b0] ss:$36 sps:$4 sm:$0xff]  }
  0xfe   :  { %4101 = vmatprep.subr.bf16.mxu0 %v8090_v31  ;;  %4593 = vmatprep.subr.bf16.mxu1 %v8093_v20  ;;  %v8169_v30 = vld [vmem:[%s11630_s1 + $0x24c] ss:$36 sps:$4 sm:$0xff]   ;;  %v8172_v31 = vld [vmem:[%s11630_s1 + $0x7fc] ss:$36 sps:$4 sm:$0xff]  }
  0xff   :  { %v8167_v20 = vld [vmem:[%s11630_s1 + $0x248] ss:$36 sps:$4 sm:$0xff]  }
 0x101   :  { %4102 = vmatpush1.bf16.msra.mxu0 %v8088_v32  ;;  %4594 = vmatpush1.bf16.msra.mxu1 %v8091_v33  ;;  %v8170_v32 = vld [vmem:[%s11630_s1 + $0x7f8] ss:$36 sps:$4 sm:$0xff]  }
 0x102   :  { %4112 = vmatprep.subr.bf16.mxu0 %v8096_v34  ;;  %4604 = vmatprep.subr.bf16.mxu1 %v8099_v35  ;;  %v8175_v33 = vld [vmem:[%s11630_s1 + $0x294] ss:$36 sps:$4 sm:$0xff]   ;;  %v8178_v34 = vld [vmem:[%s11630_s1 + $0x844] ss:$36 sps:$4 sm:$0xff]  }
 0x103   :  { %v8173_v35 = vld [vmem:[%s11630_s1 + $0x290] ss:$36 sps:$4 sm:$0xff]  }
 0x104   :  { %4104 = vmatmul.mubr.bf16.vlgmr.msra.gmra.mrb[0].mxu0 %v9594_v28  ;;  %4596 = vmatmul.mubr.bf16.vlgmr.msra.gmra.mrb[4].mxu1 %v9170_v7 }
 0x105   :  { %4113 = vmatpush1.bf16.msra.mxu0 %v8094_v36  ;;  %4605 = vmatpush1.bf16.msra.mxu1 %v8097_v38  ;;  %v8176_v36 = vld [vmem:[%s11630_s1 + $0x840] ss:$36 sps:$4 sm:$0xff]  }
 0x106   :  { %4114 = vmatprep.subr.bf16.mxu0 %v8102_v40  ;;  %4606 = vmatprep.subr.bf16.mxu1 %v8105_v41  ;;  %v8181_v38 = vld [vmem:[%s11630_s1 + $0x2dc] ss:$36 sps:$4 sm:$0xff]   ;;  %v8184_v40 = vld [vmem:[%s11630_s1 + $0x88c] ss:$36 sps:$4 sm:$0xff]  }
 0x107   :  { %4144 = vmatprep.mubr.bf16.mxu0 %v8893_v39  ;;  %4636 = vmatprep.mubr.bf16.mxu1 %v9118_v54  ;;  %v8179_v41 = vld [vmem:[%s11630_s1 + $0x2d8] ss:$36 sps:$4 sm:$0xff]  }
 0x109   :  { %4115 = vmatpush1.bf16.msra.mxu0 %v8100_v42  ;;  %4607 = vmatpush1.bf16.msra.mxu1 %v8103_v43  ;;  %v8182_v42 = vld [vmem:[%s11630_s1 + $0x888] ss:$36 sps:$4 sm:$0xff]  }
 0x10a   :  { %4116 = vmatprep.subr.bf16.mxu0 %v8108_v44  ;;  %4608 = vmatprep.subr.bf16.mxu1 %v8111_v45  ;;  %v8187_v43 = vld [vmem:[%s11630_s1 + $0x324] ss:$36 sps:$4 sm:$0xff]   ;;  %v8190_v44 = vld [vmem:[%s11630_s1 + $0x8d4] ss:$36 sps:$4 sm:$0xff]  }
 0x10b   :  { %v8185_v45 = vld [vmem:[%s11630_s1 + $0x320] ss:$36 sps:$4 sm:$0xff]  }
 0x10d   :  { %4117 = vmatpush1.bf16.msra.mxu0 %v8106_v46  ;;  %4609 = vmatpush1.bf16.msra.mxu1 %v8109_v47  ;;  %v8188_v46 = vld [vmem:[%s11630_s1 + $0x8d0] ss:$36 sps:$4 sm:$0xff]  }
 0x10e   :  { %4118 = vmatprep.subr.bf16.mxu0 %v8114_v48  ;;  %4610 = vmatprep.subr.bf16.mxu1 %v8117_v50  ;;  %v8193_v47 = vld [vmem:[%s11630_s1 + $0x36c] ss:$36 sps:$4 sm:$0xff]   ;;  %v8196_v48 = vld [vmem:[%s11630_s1 + $0x91c] ss:$36 sps:$4 sm:$0xff]  }
 0x10f   :  { %v8191_v50 = vld [vmem:[%s11630_s1 + $0x368] ss:$36 sps:$4 sm:$0xff]  }
 0x111   :  { %4119 = vmatpush1.bf16.msra.mxu0 %v8112_v51  ;;  %4611 = vmatpush1.bf16.msra.mxu1 %v8115_v52  ;;  %v8194_v51 = vld [vmem:[%s11630_s1 + $0x918] ss:$36 sps:$4 sm:$0xff]  }
 0x112   :  { %4153 = vmatprep.subr.bf16.mxu0 %v8121_v55  ;;  %4612 = vmatprep.subr.bf16.mxu1 %v8124_v56  ;;  %v8199_v52 = vld [vmem:[%s11630_s1 + $0x3b4] ss:$36 sps:$4 sm:$0xff]   ;;  %v8200_v56 = vld [vmem:[%s11630_s1 + $0x960] ss:$36 sps:$4 sm:$0xff]  }
 0x113   :  { %v8197_v55 = vld [vmem:[%s11630_s1 + $0x3b0] ss:$36 sps:$4 sm:$0xff]  }
 0x114   :  { %7292 = vmatmul.mubr.msk.bf16.vlgmr.msra.gmra.mrb[0].mxu0 %vm3944_vm0, %v9844_v57 }
 0x115   :  { %4154 = vmatpush1.bf16.msra.mxu0 %v8119_v58  ;;  %4613 = vmatpush1.bf16.msra.mxu1 %v8122_v59  ;;  %v8205_v58 = vld [vmem:[%s11630_s1 + $0x3fc] ss:$36 sps:$4 sm:$0xff]   ;;  %v8208_v59 = vld [vmem:[%s11630_s1 + $0x9ac] ss:$36 sps:$4 sm:$0xff]  }
 0x116   :  { %4155 = vmatprep.subr.bf16.mxu0 %v8127_v60  ;;  %4614 = vmatprep.subr.bf16.mxu1 %v8130_v61  ;;  %v8203_v60 = vld [vmem:[%s11630_s1 + $0x3f8] ss:$36 sps:$4 sm:$0xff]   ;;  %v8206_v61 = vld [vmem:[%s11630_s1 + $0x9a8] ss:$36 sps:$4 sm:$0xff]  }
 0x117   :  { %4185 = vmatprep.mubr.bf16.mxu0 %v9104_v49 }
 0x119   :  { %4156 = vmatpush1.bf16.msra.mxu0 %v8125_v62  ;;  %4615 = vmatpush1.bf16.msra.mxu1 %v8128_v63  ;;  %v8211_v62 = vld [vmem:[%s11630_s1 + $0x444] ss:$36 sps:$4 sm:$0xff]   ;;  %v8214_v63 = vld [vmem:[%s11630_s1 + $0x9f4] ss:$36 sps:$4 sm:$0xff]  }
 0x11a   :  { %4157 = vmatprep.subr.bf16.mxu0 %v8133_v0  ;;  %4616 = vmatprep.subr.bf16.mxu1 %v8136_v1  ;;  %v8209_v0 = vld [vmem:[%s11630_s1 + $0x440] ss:$36 sps:$4 sm:$0xff]   ;;  %v8212_v1 = vld [vmem:[%s11630_s1 + $0x9f0] ss:$36 sps:$4 sm:$0xff]  }
 0x11d   :  { %4158 = vmatpush1.bf16.msra.mxu0 %v8131_v2  ;;  %4617 = vmatpush1.bf16.msra.mxu1 %v8134_v3  ;;  %v8217_v2 = vld [vmem:[%s11630_s1 + $0x120c] ss:$36 sps:$4 sm:$0xff]   ;;  %v8220_v3 = vld [vmem:[%s11630_s1 + $0xa3c] ss:$36 sps:$4 sm:$0xff]  }
 0x11e   :  { %4159 = vmatprep.subr.bf16.mxu0 %v8139_v4  ;;  %4618 = vmatprep.subr.bf16.mxu1 %v8142_v5  ;;  %v8215_v4 = vld [vmem:[%s11630_s1 + $0x1208] ss:$36 sps:$4 sm:$0xff]   ;;  %v8218_v5 = vld [vmem:[%s11630_s1 + $0xa38] ss:$36 sps:$4 sm:$0xff]  }
 0x121   :  { %4160 = vmatpush1.bf16.msra.mxu0 %v8137_v6  ;;  %4619 = vmatpush1.bf16.msra.mxu1 %v8140_v9  ;;  %v8223_v6 = vld [vmem:[%s11630_s1 + $0x1254] ss:$36 sps:$4 sm:$0xff]   ;;  %v8226_v9 = vld [vmem:[%s11630_s1 + $0xa84] ss:$36 sps:$4 sm:$0xff]  }
 0x122   :  { %4161 = vmatprep.subr.bf16.mxu0 %v8145_v10  ;;  %4620 = vmatprep.subr.bf16.mxu1 %v8148_v11  ;;  %v8221_v10 = vld [vmem:[%s11630_s1 + $0x1250] ss:$36 sps:$4 sm:$0xff]   ;;  %v8224_v11 = vld [vmem:[%s11630_s1 + $0xa80] ss:$36 sps:$4 sm:$0xff]  }
 0x125   :  { %4162 = vmatpush1.bf16.msra.mxu0 %v8143_v12  ;;  %4621 = vmatpush1.bf16.msra.mxu1 %v8146_v13  ;;  %v8229_v12 = vld [vmem:[%s11630_s1 + $0x129c] ss:$36 sps:$4 sm:$0xff]   ;;  %v8232_v13 = vld [vmem:[%s11630_s1 + $0xacc] ss:$36 sps:$4 sm:$0xff]  }
 0x126   :  { %4163 = vmatprep.subr.bf16.mxu0 %v8151_v14  ;;  %4622 = vmatprep.subr.bf16.mxu1 %v8154_v15  ;;  %v8227_v14 = vld [vmem:[%s11630_s1 + $0x1298] ss:$36 sps:$4 sm:$0xff]   ;;  %v8230_v15 = vld [vmem:[%s11630_s1 + $0xac8] ss:$36 sps:$4 sm:$0xff]  }
 0x129   :  { %4164 = vmatpush1.bf16.msra.mxu0 %v8149_v16  ;;  %4623 = vmatpush1.bf16.msra.mxu1 %v8152_v18  ;;  %v8235_v16 = vld [vmem:[%s11630_s1 + $0x12e4] ss:$36 sps:$4 sm:$0xff]   ;;  %v8238_v18 = vld [vmem:[%s11630_s1 + $0xb14] ss:$36 sps:$4 sm:$0xff]  }
 0x12a   :  { %4165 = vmatprep.subr.bf16.mxu0 %v8157_v19  ;;  %4624 = vmatprep.subr.bf16.mxu1 %v8160_v22  ;;  %v8233_v19 = vld [vmem:[%s11630_s1 + $0x12e0] ss:$36 sps:$4 sm:$0xff]   ;;  %v8236_v22 = vld [vmem:[%s11630_s1 + $0xb10] ss:$36 sps:$4 sm:$0xff]  }
 0x12d   :  { %4166 = vmatpush1.bf16.msra.mxu0 %v8155_v23  ;;  %4625 = vmatpush1.bf16.msra.mxu1 %v8158_v24  ;;  %v8241_v23 = vld [vmem:[%s11630_s1 + $0x14] ss:$36 sps:$4 sm:$0xff]   ;;  %v8244_v24 = vld [vmem:[%s11630_s1 + $0xb5c] ss:$36 sps:$4 sm:$0xff]  }
 0x12e   :  { %4167 = vmatprep.subr.bf16.mxu0 %v8163_v25  ;;  %4626 = vmatprep.subr.bf16.mxu1 %v8166_v26  ;;  %v8239_v25 = vld [vmem:[%s11630_s1 + $0x10] ss:$36 sps:$4 sm:$0xff]   ;;  %v8242_v26 = vld [vmem:[%s11630_s1 + $0xb58] ss:$36 sps:$4 sm:$0xff]  }
 0x131   :  { %4168 = vmatpush1.bf16.msra.mxu0 %v8161_v27  ;;  %4627 = vmatpush1.bf16.msra.mxu1 %v8164_v29  ;;  %v8247_v27 = vld [vmem:[%s11630_s1 + $0x5c] ss:$36 sps:$4 sm:$0xff]   ;;  %v8250_v29 = vld [vmem:[%s11630_s1 + $0xba4] ss:$36 sps:$4 sm:$0xff]  }
 0x132   :  { %4169 = vmatprep.subr.bf16.mxu0 %v8169_v30  ;;  %4628 = vmatprep.subr.bf16.mxu1 %v8172_v31  ;;  %v8245_v30 = vld [vmem:[%s11630_s1 + $0x58] ss:$36 sps:$4 sm:$0xff]   ;;  %v8248_v31 = vld [vmem:[%s11630_s1 + $0xba0] ss:$36 sps:$4 sm:$0xff]  }
 0x135   :  { %4170 = vmatpush1.bf16.msra.mxu0 %v8167_v20  ;;  %4629 = vmatpush1.bf16.msra.mxu1 %v8170_v32  ;;  %v8253_v20 = vld [vmem:[%s11630_s1 + $0xa4] ss:$36 sps:$4 sm:$0xff]   ;;  %v8256_v32 = vld [vmem:[%s11630_s1 + $0xbec] ss:$36 sps:$4 sm:$0xff]  }
 0x136   :  { %4171 = vmatprep.subr.bf16.mxu0 %v8175_v33  ;;  %4630 = vmatprep.subr.bf16.mxu1 %v8178_v34  ;;  %v8251_v33 = vld [vmem:[%s11630_s1 + $0xa0] ss:$36 sps:$4 sm:$0xff]   ;;  %v8254_v34 = vld [vmem:[%s11630_s1 + $0xbe8] ss:$36 sps:$4 sm:$0xff]  }
 0x139   :  { %4172 = vmatpush1.bf16.msra.mxu0 %v8173_v35  ;;  %4631 = vmatpush1.bf16.msra.mxu1 %v8176_v36  ;;  %v8259_v35 = vld [vmem:[%s11630_s1 + $0xec] ss:$36 sps:$4 sm:$0xff]   ;;  %v8262_v36 = vld [vmem:[%s11630_s1 + $0xc34] ss:$36 sps:$4 sm:$0xff]  }
 0x13a   :  { %4173 = vmatprep.subr.bf16.mxu0 %v8181_v38  ;;  %4632 = vmatprep.subr.bf16.mxu1 %v8184_v40  ;;  %v8257_v38 = vld [vmem:[%s11630_s1 + $0xe8] ss:$36 sps:$4 sm:$0xff]   ;;  %v8260_v40 = vld [vmem:[%s11630_s1 + $0xc30] ss:$36 sps:$4 sm:$0xff]  }
 0x13d   :  { %4174 = vmatpush1.bf16.msra.mxu0 %v8179_v41  ;;  %4633 = vmatpush1.bf16.msra.mxu1 %v8182_v42  ;;  %v8265_v41 = vld [vmem:[%s11630_s1 + $0x134] ss:$36 sps:$4 sm:$0xff]   ;;  %v8268_v42 = vld [vmem:[%s11630_s1 + $0xc7c] ss:$36 sps:$4 sm:$0xff]  }
 0x13e   :  { %4175 = vmatprep.subr.bf16.mxu0 %v8187_v43  ;;  %4634 = vmatprep.subr.bf16.mxu1 %v8190_v44  ;;  %v8263_v43 = vld [vmem:[%s11630_s1 + $0x130] ss:$36 sps:$4 sm:$0xff]   ;;  %v8266_v44 = vld [vmem:[%s11630_s1 + $0xc78] ss:$36 sps:$4 sm:$0xff]  }
 0x141   :  { %4176 = vmatpush1.bf16.msra.mxu0 %v8185_v45  ;;  %4635 = vmatpush1.bf16.msra.mxu1 %v8188_v46  ;;  %v8271_v45 = vld [vmem:[%s11630_s1 + $0x17c] ss:$36 sps:$4 sm:$0xff]   ;;  %v8274_v46 = vld [vmem:[%s11630_s1 + $0xcc4] ss:$36 sps:$4 sm:$0xff]  }
 0x142   :  { %4177 = vmatprep.subr.bf16.mxu0 %v8193_v47  ;;  %4645 = vmatprep.subr.bf16.mxu1 %v8196_v48  ;;  %v8269_v47 = vld [vmem:[%s11630_s1 + $0x178] ss:$36 sps:$4 sm:$0xff]   ;;  %v8272_v48 = vld [vmem:[%s11630_s1 + $0xcc0] ss:$36 sps:$4 sm:$0xff]  }
 0x144   :  { %4637 = vmatmul.mubr.bf16.vlgmr.msra.gmra.mrb[4].mxu1 %v9172_v8 }
 0x145   :  { %4178 = vmatpush1.bf16.msra.mxu0 %v8191_v50  ;;  %4646 = vmatpush1.bf16.msra.mxu1 %v8194_v51  ;;  %v8277_v50 = vld [vmem:[%s11630_s1 + $0x1c4] ss:$36 sps:$4 sm:$0xff]   ;;  %v8280_v51 = vld [vmem:[%s11630_s1 + $0xd0c] ss:$36 sps:$4 sm:$0xff]  }
 0x146   :  { %4179 = vmatprep.subr.bf16.mxu0 %v8199_v52  ;;  %4647 = vmatprep.subr.bf16.mxu1 %v8202_v53  ;;  %v8275_v52 = vld [vmem:[%s11630_s1 + $0x1c0] ss:$36 sps:$4 sm:$0xff]   ;;  %v8278_v53 = vld [vmem:[%s11630_s1 + $0xd08] ss:$36 sps:$4 sm:$0xff]  }
 0x147   :  { %4677 = vmatprep.mubr.bf16.mxu1 %v9265_v37 }
 0x149   :  { %4180 = vmatpush1.bf16.msra.mxu0 %v8197_v55  ;;  %4648 = vmatpush1.bf16.msra.mxu1 %v8200_v56  ;;  %v8283_v55 = vld [vmem:[%s11630_s1 + $0x20c] ss:$36 sps:$4 sm:$0xff]   ;;  %v8286_v56 = vld [vmem:[%s11630_s1 + $0xd54] ss:$36 sps:$4 sm:$0xff]  }
 0x14a   :  { %4181 = vmatprep.subr.bf16.mxu0 %v8205_v58  ;;  %4649 = vmatprep.subr.bf16.mxu1 %v8208_v59  ;;  %v8281_v58 = vld [vmem:[%s11630_s1 + $0x208] ss:$36 sps:$4 sm:$0xff]   ;;  %v8284_v59 = vld [vmem:[%s11630_s1 + $0xd50] ss:$36 sps:$4 sm:$0xff]  }
 0x14d   :  { %4182 = vmatpush1.bf16.msra.mxu0 %v8203_v60  ;;  %4650 = vmatpush1.bf16.msra.mxu1 %v8206_v61  ;;  %v8289_v60 = vld [vmem:[%s11630_s1 + $0x254] ss:$36 sps:$4 sm:$0xff]   ;;  %v8292_v61 = vld [vmem:[%s11630_s1 + $0xd9c] ss:$36 sps:$4 sm:$0xff]  }
 0x14e   :  { %4183 = vmatprep.subr.bf16.mxu0 %v8211_v62  ;;  %4651 = vmatprep.subr.bf16.mxu1 %v8214_v63  ;;  %v8287_v62 = vld [vmem:[%s11630_s1 + $0x250] ss:$36 sps:$4 sm:$0xff]   ;;  %v8290_v63 = vld [vmem:[%s11630_s1 + $0xd98] ss:$36 sps:$4 sm:$0xff]  }
 0x151   :  { %4184 = vmatpush1.bf16.msra.mxu0 %v8209_v0  ;;  %4652 = vmatpush1.bf16.msra.mxu1 %v8212_v1  ;;  %v8295_v0 = vld [vmem:[%s11630_s1 + $0x29c] ss:$36 sps:$4 sm:$0xff]   ;;  %v8298_v1 = vld [vmem:[%s11630_s1 + $0xde4] ss:$36 sps:$4 sm:$0xff]  }
 0x152   :  { %4317 = vmatprep.subr.bf16.mxu0 %v8217_v2  ;;  %4653 = vmatprep.subr.bf16.mxu1 %v8220_v3  ;;  %v8293_v2 = vld [vmem:[%s11630_s1 + $0x298] ss:$36 sps:$4 sm:$0xff]   ;;  %v8296_v3 = vld [vmem:[%s11630_s1 + $0xde0] ss:$36 sps:$4 sm:$0xff]  }
 0x154   :  { %4186 = vmatmul.mubr.bf16.vlgmr.msra.gmra.mrb[4].mxu0 %v9170_v7 }
 0x155   :  { %4318 = vmatpush1.bf16.msra.mxu0 %v8215_v4  ;;  %4654 = vmatpush1.bf16.msra.mxu1 %v8218_v5  ;;  %v8301_v4 = vld [vmem:[%s11630_s1 + $0x2e4] ss:$36 sps:$4 sm:$0xff]   ;;  %v8304_v5 = vld [vmem:[%s11630_s1 + $0xe2c] ss:$36 sps:$4 sm:$0xff]  }
 0x156   :  { %4319 = vmatprep.subr.bf16.mxu0 %v8223_v6  ;;  %4655 = vmatprep.subr.bf16.mxu1 %v8226_v9  ;;  %v8299_v6 = vld [vmem:[%s11630_s1 + $0x2e0] ss:$36 sps:$4 sm:$0xff]   ;;  %v8302_v9 = vld [vmem:[%s11630_s1 + $0xe28] ss:$36 sps:$4 sm:$0xff]  }
 0x157   :  { %4349 = vmatprep.mubr.bf16.mxu0 %v8893_v39 }
 0x159   :  { %4320 = vmatpush1.bf16.msra.mxu0 %v8221_v10  ;;  %4656 = vmatpush1.bf16.msra.mxu1 %v8224_v11  ;;  %v8307_v10 = vld [vmem:[%s11630_s1 + $0x32c] ss:$36 sps:$4 sm:$0xff]   ;;  %v8310_v11 = vld [vmem:[%s11630_s1 + $0xe74] ss:$36 sps:$4 sm:$0xff]  }
 0x15a   :  { %4321 = vmatprep.subr.bf16.mxu0 %v8229_v12  ;;  %4657 = vmatprep.subr.bf16.mxu1 %v8232_v13  ;;  %v8305_v12 = vld [vmem:[%s11630_s1 + $0x328] ss:$36 sps:$4 sm:$0xff]   ;;  %v8308_v13 = vld [vmem:[%s11630_s1 + $0xe70] ss:$36 sps:$4 sm:$0xff]  }
 0x15d   :  { %4322 = vmatpush1.bf16.msra.mxu0 %v8227_v14  ;;  %4658 = vmatpush1.bf16.msra.mxu1 %v8230_v15  ;;  %v8313_v14 = vld [vmem:[%s11630_s1 + $0x374] ss:$36 sps:$4 sm:$0xff]   ;;  %v8316_v15 = vld [vmem:[%s11630_s1 + $0xebc] ss:$36 sps:$4 sm:$0xff]  }
 0x15e   :  { %4323 = vmatprep.subr.bf16.mxu0 %v8235_v16  ;;  %4659 = vmatprep.subr.bf16.mxu1 %v8238_v18  ;;  %v8311_v16 = vld [vmem:[%s11630_s1 + $0x370] ss:$36 sps:$4 sm:$0xff]   ;;  %v8314_v18 = vld [vmem:[%s11630_s1 + $0xeb8] ss:$36 sps:$4 sm:$0xff]  }
 0x161   :  { %4324 = vmatpush1.bf16.msra.mxu0 %v8233_v19  ;;  %4660 = vmatpush1.bf16.msra.mxu1 %v8236_v22  ;;  %v8319_v19 = vld [vmem:[%s11630_s1 + $0x3bc] ss:$36 sps:$4 sm:$0xff]   ;;  %v8322_v22 = vld [vmem:[%s11630_s1 + $0xf04] ss:$36 sps:$4 sm:$0xff]  }
 0x162   :  { %4358 = vmatprep.subr.bf16.mxu0 %v8241_v23  ;;  %4661 = vmatprep.subr.bf16.mxu1 %v8244_v24  ;;  %v8317_v23 = vld [vmem:[%s11630_s1 + $0x3b8] ss:$36 sps:$4 sm:$0xff]   ;;  %v8320_v24 = vld [vmem:[%s11630_s1 + $0xf00] ss:$36 sps:$4 sm:$0xff]  }
 0x164   :  { %7293 = vmatmul.mubr.msk.bf16.vlgmr.msra.gmra.mrb[8].mxu0 %vm3944_vm0, %v9844_v57 }
 0x165   :  { %4359 = vmatpush1.bf16.msra.mxu0 %v8239_v25  ;;  %4662 = vmatpush1.bf16.msra.mxu1 %v8242_v26  ;;  %v8325_v25 = vld [vmem:[%s11630_s1 + $0x404] ss:$36 sps:$4 sm:$0xff]   ;;  %v8328_v26 = vld [vmem:[%s11630_s1 + $0xf4c] ss:$36 sps:$4 sm:$0xff]  }
 0x166   :  { %4360 = vmatprep.subr.bf16.mxu0 %v8247_v27  ;;  %4663 = vmatprep.subr.bf16.mxu1 %v8250_v29 }
 0x167   :  { %4390 = vmatprep.mubr.bf16.mxu0 %v9104_v49 }
 0x169   :  { %4361 = vmatpush1.bf16.msra.mxu0 %v8245_v30  ;;  %4664 = vmatpush1.bf16.msra.mxu1 %v8248_v31  ;;  %v8323_v31 = vld [vmem:[%s11630_s1 + $0x400] ss:$36 sps:$4 sm:$0xff]  }
 0x16a   :  { %4362 = vmatprep.subr.bf16.mxu0 %v8253_v20  ;;  %4665 = vmatprep.subr.bf16.mxu1 %v8256_v32  ;;  %v8326_v20 = vld [vmem:[%s11630_s1 + $0xf48] ss:$36 sps:$4 sm:$0xff]  }
 0x16d   :  { %4363 = vmatpush1.bf16.msra.mxu0 %v8251_v33  ;;  %4666 = vmatpush1.bf16.msra.mxu1 %v8254_v34  ;;  %v8331_v33 = vld [vmem:[%s11630_s1 + $0x44c] ss:$36 sps:$4 sm:$0xff]   ;;  %v8334_v34 = vld [vmem:[%s11630_s1 + $0xf94] ss:$36 sps:$4 sm:$0xff]  }
 0x16e   :  { %4364 = vmatprep.subr.bf16.mxu0 %v8259_v35  ;;  %4667 = vmatprep.subr.bf16.mxu1 %v8262_v36  ;;  %v8329_v35 = vld [vmem:[%s11630_s1 + $0x448] ss:$36 sps:$4 sm:$0xff]   ;;  %v8332_v36 = vld [vmem:[%s11630_s1 + $0xf90] ss:$36 sps:$4 sm:$0xff]  }
 0x171   :  { %4365 = vmatpush1.bf16.msra.mxu0 %v8257_v38  ;;  %4668 = vmatpush1.bf16.msra.mxu1 %v8260_v40  ;;  %v8337_v38 = vld [vmem:[%s11630_s1 + $0x494] ss:$36 sps:$4 sm:$0xff]   ;;  %v8340_v40 = vld [vmem:[%s11630_s1 + $0xfdc] ss:$36 sps:$4 sm:$0xff]  }
 0x172   :  { %4366 = vmatprep.subr.bf16.mxu0 %v8265_v41  ;;  %4669 = vmatprep.subr.bf16.mxu1 %v8268_v42  ;;  %v8335_v41 = vld [vmem:[%s11630_s1 + $0x490] ss:$36 sps:$4 sm:$0xff]   ;;  %v8338_v42 = vld [vmem:[%s11630_s1 + $0xfd8] ss:$36 sps:$4 sm:$0xff]  }
 0x175   :  { %4367 = vmatpush1.bf16.msra.mxu0 %v8263_v43  ;;  %4670 = vmatpush1.bf16.msra.mxu1 %v8266_v44  ;;  %v8343_v43 = vld [vmem:[%s11630_s1 + $0x4dc] ss:$36 sps:$4 sm:$0xff]   ;;  %v8346_v44 = vld [vmem:[%s11630_s1 + $0x1024] ss:$36 sps:$4 sm:$0xff]  }
 0x176   :  { %4368 = vmatprep.subr.bf16.mxu0 %v8271_v45  ;;  %4671 = vmatprep.subr.bf16.mxu1 %v8274_v46  ;;  %v8341_v45 = vld [vmem:[%s11630_s1 + $0x4d8] ss:$36 sps:$4 sm:$0xff]   ;;  %v8344_v46 = vld [vmem:[%s11630_s1 + $0x1020] ss:$36 sps:$4 sm:$0xff]  }
 0x179   :  { %4369 = vmatpush1.bf16.msra.mxu0 %v8269_v47  ;;  %4672 = vmatpush1.bf16.msra.mxu1 %v8272_v48  ;;  %v8349_v47 = vld [vmem:[%s11630_s1 + $0x524] ss:$36 sps:$4 sm:$0xff]   ;;  %v8352_v48 = vld [vmem:[%s11630_s1 + $0x106c] ss:$36 sps:$4 sm:$0xff]  }
 0x17a   :  { %4370 = vmatprep.subr.bf16.mxu0 %v8277_v50  ;;  %4673 = vmatprep.subr.bf16.mxu1 %v8280_v51  ;;  %v8347_v50 = vld [vmem:[%s11630_s1 + $0x520] ss:$36 sps:$4 sm:$0xff]   ;;  %v8350_v51 = vld [vmem:[%s11630_s1 + $0x1068] ss:$36 sps:$4 sm:$0xff]  }
 0x17d   :  { %4371 = vmatpush1.bf16.msra.mxu0 %v8275_v52  ;;  %4674 = vmatpush1.bf16.msra.mxu1 %v8278_v53  ;;  %v8355_v52 = vld [vmem:[%s11630_s1 + $0x56c] ss:$36 sps:$4 sm:$0xff]   ;;  %v8358_v53 = vld [vmem:[%s11630_s1 + $0x10b4] ss:$36 sps:$4 sm:$0xff]  }
 0x17e   :  { %4372 = vmatprep.subr.bf16.mxu0 %v8283_v55  ;;  %4675 = vmatprep.subr.bf16.mxu1 %v8286_v56  ;;  %v8353_v55 = vld [vmem:[%s11630_s1 + $0x568] ss:$36 sps:$4 sm:$0xff]   ;;  %v8356_v56 = vld [vmem:[%s11630_s1 + $0x10b0] ss:$36 sps:$4 sm:$0xff]  }
 0x181   :  { %4373 = vmatpush1.bf16.msra.mxu0 %v8281_v58  ;;  %4676 = vmatpush1.bf16.msra.mxu1 %v8284_v59  ;;  %v8361_v58 = vld [vmem:[%s11630_s1 + $0x5b4] ss:$36 sps:$4 sm:$0xff]   ;;  %v8364_v59 = vld [vmem:[%s11630_s1 + $0x10fc] ss:$36 sps:$4 sm:$0xff]  }
 0x182   :  { %4374 = vmatprep.subr.bf16.mxu0 %v8289_v60  ;;  %4686 = vmatprep.subr.bf16.mxu1 %v8292_v61  ;;  %v8359_v60 = vld [vmem:[%s11630_s1 + $0x5b0] ss:$36 sps:$4 sm:$0xff]   ;;  %v8362_v61 = vld [vmem:[%s11630_s1 + $0x10f8] ss:$36 sps:$4 sm:$0xff]  }
 0x184   :  { %4678 = vmatmul.mubr.bf16.vlgmr.msra.gmra.mrb[4].mxu1 %v9387_v17 }
 0x185   :  { %4375 = vmatpush1.bf16.msra.mxu0 %v8287_v62  ;;  %4687 = vmatpush1.bf16.msra.mxu1 %v8290_v63  ;;  %v8367_v62 = vld [vmem:[%s11630_s1 + $0x5fc] ss:$36 sps:$4 sm:$0xff]   ;;  %v8370_v63 = vld [vmem:[%s11630_s1 + $0x1144] ss:$36 sps:$4 sm:$0xff]  }
 0x186   :  { %4376 = vmatprep.subr.bf16.mxu0 %v8295_v0  ;;  %4688 = vmatprep.subr.bf16.mxu1 %v8298_v1  ;;  %v8365_v0 = vld [vmem:[%s11630_s1 + $0x5f8] ss:$36 sps:$4 sm:$0xff]   ;;  %v8368_v1 = vld [vmem:[%s11630_s1 + $0x1140] ss:$36 sps:$4 sm:$0xff]  }
 0x187   :  { %4718 = vmatprep.mubr.bf16.mxu1 %v9402_v21 }
 0x189   :  { %4377 = vmatpush1.bf16.msra.mxu0 %v8293_v2  ;;  %4689 = vmatpush1.bf16.msra.mxu1 %v8296_v3  ;;  %v8373_v2 = vld [vmem:[%s11630_s1 + $0x644] ss:$36 sps:$4 sm:$0xff]   ;;  %v8376_v3 = vld [vmem:[%s11630_s1 + $0x118c] ss:$36 sps:$4 sm:$0xff]  }
 0x18a   :  { %4378 = vmatprep.subr.bf16.mxu0 %v8301_v4  ;;  %4690 = vmatprep.subr.bf16.mxu1 %v8304_v5  ;;  %v8371_v4 = vld [vmem:[%s11630_s1 + $0x640] ss:$36 sps:$4 sm:$0xff]   ;;  %v8374_v5 = vld [vmem:[%s11630_s1 + $0x1188] ss:$36 sps:$4 sm:$0xff]  }
 0x18d   :  { %4379 = vmatpush1.bf16.msra.mxu0 %v8299_v6  ;;  %4691 = vmatpush1.bf16.msra.mxu1 %v8302_v9  ;;  %v8379_v6 = vld [vmem:[%s11630_s1 + $0x68c] ss:$36 sps:$4 sm:$0xff]   ;;  %v8382_v9 = vld [vmem:[%s11630_s1 + $0x11d4] ss:$36 sps:$4 sm:$0xff]  }
 0x18e   :  { %4380 = vmatprep.subr.bf16.mxu0 %v8307_v10  ;;  %4692 = vmatprep.subr.bf16.mxu1 %v8310_v11  ;;  %v8377_v10 = vld [vmem:[%s11630_s1 + $0x688] ss:$36 sps:$4 sm:$0xff]   ;;  %v8380_v11 = vld [vmem:[%s11630_s1 + $0x11d0] ss:$36 sps:$4 sm:$0xff]  }
 0x191   :  { %4381 = vmatpush1.bf16.msra.mxu0 %v8305_v12  ;;  %4693 = vmatpush1.bf16.msra.mxu1 %v8308_v13  ;;  %v8385_v12 = vld [vmem:[%s11630_s1 + $0x6d4] ss:$36 sps:$4 sm:$0xff]   ;;  %v8388_v13 = vld [vmem:[%s11630_s1 + $0x121c] ss:$36 sps:$4 sm:$0xff]  }
 0x192   :  { %4382 = vmatprep.subr.bf16.mxu0 %v8313_v14  ;;  %4694 = vmatprep.subr.bf16.mxu1 %v8316_v15  ;;  %v8383_v14 = vld [vmem:[%s11630_s1 + $0x6d0] ss:$36 sps:$4 sm:$0xff]   ;;  %v8386_v15 = vld [vmem:[%s11630_s1 + $0x1218] ss:$36 sps:$4 sm:$0xff]  }
 0x195   :  { %4383 = vmatpush1.bf16.msra.mxu0 %v8311_v16  ;;  %4695 = vmatpush1.bf16.msra.mxu1 %v8314_v18  ;;  %v8391_v16 = vld [vmem:[%s11630_s1 + $0x71c] ss:$36 sps:$4 sm:$0xff]   ;;  %v8394_v18 = vld [vmem:[%s11630_s1 + $0x1264] ss:$36 sps:$4 sm:$0xff]  }
 0x196   :  { %4384 = vmatprep.subr.bf16.mxu0 %v8319_v19  ;;  %4696 = vmatprep.subr.bf16.mxu1 %v8322_v22  ;;  %v8389_v19 = vld [vmem:[%s11630_s1 + $0x718] ss:$36 sps:$4 sm:$0xff]   ;;  %v8392_v22 = vld [vmem:[%s11630_s1 + $0x1260] ss:$36 sps:$4 sm:$0xff]  }
 0x197   :  { %v10266_v27 = vpop.f32.mrb[0].mxu1 }
 0x198   :  { %v10268_v29 = vpop.f32.mrb[1].mxu1 }
 0x199   :  { %v4314_v30 = vpop.f32.mrb[2].mxu1  ;;  %4385 = vmatpush1.bf16.msra.mxu0 %v8317_v23  ;;  %4697 = vmatpush1.bf16.msra.mxu1 %v8320_v24  ;;  %v8397_v23 = vld [vmem:[%s11630_s1 + $0x764] ss:$36 sps:$4 sm:$0xff]   ;;  %v8400_v24 = vld [vmem:[%s11630_s1 + $0x12ac] ss:$36 sps:$4 sm:$0xff]  }
 0x19a   :  { %v4315_v32 = vpop.f32.mrb[3].mxu1  ;;  %4386 = vmatprep.subr.bf16.mxu0 %v8325_v25  ;;  %4698 = vmatprep.subr.bf16.mxu1 %v8328_v26  ;;  %v8395_v25 = vld [vmem:[%s11630_s1 + $0x760] ss:$36 sps:$4 sm:$0xff]   ;;  %v8398_v26 = vld [vmem:[%s11630_s1 + $0x12a8] ss:$36 sps:$4 sm:$0xff]  }
 0x19b   :  { %v8403_v30 = vld [vmem:[%s11630_s1 + $0x7ac] ss:$36 sps:$4 sm:$0xff]  }
 0x19c   :  { %v8404_v32 = vld [vmem:[%s11630_s1 + $0x12f0] ss:$36 sps:$4 sm:$0xff]  }
 0x19d   :  { %4387 = vmatpush1.bf16.msra.mxu0 %v8323_v31  ;;  %4699 = vmatpush1.bf16.msra.mxu1 %v8326_v20  ;;  %v8406_v31 = vld [vmem:[%s11630_s1 + $0x12f4] ss:$36 sps:$4 sm:$0xff]   ;;  %v8401_v20 = vld [vmem:[%s11630_s1 + $0x7a8] ss:$36 sps:$4 sm:$0xff]  }
 0x19e   :  { %4388 = vmatprep.subr.bf16.mxu0 %v8331_v33  ;;  %4700 = vmatprep.subr.bf16.mxu1 %v8334_v34  ;;  %v8409_v33 = vld [vmem:[%s11630_s1 + $0x7f4] ss:$36 sps:$4 sm:$0xff]   ;;  %v8410_v34 = vld [vmem:[%s11630_s1 + $0x6e0] ss:$36 sps:$4 sm:$0xff]  }
 0x1a1   :  { %4389 = vmatpush1.bf16.msra.mxu0 %v8329_v35  ;;  %4701 = vmatpush1.bf16.msra.mxu1 %v8332_v36  ;;  %v8407_v35 = vld [vmem:[%s11630_s1 + $0x7f0] ss:$36 sps:$4 sm:$0xff]   ;;  %v8411_v36 = vld [vmem:[%s11630_s1 + $0x4a0] ss:$36 sps:$4 sm:$0xff]  }
 0x1a2   :  { %4399 = vmatprep.subr.bf16.mxu0 %v8337_v38  ;;  %4702 = vmatprep.subr.bf16.mxu1 %v8340_v40  ;;  %v8414_v38 = vld [vmem:[%s11630_s1 + $0x83c] ss:$36 sps:$4 sm:$0xff]   ;;  %v8415_v40 = vld [vmem:[%s11630_s1 + $0x728] ss:$36 sps:$4 sm:$0xff]  }
 0x1a4   :  { %4391 = vmatmul.mubr.bf16.vlgmr.msra.gmra.mrb[12].mxu0 %v9170_v7 }
 0x1a5   :  { %4400 = vmatpush1.bf16.msra.mxu0 %v8335_v41  ;;  %4703 = vmatpush1.bf16.msra.mxu1 %v8338_v42  ;;  %v8412_v41 = vld [vmem:[%s11630_s1 + $0x838] ss:$36 sps:$4 sm:$0xff]   ;;  %v8416_v42 = vld [vmem:[%s11630_s1 + $0x4e8] ss:$36 sps:$4 sm:$0xff]  }
 0x1a6   :  { %4401 = vmatprep.subr.bf16.mxu0 %v8343_v43  ;;  %4704 = vmatprep.subr.bf16.mxu1 %v8346_v44  ;;  %v8419_v43 = vld [vmem:[%s11630_s1 + $0x884] ss:$36 sps:$4 sm:$0xff]   ;;  %v8420_v44 = vld [vmem:[%s11630_s1 + $0x770] ss:$36 sps:$4 sm:$0xff]  }
 0x1a7   :  { %4431 = vmatprep.mubr.bf16.mxu0 %v9118_v54 }
 0x1a9   :  { %4402 = vmatpush1.bf16.msra.mxu0 %v8341_v45  ;;  %4705 = vmatpush1.bf16.msra.mxu1 %v8344_v46  ;;  %v8417_v45 = vld [vmem:[%s11630_s1 + $0x880] ss:$36 sps:$4 sm:$0xff]   ;;  %v8421_v46 = vld [vmem:[%s11630_s1 + $0x530] ss:$36 sps:$4 sm:$0xff]  }
 0x1aa   :  { %4403 = vmatprep.subr.bf16.mxu0 %v8349_v47  ;;  %4706 = vmatprep.subr.bf16.mxu1 %v8352_v48  ;;  %v8424_v47 = vld [vmem:[%s11630_s1 + $0x8cc] ss:$36 sps:$4 sm:$0xff]  }
 0x1ab   :  { %v8422_v48 = vld [vmem:[%s11630_s1 + $0x8c8] ss:$36 sps:$4 sm:$0xff]  }
 0x1ad   :  { %4404 = vmatpush1.bf16.msra.mxu0 %v8347_v50  ;;  %4707 = vmatpush1.bf16.msra.mxu1 %v8350_v51  ;;  %v8426_v50 = vld [vmem:[%s11630_s1 + $0x578] ss:$36 sps:$4 sm:$0xff]  }
 0x1ae   :  { %4405 = vmatprep.subr.bf16.mxu0 %v8355_v52  ;;  %4708 = vmatprep.subr.bf16.mxu1 %v8358_v53  ;;  %v8429_v51 = vld [vmem:[%s11630_s1 + $0x914] ss:$36 sps:$4 sm:$0xff]   ;;  %v8430_v52 = vld [vmem:[%s11630_s1 + $0x800] ss:$36 sps:$4 sm:$0xff]  }
 0x1af   :  { %v8427_v53 = vld [vmem:[%s11630_s1 + $0x910] ss:$36 sps:$4 sm:$0xff]  }
 0x1b1   :  { %4406 = vmatpush1.bf16.msra.mxu0 %v8353_v55  ;;  %4709 = vmatpush1.bf16.msra.mxu1 %v8356_v56  ;;  %v8431_v55 = vld [vmem:[%s11630_s1 + $0x5c0] ss:$36 sps:$4 sm:$0xff]  }
 0x1b2   :  { %4407 = vmatprep.subr.bf16.mxu0 %v8361_v58  ;;  %4710 = vmatprep.subr.bf16.mxu1 %v8364_v59  ;;  %v8434_v56 = vld [vmem:[%s11630_s1 + $0x95c] ss:$36 sps:$4 sm:$0xff]   ;;  %v8435_v58 = vld [vmem:[%s11630_s1 + $0x848] ss:$36 sps:$4 sm:$0xff]  }
 0x1b3   :  { %v8432_v59 = vld [vmem:[%s11630_s1 + $0x958] ss:$36 sps:$4 sm:$0xff]  }
 0x1b5   :  { %4408 = vmatpush1.bf16.msra.mxu0 %v8359_v60  ;;  %4711 = vmatpush1.bf16.msra.mxu1 %v8362_v61  ;;  %v8436_v60 = vld [vmem:[%s11630_s1 + $0x608] ss:$36 sps:$4 sm:$0xff]  }
 0x1b6   :  { %4409 = vmatprep.subr.bf16.mxu0 %v8367_v62  ;;  %4712 = vmatprep.subr.bf16.mxu1 %v8370_v63  ;;  %v8439_v61 = vld [vmem:[%s11630_s1 + $0x9a4] ss:$36 sps:$4 sm:$0xff]   ;;  %v8440_v62 = vld [vmem:[%s11630_s1 + $0x890] ss:$36 sps:$4 sm:$0xff]  }
 0x1b9   :  { %4410 = vmatpush1.bf16.msra.mxu0 %v8365_v0  ;;  %4713 = vmatpush1.bf16.msra.mxu1 %v8368_v1 }
 0x1ba   :  { %4411 = vmatprep.subr.bf16.mxu0 %v8373_v2  ;;  %4714 = vmatprep.subr.bf16.mxu1 %v8376_v3  ;;  %v8437_v2 = vld [vmem:[%s11630_s1 + $0x9a0] ss:$36 sps:$4 sm:$0xff]   ;;  %v8441_v3 = vld [vmem:[%s11630_s1 + $0x650] ss:$36 sps:$4 sm:$0xff]  }
 0x1bd   :  { %4412 = vmatpush1.bf16.msra.mxu0 %v8371_v4  ;;  %4715 = vmatpush1.bf16.msra.mxu1 %v8374_v5  ;;  %v8444_v5 = vld [vmem:[%s11630_s1 + $0x9ec] ss:$36 sps:$4 sm:$0xff]  }
 0x1be   :  { %4413 = vmatprep.subr.bf16.mxu0 %v8379_v6  ;;  %4716 = vmatprep.subr.bf16.mxu1 %v8382_v9  ;;  %v8445_v6 = vld [vmem:[%s11630_s1 + $0x8d8] ss:$36 sps:$4 sm:$0xff]   ;;  %v8442_v9 = vld [vmem:[%s11630_s1 + $0x9e8] ss:$36 sps:$4 sm:$0xff]  }
 0x1c1   :  { %4414 = vmatpush1.bf16.msra.mxu0 %v8377_v10  ;;  %4717 = vmatpush1.bf16.msra.mxu1 %v8380_v11  ;;  %v8446_v10 = vld [vmem:[%s11630_s1 + $0x698] ss:$36 sps:$4 sm:$0xff]  }
 0x1c2   :  { %4415 = vmatprep.subr.bf16.mxu0 %v8385_v12  ;;  %4727 = vmatprep.subr.bf16.mxu1 %v8388_v13  ;;  %v8449_v11 = vld [vmem:[%s11630_s1 + $0xa34] ss:$36 sps:$4 sm:$0xff]   ;;  %v8450_v12 = vld [vmem:[%s11630_s1 + $0xfe0] ss:$36 sps:$4 sm:$0xff]  }
 0x1c3   :  { %v8447_v13 = vld [vmem:[%s11630_s1 + $0xa30] ss:$36 sps:$4 sm:$0xff]  }
 0x1c4   :  { %4719 = vmatmul.mubr.bf16.vlgmr.msra.gmra.mrb[4].mxu1 %v9594_v28 }
 0x1c5   :  { %4416 = vmatpush1.bf16.msra.mxu0 %v8383_v14  ;;  %4728 = vmatpush1.bf16.msra.mxu1 %v8386_v15  ;;  %v8451_v14 = vld [vmem:[%s11630_s1 + $0xda0] ss:$36 sps:$4 sm:$0xff]  }
 0x1c6   :  { %4417 = vmatprep.subr.bf16.mxu0 %v8391_v16  ;;  %4729 = vmatprep.subr.bf16.mxu1 %v8394_v18  ;;  %v8454_v15 = vld [vmem:[%s11630_s1 + $0xa7c] ss:$36 sps:$4 sm:$0xff]   ;;  %v8455_v16 = vld [vmem:[%s11630_s1 + $0x1028] ss:$36 sps:$4 sm:$0xff]  }
 0x1c7   :  { %4759 = vmatprep.mubr.bf16.mxu1 %v8893_v39  ;;  %v8452_v18 = vld [vmem:[%s11630_s1 + $0xa78] ss:$36 sps:$4 sm:$0xff]  }
 0x1c9   :  { %4418 = vmatpush1.bf16.msra.mxu0 %v8389_v19  ;;  %4730 = vmatpush1.bf16.msra.mxu1 %v8392_v22  ;;  %v8456_v19 = vld [vmem:[%s11630_s1 + $0xde8] ss:$36 sps:$4 sm:$0xff]  }
 0x1ca   :  { %4419 = vmatprep.subr.bf16.mxu0 %v8397_v23  ;;  %4731 = vmatprep.subr.bf16.mxu1 %v8400_v24  ;;  %v8459_v22 = vld [vmem:[%s11630_s1 + $0xac4] ss:$36 sps:$4 sm:$0xff]   ;;  %v8461_v24 = vld [vmem:[%s11630_s1 + $0xe30] ss:$36 sps:$4 sm:$0xff]  }
 0x1cb   :  { %v8457_v23 = vld [vmem:[%s11630_s1 + $0xac0] ss:$36 sps:$4 sm:$0xff]  }
 0x1cd   :  { %4420 = vmatpush1.bf16.msra.mxu0 %v8395_v25  ;;  %4732 = vmatpush1.bf16.msra.mxu1 %v8398_v26  ;;  %v8464_v25 = vld [vmem:[%s11630_s1 + $0xb0c] ss:$36 sps:$4 sm:$0xff]   ;;  %v8465_v26 = vld [vmem:[%s11630_s1 + $0x10b8] ss:$36 sps:$4 sm:$0xff]  }
 0x1ce   :  { %4421 = vmatprep.subr.bf16.mxu0 %v8403_v30  ;;  %4733 = vmatprep.subr.bf16.mxu1 %v8406_v31  ;;  %v740_v30 = vlaneseq }
 0x1d1   :  { %4422 = vmatpush1.bf16.msra.mxu0 %v8401_v20  ;;  %4734 = vmatpush1.bf16.msra.mxu1 %v8404_v32 }
 0x1d2   :  { %4423 = vmatprep.subr.bf16.mxu0 %v8409_v33  ;;  %7505 = vmatprep.subr.bf16.mxu1 %v8410_v34 }
 0x1d4   :  { %7295 = vmatmul.mubr.msk.bf16.vlgmr.msra.gmra.mrb[4].mxu1 %vm3944_vm0, %v9844_v57 }
 0x1d5   :  { %4424 = vmatpush1.bf16.msra.mxu0 %v8407_v35  ;;  %7506 = vmatpush3.bf16.msra.mxu1 %v8411_v36 }
 0x1d6   :  { %4425 = vmatprep.subr.bf16.mxu0 %v8414_v38  ;;  %7507 = vmatprep.subr.bf16.mxu1 %v8415_v40 }
 0x1d7   :  { %4840 = vmatprep.mubr.bf16.mxu1 %v9118_v54  ;;  %v8425_v54 = vld [vmem:[%s11630_s1 + $0x7b8] ss:$36 sps:$4 sm:$0xff]  }
 0x1d9   :  { %4426 = vmatpush1.bf16.msra.mxu0 %v8412_v41  ;;  %7508 = vmatpush3.bf16.msra.mxu1 %v8416_v42 }
 0x1da   :  { %4427 = vmatprep.subr.bf16.mxu0 %v8419_v43  ;;  %7509 = vmatprep.subr.bf16.mxu1 %v8420_v44 }
 0x1dd   :  { %4428 = vmatpush1.bf16.msra.mxu0 %v8417_v45  ;;  %7510 = vmatpush3.bf16.msra.mxu1 %v8421_v46 }
 0x1de   :  { %4429 = vmatprep.subr.bf16.mxu0 %v8424_v47  ;;  %7511 = vmatprep.subr.bf16.mxu1 %v8425_v54 }
 0x1e1   :  { %4430 = vmatpush1.bf16.msra.mxu0 %v8422_v48  ;;  %7512 = vmatpush3.bf16.msra.mxu1 %v8426_v50 }
 0x1e2   :  { %4440 = vmatprep.subr.bf16.mxu0 %v8429_v51  ;;  %7513 = vmatprep.subr.bf16.mxu1 %v8430_v52 }
 0x1e4   :  { %4432 = vmatmul.mubr.bf16.vlgmr.msra.gmra.mrb[12].mxu0 %v9172_v8 }
 0x1e5   :  { %4441 = vmatpush1.bf16.msra.mxu0 %v8427_v53  ;;  %7514 = vmatpush3.bf16.msra.mxu1 %v8431_v55 }
 0x1e6   :  { %4442 = vmatprep.subr.bf16.mxu0 %v8434_v56  ;;  %7515 = vmatprep.subr.bf16.mxu1 %v8435_v58 }
 0x1e7   :  { %v10518_v63 = vpop.f32.mrb[0].mxu0  ;;  %4472 = vmatprep.mubr.bf16.mxu0 %v9265_v37 }
 0x1e8   :  { %v10521_v0 = vpop.f32.mrb[1].mxu0 }
 0x1e9   :  { %v4150_v1 = vpop.f32.mrb[2].mxu0  ;;  %4443 = vmatpush1.bf16.msra.mxu0 %v8432_v59  ;;  %7516 = vmatpush3.bf16.msra.mxu1 %v8436_v60 }
 0x1ea   :  { %v4151_v4 = vpop.f32.mrb[3].mxu0  ;;  %4444 = vmatprep.subr.bf16.mxu0 %v8439_v61  ;;  %7517 = vmatprep.subr.bf16.mxu1 %v8440_v62 }
 0x1ed   :  { %4445 = vmatpush1.bf16.msra.mxu0 %v8437_v2  ;;  %7518 = vmatpush3.bf16.msra.mxu1 %v8441_v3 }
 0x1ee   :  { %4446 = vmatprep.subr.bf16.mxu0 %v8444_v5  ;;  %7519 = vmatprep.subr.bf16.mxu1 %v8445_v6 }
 0x1f1   :  { %4447 = vmatpush1.bf16.msra.mxu0 %v8442_v9  ;;  %7520 = vmatpush3.bf16.msra.mxu1 %v8446_v10 }
 0x1f2   :  { %4448 = vmatprep.subr.bf16.mxu0 %v8449_v11  ;;  %7549 = vmatprep.subr.bf16.mxu1 %v8450_v12 }
 0x1f4   :  { %4841 = vmatmul.mubr.bf16.vlgmr.msra.gmra.mrb[8].mxu1 %v9172_v8  ;;  %v8460_v8 = vld [vmem:[%s11630_s1 + $0x1070] ss:$36 sps:$4 sm:$0xff]  }
 0x1f5   :  { %4449 = vmatpush1.bf16.msra.mxu0 %v8447_v13  ;;  %7550 = vmatpush3.bf16.msra.mxu1 %v8451_v14 }
 0x1f6   :  { %4450 = vmatprep.subr.bf16.mxu0 %v8454_v15  ;;  %7551 = vmatprep.subr.bf16.mxu1 %v8455_v16 }
 0x1f7   :  { %4920 = vmatprep.mubr.bf16.mxu1 %v9402_v21 }
 0x1f9   :  { %4451 = vmatpush1.bf16.msra.mxu0 %v8452_v18  ;;  %7552 = vmatpush3.bf16.msra.mxu1 %v8456_v19 }
 0x1fa   :  { %4452 = vmatprep.subr.bf16.mxu0 %v8459_v22  ;;  %7553 = vmatprep.subr.bf16.mxu1 %v8460_v8 }
 0x1fb   :  { %18 = vsyncpa [#allocation4], 0  ;;  %v8462_v31 = vld [vmem:[%s11630_s1 + $0xb08] ss:$36 sps:$4 sm:$0xff]   ;;  %v8466_v20 = vld [vmem:[%s11630_s1 + $0xe78] ss:$36 sps:$4 sm:$0xff]  }
 0x1fc   :  { %v8469_v32 = vld [vmem:[%s11630_s1 + $0xb54] ss:$36 sps:$4 sm:$0xff]   ;;  %v8470_v33 = vld [vmem:[%s11630_s1 + $0x1100] ss:$36 sps:$4 sm:$0xff]   ;;  %v10597_v34 = vshrl.u32 %v740_v30, 7  ;;  %vm8895_vm1 = vmmov 0  }
 0x1fd   :  { %4453 = vmatpush1.bf16.msra.mxu0 %v8457_v23  ;;  %7554 = vmatpush3.bf16.msra.mxu1 %v8461_v24  ;;  %v8467_v35 = vld [vmem:[%s11630_s1 + $0xb50] ss:$36 sps:$4 sm:$0xff]   ;;  %v8471_v36 = vld [vmem:[%s11630_s1 + $0xec0] ss:$36 sps:$4 sm:$0xff]   ;;  %v8475_v40 = vld [vmem:[%s11630_s1 + $0x1148] ss:$36 sps:$4 sm:$0xff]  }
 0x1fe   :  { %4454 = vmatprep.subr.bf16.mxu0 %v8464_v25  ;;  %7555 = vmatprep.subr.bf16.mxu1 %v8465_v26  ;;  %v8474_v38 = vld [vmem:[%s11630_s1 + $0xb9c] ss:$36 sps:$4 sm:$0xff]   ;;  %v10612_v41 = vsub.s32 1, %v10597_v34  ;;  %v8476_v44 = vld [vmem:[%s11630_s1 + $0xf08] ss:$36 sps:$4 sm:$0xff]   ;;  %v750_v19 = vsub.s32 2, %v10597_v34 }
 0x1ff   :  { %v10617_v42 = vld [vmem:[%s11631_s2] sm:$0xff]  ;;  %v8472_v43 = vld [vmem:[%s11630_s1 + $0xb98] ss:$36 sps:$4 sm:$0xff]   ;;  %v8480_v46 = vld [vmem:[%s11630_s1 + $0x1190] ss:$36 sps:$4 sm:$0xff]   ;;  %v754_v23 = vsub.s32 3, %v10597_v34 }
 0x200   :  { %v8479_v45 = vld [vmem:[%s11630_s1 + $0xbe4] ss:$36 sps:$4 sm:$0xff]   ;;  %v747_v47 = vrot.slane %v10617_v42, %v10612_v41  ;;  %v8481_v48 = vld [vmem:[%s11630_s1 + $0xf50] ss:$36 sps:$4 sm:$0xff]   ;;  %v8485_v51 = vld [vmem:[%s11630_s1 + $0x11d8] ss:$36 sps:$4 sm:$0xff]   ;;  %v751_v26 = vrot.slane %v10617_v42, %v750_v19 }
 0x201   :  { %4455 = vmatpush1.bf16.msra.mxu0 %v8462_v31  ;;  %7556 = vmatpush3.bf16.msra.mxu1 %v8466_v20  ;;  %v8477_v54 = vld [vmem:[%s11630_s1 + $0xbe0] ss:$36 sps:$4 sm:$0xff]   ;;  %v8484_v50 = vld [vmem:[%s11630_s1 + $0xc2c] ss:$36 sps:$4 sm:$0xff]   ;;  %v8486_v58 = vld [vmem:[%s11630_s1 + $0xf98] ss:$36 sps:$4 sm:$0xff]   ;;  %v755_v30 = vrot.slane %v10617_v42, %v754_v23 }
 0x202   :  { %4456 = vmatprep.subr.bf16.mxu0 %v8469_v32  ;;  %7557 = vmatprep.subr.bf16.mxu1 %v8470_v33  ;;  %v10648_v52 = vld [vmem:[%s11629_s0] sm:$0xff]  ;;  %v7611_v55 = vadd.f32 %v10521_v0, %v747_v47  ;;  %v8482_v56 = vld [vmem:[%s11630_s1 + $0xc28] ss:$36 sps:$4 sm:$0xff]   ;;  %v8489_v59 = vld [vmem:[%s11630_s1 + $0xc74] ss:$36 sps:$4 sm:$0xff]   ;;  %v10826_v19 = vsub.s32 0, %v10597_v34 }
 0x203   :  { %v48_v53 = vunpack.c.h.bf16 %v10648_v52  ;;  %v8492_v60 = vld [vmem:[%s11632_s3 + $0x4] ss:$8 sps:$4 sm:$0xff]   ;;  %v8487_v62 = vld [vmem:[%s11630_s1 + $0xc70] ss:$36 sps:$4 sm:$0xff]   ;;  %v8490_v0 = vld [vmem:[%s11632_s3] ss:$8 sps:$4 sm:$0xff]  }
 0x204   :  { %v8495_v1 = vld [vmem:[%s11630_s1 + $0xcbc] ss:$36 sps:$4 sm:$0xff]   ;;  %v8496_v5 = vld [vmem:[%s11632_s3 + $0x10] ss:$8 sps:$4 sm:$0xff]   ;;  %v8501_v6 = vld [vmem:[%s11630_s1 + $0xd04] ss:$36 sps:$4 sm:$0xff]  }
 0x205   :  { %4457 = vmatpush1.bf16.msra.mxu0 %v8467_v35  ;;  %7558 = vmatpush3.bf16.msra.mxu1 %v8471_v36  ;;  %v4969_v61 = vmul.f32 %v7611_v55, %v48_v53  ;;  %v8498_v2 = vld [vmem:[%s11632_s3 + $0x14] ss:$8 sps:$4 sm:$0xff]   ;;  %v8504_v9 = vld [vmem:[%s11632_s3 + $0x24] ss:$8 sps:$4 sm:$0xff]   ;;  %v8502_v11 = vld [vmem:[%s11632_s3 + $0x20] ss:$8 sps:$4 sm:$0xff]  }
 0x206   :  { %4458 = vmatprep.subr.bf16.mxu0 %v8474_v38  ;;  %7559 = vmatprep.subr.bf16.mxu1 %v8475_v40  ;;  %v8493_v4 = vld [vmem:[%s11630_s1 + $0xcb8] ss:$36 sps:$4 sm:$0xff]   ;;  %v8499_v10 = vld [vmem:[%s11630_s1 + $0xd00] ss:$36 sps:$4 sm:$0xff]   ;;  %v8507_v12 = vld [vmem:[%s11630_s1 + $0xd4c] ss:$36 sps:$4 sm:$0xff]  }
 0x207   :  { %v4978_v3 = vpack.c.bf16 %v4969_v61, %v4969_v61  ;;  %v8510_v13 = vld [vmem:[%s11632_s3 + $0x34] ss:$8 sps:$4 sm:$0xff]   ;;  %v8505_v14 = vld [vmem:[%s11630_s1 + $0xd48] ss:$36 sps:$4 sm:$0xff]   ;;  %v8508_v15 = vld [vmem:[%s11632_s3 + $0x30] ss:$8 sps:$4 sm:$0xff]  }
 0x208   :  { %v8513_v16 = vld [vmem:[%s11630_s1 + $0xd94] ss:$36 sps:$4 sm:$0xff]   ;;  %v8516_v18 = vld [vmem:[%s11632_s3 + $0x44] ss:$8 sps:$4 sm:$0xff]   ;;  %v8514_v8 = vld [vmem:[%s11632_s3 + $0x40] ss:$8 sps:$4 sm:$0xff]  }
 0x209   :  { %4459 = vmatpush1.bf16.msra.mxu0 %v8472_v43  ;;  %7560 = vmatpush3.bf16.msra.mxu1 %v8476_v44  ;;  %v8511_v22 = vld [vmem:[%s11630_s1 + $0xd90] ss:$36 sps:$4 sm:$0xff]   ;;  %v8519_v24 = vld [vmem:[%s11630_s1 + $0xddc] ss:$36 sps:$4 sm:$0xff]   ;;  %v8525_v32 = vld [vmem:[%s11630_s1 + $0xe24] ss:$36 sps:$4 sm:$0xff]  }
 0x20a   :  { %4460 = vmatprep.subr.bf16.mxu0 %v8479_v45  ;;  %7561 = vmatprep.subr.bf16.mxu1 %v8480_v46  ;;  %v8522_v25 = vld [vmem:[%s11632_s3 + $0x54] ss:$8 sps:$4 sm:$0xff]   ;;  %v8520_v20 = vld [vmem:[%s11632_s3 + $0x50] ss:$8 sps:$4 sm:$0xff]   ;;  %v8528_v33 = vld [vmem:[%s11632_s3 + $0x64] ss:$8 sps:$4 sm:$0xff]  }
 0x20b   :  { %v8517_v31 = vld [vmem:[%s11630_s1 + $0xdd8] ss:$36 sps:$4 sm:$0xff]   ;;  %v8523_v44 = vld [vmem:[%s11630_s1 + $0xe20] ss:$36 sps:$4 sm:$0xff]   ;;  %vm6605_vm7 = vcmask 64512   ;;  %vm6654_vm8 = vcmask 57344  }
 0x20c   :  { %v8526_v45 = vld [vmem:[%s11632_s3 + $0x60] ss:$8 sps:$4 sm:$0xff]   ;;  %v8534_v47 = vld [vmem:[%s11632_s3 + $0x74] ss:$8 sps:$4 sm:$0xff]  }
 0x20d   :  { %4461 = vmatpush1.bf16.msra.mxu0 %v8477_v54  ;;  %7562 = vmatpush3.bf16.msra.mxu1 %v8481_v48  ;;  %v8537_v53 = vld [vmem:[%s11630_s1 + $0xeb4] ss:$36 sps:$4 sm:$0xff]   ;;  %v8538_v55 = vld [vmem:[%s11632_s3 + $0x80] ss:$8 sps:$4 sm:$0xff]  }
 0x20e   :  { %4462 = vmatprep.subr.bf16.mxu0 %v8484_v50  ;;  %7563 = vmatprep.subr.bf16.mxu1 %v8485_v51  ;;  %v8529_v50 = vld [vmem:[%s11630_s1 + $0xe68] ss:$36 sps:$4 sm:$0xff]   ;;  %v8532_v51 = vld [vmem:[%s11632_s3 + $0x70] ss:$8 sps:$4 sm:$0xff]  }
 0x20f   :  { %v8549_v61 = vld [vmem:[%s11630_s1 + $0xf44] ss:$36 sps:$4 sm:$0xff]   ;;  %v8565_v23 = vld [vmem:[%s11630_s1 + $0x1018] ss:$36 sps:$4 sm:$0xff]  }
 0x211   :  { %4463 = vmatpush1.bf16.msra.mxu0 %v8482_v56  ;;  %7564 = vmatpush3.bf16.msra.mxu1 %v8486_v58  ;;  %v8543_v56 = vld [vmem:[%s11630_s1 + $0xefc] ss:$36 sps:$4 sm:$0xff]  }
 0x212   :  { %4464 = vmatprep.subr.bf16.mxu0 %v8489_v59  ;;  %5817 = vmatprep.subr.bf16.mxu1 %v8492_v60  ;;  %v8546_v58 = vld [vmem:[%s11632_s3 + $0x94] ss:$8 sps:$4 sm:$0xff]   ;;  %v8544_v60 = vld [vmem:[%s11632_s3 + $0x90] ss:$8 sps:$4 sm:$0xff]  }
 0x213   :  { %v8541_v59 = vld [vmem:[%s11630_s1 + $0xef8] ss:$36 sps:$4 sm:$0xff]  }
 0x214   :  { %4921 = vmatmul.mubr.bf16.vlgmr.msra.gmra.mrb[12].mxu1 %v9594_v28 }
 0x215   :  { %4465 = vmatpush1.bf16.msra.mxu0 %v8487_v62  ;;  %5818 = vmatpush1.bf16.msra.mxu1 %v8490_v0  ;;  %v8552_v62 = vld [vmem:[%s11632_s3 + $0xa4] ss:$8 sps:$4 sm:$0xff]  }
 0x216   :  { %5849 = vmatprep.mubr.bf16.mxu1 %v4978_v3  ;;  %4466 = vmatprep.subr.bf16.mxu0 %v8495_v1 }
 0x217   :  { %5819 = vmatprep.subr.bf16.mxu1 %v8498_v2 }
 0x219   :  { %4467 = vmatpush1.bf16.msra.mxu0 %v8493_v4  ;;  %5820 = vmatpush1.bf16.msra.mxu1 %v8496_v5  ;;  %v8547_v5 = vld [vmem:[%s11630_s1 + $0xf40] ss:$36 sps:$4 sm:$0xff]  }
 0x21a   :  { %4468 = vmatprep.subr.bf16.mxu0 %v8501_v6  ;;  %5821 = vmatprep.subr.bf16.mxu1 %v8504_v9  ;;  %v8550_v6 = vld [vmem:[%s11632_s3 + $0xa0] ss:$8 sps:$4 sm:$0xff]  }
 0x21d   :  { %4469 = vmatpush1.bf16.msra.mxu0 %v8499_v10  ;;  %5822 = vmatpush1.bf16.msra.mxu1 %v8502_v11  ;;  %v8555_v10 = vld [vmem:[%s11630_s1 + $0xf8c] ss:$36 sps:$4 sm:$0xff]   ;;  %v8558_v11 = vld [vmem:[%s11632_s3 + $0xb4] ss:$8 sps:$4 sm:$0xff]  }
 0x21e   :  { %4470 = vmatprep.subr.bf16.mxu0 %v8507_v12  ;;  %5823 = vmatprep.subr.bf16.mxu1 %v8510_v13  ;;  %v8553_v12 = vld [vmem:[%s11630_s1 + $0xf88] ss:$36 sps:$4 sm:$0xff]   ;;  %v8556_v13 = vld [vmem:[%s11632_s3 + $0xb0] ss:$8 sps:$4 sm:$0xff]  }
 0x221   :  { %4471 = vmatpush1.bf16.msra.mxu0 %v8505_v14  ;;  %5824 = vmatpush1.bf16.msra.mxu1 %v8508_v15  ;;  %v8561_v14 = vld [vmem:[%s11630_s1 + $0xfd4] ss:$36 sps:$4 sm:$0xff]   ;;  %v8564_v15 = vld [vmem:[%s11632_s3 + $0xc4] ss:$8 sps:$4 sm:$0xff]  }
 0x222   :  { %4481 = vmatprep.subr.bf16.mxu0 %v8513_v16  ;;  %5825 = vmatprep.subr.bf16.mxu1 %v8516_v18  ;;  %v8559_v16 = vld [vmem:[%s11630_s1 + $0xfd0] ss:$36 sps:$4 sm:$0xff]   ;;  %v8562_v18 = vld [vmem:[%s11632_s3 + $0xc0] ss:$8 sps:$4 sm:$0xff]  }
 0x224   :  { %4473 = vmatmul.mubr.bf16.vlgmr.msra.gmra.mrb[12].mxu0 %v9387_v17 }
 0x225   :  { %4482 = vmatpush1.bf16.msra.mxu0 %v8511_v22  ;;  %5826 = vmatpush1.bf16.msra.mxu1 %v8514_v8  ;;  %v8567_v22 = vld [vmem:[%s11630_s1 + $0x101c] ss:$36 sps:$4 sm:$0xff]  }
 0x226   :  { %4483 = vmatprep.subr.bf16.mxu0 %v8519_v24  ;;  %5827 = vmatprep.subr.bf16.mxu1 %v8522_v25  ;;  %v8570_v8 = vld [vmem:[%s11632_s3 + $0xd4] ss:$8 sps:$4 sm:$0xff]   ;;  %v8568_v24 = vld [vmem:[%s11632_s3 + $0xd0] ss:$8 sps:$4 sm:$0xff]   ;;  %v743_v25 = vrot.slane %v10617_v42, %v10826_v19 }
 0x227   :  { %v4187_v35 = vpop.f32.mrb[4].mxu0  ;;  %4513 = vmatprep.mubr.bf16.mxu0 %v9402_v21  ;;  %v8531_v21 = vld [vmem:[%s11630_s1 + $0xe6c] ss:$36 sps:$4 sm:$0xff]  }
 0x228   :  { %v4188_v36 = vadd.f32 %v4187_v35, %v751_v26  ;;  %v4189_v38 = vpop.f32.mrb[5].mxu0  ;;  %v8573_v26 = vld [vmem:[%s11630_s1 + $0x1064] ss:$36 sps:$4 sm:$0xff]   ;;  %v8579_v35 = vld [vmem:[%s11630_s1 + $0x10ac] ss:$36 sps:$4 sm:$0xff]  }
 0x229   :  { %v4190_v40 = vadd.f32 %v4189_v38, %v755_v30  ;;  %v4191_v43 = vpop.f32.mrb[6].mxu0  ;;  %4484 = vmatpush1.bf16.msra.mxu0 %v8517_v31  ;;  %5828 = vmatpush1.bf16.msra.mxu1 %v8520_v20  ;;  %v8576_v30 = vld [vmem:[%s11632_s3 + $0xe4] ss:$8 sps:$4 sm:$0xff]   ;;  %v8574_v20 = vld [vmem:[%s11632_s3 + $0xe0] ss:$8 sps:$4 sm:$0xff]  }
 0x22a   :  { %v4192_v46 = vpop.f32.mrb[7].mxu0  ;;  %4485 = vmatprep.subr.bf16.mxu0 %v8525_v32  ;;  %5829 = vmatprep.subr.bf16.mxu1 %v8528_v33  ;;  %v7613_v54 = vadd.f32 %v10266_v27, %v4188_v36  ;;  %v8540_v27 = vld [vmem:[%s11632_s3 + $0x84] ss:$8 sps:$4 sm:$0xff]   ;;  %v47_v32 = vunpack.c.l.bf16 %v10648_v52  ;;  %v7610_v33 = vadd.f32 %v10518_v63, %v743_v25  ;;  %v8582_v36 = vld [vmem:[%s11632_s3 + $0xf4] ss:$8 sps:$4 sm:$0xff]  }
 0x22b   :  { %v7616_v48 = vadd.f32 %v10268_v29, %v4190_v40  ;;  %v8535_v29 = vld [vmem:[%s11630_s1 + $0xeb0] ss:$36 sps:$4 sm:$0xff]   ;;  %v8571_v31 = vld [vmem:[%s11630_s1 + $0x1060] ss:$36 sps:$4 sm:$0xff]   ;;  %v10865_v38 = vld [vmem:[%s11629_s0 + $0x8] sm:$0xff] }
 0x22c   :  { %v50_v40 = vunpack.c.h.bf16 %v10865_v38  ;;  %v8577_v63 = vld [vmem:[%s11630_s1 + $0x10a8] ss:$36 sps:$4 sm:$0xff]   ;;  %v8580_v52 = vld [vmem:[%s11632_s3 + $0xf0] ss:$8 sps:$4 sm:$0xff]   ;;  %v4968_v43 = vmul.f32 %v7610_v33, %v47_v32 }
 0x22d   :  { %4486 = vmatpush1.bf16.msra.mxu0 %v8523_v44  ;;  %5830 = vmatpush1.bf16.msra.mxu1 %v8526_v45  ;;  %v8585_v44 = vld [vmem:[%s11630_s1 + $0x10f4] ss:$36 sps:$4 sm:$0xff]   ;;  %v8588_v45 = vld [vmem:[%s11632_s3 + $0x104] ss:$8 sps:$4 sm:$0xff]   ;;  %v8642_v33 = vld [vmem:[%s11632_s3 + $0x1a0] ss:$8 sps:$4 sm:$0xff]  }
 0x22e   :  { %4487 = vmatprep.subr.bf16.mxu0 %v8531_v21  ;;  %5831 = vmatprep.subr.bf16.mxu1 %v8534_v47  ;;  %v8583_v21 = vld [vmem:[%s11630_s1 + $0x10f0] ss:$36 sps:$4 sm:$0xff]   ;;  %v8586_v47 = vld [vmem:[%s11632_s3 + $0x100] ss:$8 sps:$4 sm:$0xff]   ;;  %v8644_v32 = vld [vmem:[%s11632_s3 + $0x1a4] ss:$8 sps:$4 sm:$0xff]  }
 0x22f   :  { %v8636_v25 = vld [vmem:[%s11630_s1 + $0x2a8] ss:$36 sps:$4 sm:$0xff]  }
 0x231   :  { %4488 = vmatpush1.bf16.msra.mxu0 %v8529_v50  ;;  %5832 = vmatpush1.bf16.msra.mxu1 %v8532_v51  ;;  %v8594_v50 = vld [vmem:[%s11632_s3 + $0x114] ss:$8 sps:$4 sm:$0xff]  }
 0x232   :  { %4489 = vmatprep.subr.bf16.mxu0 %v8537_v53  ;;  %5833 = vmatprep.subr.bf16.mxu1 %v8540_v27  ;;  %v8589_v53 = vld [vmem:[%s11630_s1 + $0x1138] ss:$36 sps:$4 sm:$0xff]  }
 0x233   :  { %v8592_v27 = vld [vmem:[%s11632_s3 + $0x110] ss:$8 sps:$4 sm:$0xff]  }
 0x235   :  { %4490 = vmatpush1.bf16.msra.mxu0 %v8535_v29  ;;  %5834 = vmatpush1.bf16.msra.mxu1 %v8538_v55  ;;  %v8597_v29 = vld [vmem:[%s11630_s1 + $0x1184] ss:$36 sps:$4 sm:$0xff]  }
 0x236   :  { %4491 = vmatprep.subr.bf16.mxu0 %v8543_v56  ;;  %5835 = vmatprep.subr.bf16.mxu1 %v8546_v58  ;;  %v8600_v55 = vld [vmem:[%s11632_s3 + $0x124] ss:$8 sps:$4 sm:$0xff]   ;;  %v8598_v58 = vld [vmem:[%s11632_s3 + $0x120] ss:$8 sps:$4 sm:$0xff]  }
 0x237   :  { %v4351_v0 = vpop.f32.mrb[8].mxu0  ;;  %v8595_v56 = vld [vmem:[%s11630_s1 + $0x1180] ss:$36 sps:$4 sm:$0xff]  }
 0x238   :  { %v10793_v1 = vadd.f32 %v7613_v54, %v4351_v0  ;;  %v4353_v2 = vpop.f32.mrb[9].mxu0  ;;  %v4977_v54 = vpack.c.bf16 %v4968_v43, %v4968_v43  ;;  %v8609_v0 = vld [vmem:[%s11630_s1 + $0x1214] ss:$36 sps:$4 sm:$0xff]   ;;  %v8654_v43 = vld [vmem:[%s11632_s3 + $0x1c4] ss:$8 sps:$4 sm:$0xff]  }
 0x239   :  { %v7617_v3 = vadd.f32 %v7616_v48, %v4353_v2  ;;  %v4355_v4 = vpop.f32.mrb[10].mxu0  ;;  %4492 = vmatpush1.bf16.msra.mxu0 %v8541_v59  ;;  %5836 = vmatpush1.bf16.msra.mxu1 %v8544_v60  ;;  %v8591_v48 = vld [vmem:[%s11630_s1 + $0x113c] ss:$36 sps:$4 sm:$0xff]   ;;  %v8603_v59 = vld [vmem:[%s11630_s1 + $0x11cc] ss:$36 sps:$4 sm:$0xff]  }
 0x23a   :  { %v4356_v9 = vpop.f32.mrb[11].mxu0  ;;  %4493 = vmatprep.subr.bf16.mxu0 %v8549_v61  ;;  %5837 = vmatprep.subr.bf16.mxu1 %v8552_v62  ;;  %v8606_v60 = vld [vmem:[%s11632_s3 + $0x134] ss:$8 sps:$4 sm:$0xff]   ;;  %v8601_v61 = vld [vmem:[%s11630_s1 + $0x11c8] ss:$36 sps:$4 sm:$0xff]  }
 0x23b   :  { %v4971_v46 = vmul.f32 %v7617_v3, %v50_v40  ;;  %v8604_v62 = vld [vmem:[%s11632_s3 + $0x130] ss:$8 sps:$4 sm:$0xff]   ;;  %v8612_v2 = vld [vmem:[%s11632_s3 + $0x144] ss:$8 sps:$4 sm:$0xff]   ;;  %v8610_v4 = vld [vmem:[%s11632_s3 + $0x140] ss:$8 sps:$4 sm:$0xff]  }
 0x23c   :  { %v8607_v3 = vld [vmem:[%s11630_s1 + $0x1210] ss:$36 sps:$4 sm:$0xff]   ;;  %v8613_v9 = vld [vmem:[%s11630_s1 + $0x1258] ss:$36 sps:$4 sm:$0xff]  }
 0x23d   :  { %4494 = vmatpush1.bf16.msra.mxu0 %v8547_v5  ;;  %5838 = vmatpush1.bf16.msra.mxu1 %v8550_v6  ;;  %v4980_v51 = vpack.c.bf16 %v4971_v46, %v4971_v46  ;;  %v8615_v5 = vld [vmem:[%s11630_s1 + $0x125c] ss:$36 sps:$4 sm:$0xff]   ;;  %v8647_v40 = vld [vmem:[%s11632_s3 + $0x1b0] ss:$8 sps:$4 sm:$0xff]   ;;  %v8656_v46 = vld [vmem:[%s11630_s1 + $0x3c8] ss:$36 sps:$4 sm:$0xff]  }
 0x23e   :  { %4495 = vmatprep.subr.bf16.mxu0 %v8555_v10  ;;  %5839 = vmatprep.subr.bf16.mxu1 %v8558_v11  ;;  %v8618_v6 = vld [vmem:[%s11632_s3 + $0x154] ss:$8 sps:$4 sm:$0xff]   ;;  %v8616_v10 = vld [vmem:[%s11632_s3 + $0x150] ss:$8 sps:$4 sm:$0xff]   ;;  %v8621_v11 = vld [vmem:[%s11630_s1 + $0x12a4] ss:$36 sps:$4 sm:$0xff]  }
 0x241   :  { %4496 = vmatpush1.bf16.msra.mxu0 %v8553_v12  ;;  %5840 = vmatpush1.bf16.msra.mxu1 %v8556_v13  ;;  %v8619_v12 = vld [vmem:[%s11630_s1 + $0x12a0] ss:$36 sps:$4 sm:$0xff]  }
 0x242   :  { %4497 = vmatprep.subr.bf16.mxu0 %v8561_v14  ;;  %5841 = vmatprep.subr.bf16.mxu1 %v8564_v15  ;;  %v8622_v13 = vld [vmem:[%s11632_s3 + $0x160] ss:$8 sps:$4 sm:$0xff]   ;;  %v8627_v14 = vld [vmem:[%s11630_s1 + $0x12ec] ss:$36 sps:$4 sm:$0xff]   ;;  %v8630_v15 = vld [vmem:[%s11632_s3 + $0x174] ss:$8 sps:$4 sm:$0xff]  }
 0x245   :  { %4498 = vmatpush1.bf16.msra.mxu0 %v8559_v16  ;;  %5842 = vmatpush1.bf16.msra.mxu1 %v8562_v18  ;;  %v8625_v16 = vld [vmem:[%s11630_s1 + $0x12e8] ss:$36 sps:$4 sm:$0xff]   ;;  %v8628_v18 = vld [vmem:[%s11632_s3 + $0x170] ss:$8 sps:$4 sm:$0xff]  }
 0x246   :  { %4499 = vmatprep.subr.bf16.mxu0 %v8567_v22  ;;  %5843 = vmatprep.subr.bf16.mxu1 %v8570_v8  ;;  %v8631_v22 = vld [vmem:[%s11630_s1 + $0x260] ss:$36 sps:$4 sm:$0xff]  }
 0x247   :  { %v8634_v8 = vld [vmem:[%s11632_s3 + $0x184] ss:$8 sps:$4 sm:$0xff]  }
 0x249   :  { %4500 = vmatpush1.bf16.msra.mxu0 %v8565_v23  ;;  %5844 = vmatpush1.bf16.msra.mxu1 %v8568_v24  ;;  %v8632_v23 = vld [vmem:[%s11632_s3 + $0x180] ss:$8 sps:$4 sm:$0xff]  }
 0x24a   :  { %4501 = vmatprep.subr.bf16.mxu0 %v8573_v26  ;;  %5845 = vmatprep.subr.bf16.mxu1 %v8576_v30  ;;  %v8635_v24 = vld [vmem:[%s11630_s1 + $0x20] ss:$36 sps:$4 sm:$0xff]   ;;  %v8639_v26 = vld [vmem:[%s11632_s3 + $0x194] ss:$8 sps:$4 sm:$0xff]   ;;  %v8637_v30 = vld [vmem:[%s11632_s3 + $0x190] ss:$8 sps:$4 sm:$0xff]  }
 0x24d   :  { %4502 = vmatpush1.bf16.msra.mxu0 %v8571_v31  ;;  %5846 = vmatpush1.bf16.msra.mxu1 %v8574_v20  ;;  %v8640_v31 = vld [vmem:[%s11630_s1 + $0x68] ss:$36 sps:$4 sm:$0xff]   ;;  %v8641_v20 = vld [vmem:[%s11630_s1 + $0x2f0] ss:$36 sps:$4 sm:$0xff]  }
 0x24e   :  { %4503 = vmatprep.subr.bf16.mxu0 %v8579_v35  ;;  %5847 = vmatprep.subr.bf16.mxu1 %v8582_v36  ;;  %v8645_v35 = vld [vmem:[%s11630_s1 + $0xb0] ss:$36 sps:$4 sm:$0xff]   ;;  %v8646_v36 = vld [vmem:[%s11630_s1 + $0x338] ss:$36 sps:$4 sm:$0xff]  }
 0x251   :  { %4504 = vmatpush1.bf16.msra.mxu0 %v8577_v63  ;;  %5848 = vmatpush1.bf16.msra.mxu1 %v8580_v52  ;;  %v8650_v63 = vld [vmem:[%s11630_s1 + $0xf8] ss:$36 sps:$4 sm:$0xff]   ;;  %v8651_v52 = vld [vmem:[%s11630_s1 + $0x380] ss:$36 sps:$4 sm:$0xff]  }
 0x252   :  { %4505 = vmatprep.subr.bf16.mxu0 %v8585_v44  ;;  %5858 = vmatprep.subr.bf16.mxu1 %v8588_v45  ;;  %v8652_v44 = vld [vmem:[%s11632_s3 + $0x1c0] ss:$8 sps:$4 sm:$0xff]  }
 0x253   :  { %v8655_v45 = vld [vmem:[%s11630_s1 + $0x140] ss:$36 sps:$4 sm:$0xff]  }
 0x254   :  { %5850 = vmatmul.mubr.bf16.vlgmr.msra.gmra.mrb[16].mxu1 %v4977_v54  ;;  %v8660_v54 = vld [vmem:[%s11630_s1 + $0x188] ss:$36 sps:$4 sm:$0xff]  }
 0x255   :  { %4506 = vmatpush1.bf16.msra.mxu0 %v8583_v21  ;;  %5859 = vmatpush1.bf16.msra.mxu1 %v8586_v47  ;;  %v8659_v21 = vld [vmem:[%s11632_s3 + $0x1d4] ss:$8 sps:$4 sm:$0xff]   ;;  %v8657_v47 = vld [vmem:[%s11632_s3 + $0x1d0] ss:$8 sps:$4 sm:$0xff]  }
 0x256   :  { %5890 = vmatprep.mubr.bf16.mxu1 %v4980_v51  ;;  %4507 = vmatprep.subr.bf16.mxu0 %v8591_v48  ;;  %v8661_v48 = vld [vmem:[%s11630_s1 + $0x410] ss:$36 sps:$4 sm:$0xff]   ;;  %v8662_v51 = vld [vmem:[%s11632_s3 + $0x1e0] ss:$8 sps:$4 sm:$0xff]  }
 0x257   :  { %5860 = vmatprep.subr.bf16.mxu1 %v8594_v50  ;;  %v8664_v50 = vld [vmem:[%s11632_s3 + $0x1e4] ss:$8 sps:$4 sm:$0xff]  }
 0x259   :  { %4508 = vmatpush1.bf16.msra.mxu0 %v8589_v53  ;;  %5861 = vmatpush1.bf16.msra.mxu1 %v8592_v27  ;;  %v8665_v53 = vld [vmem:[%s11630_s1 + $0x1d0] ss:$36 sps:$4 sm:$0xff]   ;;  %v49_v27 = vunpack.c.l.bf16 %v10865_v38  ;;  %v8670_v38 = vld [vmem:[%s11630_s1 + $0x218] ss:$36 sps:$4 sm:$0xff]  }
 0x25a   :  { %4509 = vmatprep.subr.bf16.mxu0 %v8597_v29  ;;  %5862 = vmatprep.subr.bf16.mxu1 %v8600_v55  ;;  %v8666_v29 = vld [vmem:[%s11630_s1 + $0x458] ss:$36 sps:$4 sm:$0xff]  }
 0x25b   :  { %v8669_v55 = vld [vmem:[%s11632_s3 + $0x1f4] ss:$8 sps:$4 sm:$0xff]  }
 0x25d   :  { %4510 = vmatpush1.bf16.msra.mxu0 %v8595_v56  ;;  %5863 = vmatpush1.bf16.msra.mxu1 %v8598_v58  ;;  %v8667_v56 = vld [vmem:[%s11632_s3 + $0x1f0] ss:$8 sps:$4 sm:$0xff]   ;;  %v4970_v58 = vmul.f32 %v10793_v1, %v49_v27  ;;  %v8673_v1 = vld [vmem:[%s11630_s1 + $0xba8] ss:$36 sps:$4 sm:$0xff]   ;;  %v8732_v27 = vld [vmem:[%s11632_s3 + $0x2d4] ss:$8 sps:$4 sm:$0xff]  }
 0x25e   :  { %4511 = vmatprep.subr.bf16.mxu0 %v8603_v59  ;;  %5864 = vmatprep.subr.bf16.mxu1 %v8606_v60  ;;  %v8671_v59 = vld [vmem:[%s11630_s1 + $0xb60] ss:$36 sps:$4 sm:$0xff]  }
 0x25f   :  { %v8693_v60 = vld [vmem:[%s11632_s3 + $0x204] ss:$8 sps:$4 sm:$0xff]  }
 0x261   :  { %4512 = vmatpush1.bf16.msra.mxu0 %v8601_v61  ;;  %5865 = vmatpush1.bf16.msra.mxu1 %v8604_v62  ;;  %v8672_v61 = vld [vmem:[%s11630_s1 + $0x920] ss:$36 sps:$4 sm:$0xff]   ;;  %v4979_v62 = vpack.c.bf16 %v4970_v58, %v4970_v58 }
 0x262   :  { %4522 = vmatprep.subr.bf16.mxu0 %v8609_v0  ;;  %5866 = vmatprep.subr.bf16.mxu1 %v8612_v2  ;;  %v8691_v0 = vld [vmem:[%s11632_s3 + $0x200] ss:$8 sps:$4 sm:$0xff]   ;;  %v8696_v2 = vld [vmem:[%s11632_s3 + $0x214] ss:$8 sps:$4 sm:$0xff]  }
 0x264   :  { %4514 = vmatmul.mubr.bf16.vlgmr.msra.gmra.mrb[12].mxu0 %v9594_v28  ;;  %v8624_v28 = vld [vmem:[%s11632_s3 + $0x164] ss:$8 sps:$4 sm:$0xff]  }
 0x265   :  { %4523 = vmatpush1.bf16.msra.mxu0 %v8607_v3  ;;  %5867 = vmatpush1.bf16.msra.mxu1 %v8610_v4  ;;  %v8674_v3 = vld [vmem:[%s11630_s1 + $0x968] ss:$36 sps:$4 sm:$0xff]   ;;  %v8675_v4 = vld [vmem:[%s11630_s1 + $0xbf0] ss:$36 sps:$4 sm:$0xff]  }
 0x266   :  { %4524 = vmatprep.subr.bf16.mxu0 %v8615_v5  ;;  %5868 = vmatprep.subr.bf16.mxu1 %v8618_v6  ;;  %v8694_v5 = vld [vmem:[%s11632_s3 + $0x210] ss:$8 sps:$4 sm:$0xff]  }
 0x267   :  { %4554 = vmatprep.mubr.bf16.mxu0 %v8893_v39  ;;  %v8677_v6 = vld [vmem:[%s11630_s1 + $0xc38] ss:$36 sps:$4 sm:$0xff]  }
 0x269   :  { %4525 = vmatpush1.bf16.msra.mxu0 %v8613_v9  ;;  %5869 = vmatpush1.bf16.msra.mxu1 %v8616_v10  ;;  %v8697_v9 = vld [vmem:[%s11632_s3 + $0x220] ss:$8 sps:$4 sm:$0xff]   ;;  %v8702_v10 = vld [vmem:[%s11632_s3 + $0x234] ss:$8 sps:$4 sm:$0xff]  }
 0x26a   :  { %4526 = vmatprep.subr.bf16.mxu0 %v8621_v11  ;;  %5870 = vmatprep.subr.bf16.mxu1 %v8624_v28  ;;  %v8678_v11 = vld [vmem:[%s11630_s1 + $0x9f8] ss:$36 sps:$4 sm:$0xff]   ;;  %v8679_v28 = vld [vmem:[%s11630_s1 + $0xc80] ss:$36 sps:$4 sm:$0xff]  }
 0x26d   :  { %4527 = vmatpush1.bf16.msra.mxu0 %v8619_v12  ;;  %5871 = vmatpush1.bf16.msra.mxu1 %v8622_v13  ;;  %v8700_v12 = vld [vmem:[%s11632_s3 + $0x230] ss:$8 sps:$4 sm:$0xff]   ;;  %v8705_v13 = vld [vmem:[%s11632_s3 + $0x244] ss:$8 sps:$4 sm:$0xff]  }
 0x26e   :  { %4528 = vmatprep.subr.bf16.mxu0 %v8627_v14  ;;  %5872 = vmatprep.subr.bf16.mxu1 %v8630_v15  ;;  %v8680_v14 = vld [vmem:[%s11630_s1 + $0xa40] ss:$36 sps:$4 sm:$0xff]   ;;  %v8681_v15 = vld [vmem:[%s11630_s1 + $0xcc8] ss:$36 sps:$4 sm:$0xff]  }
 0x271   :  { %4529 = vmatpush1.bf16.msra.mxu0 %v8625_v16  ;;  %5873 = vmatpush1.bf16.msra.mxu1 %v8628_v18  ;;  %v8703_v16 = vld [vmem:[%s11632_s3 + $0x240] ss:$8 sps:$4 sm:$0xff]   ;;  %v8708_v18 = vld [vmem:[%s11632_s3 + $0x254] ss:$8 sps:$4 sm:$0xff]  }
 0x272   :  { %7483 = vmatprep.subr.bf16.mxu0 %v8631_v22  ;;  %5874 = vmatprep.subr.bf16.mxu1 %v8634_v8  ;;  %v8682_v22 = vld [vmem:[%s11630_s1 + $0xa88] ss:$36 sps:$4 sm:$0xff]   ;;  %v8683_v8 = vld [vmem:[%s11630_s1 + $0xd10] ss:$36 sps:$4 sm:$0xff]  }
 0x274   :  { %7294 = vmatmul.mubr.msk.bf16.vlgmr.msra.gmra.mrb[12].mxu0 %vm3944_vm0, %v9844_v57 }
 0x275   :  { %7484 = vmatpush3.bf16.msra.mxu0 %v8635_v24  ;;  %5875 = vmatpush1.bf16.msra.mxu1 %v8632_v23  ;;  %v8706_v23 = vld [vmem:[%s11632_s3 + $0x250] ss:$8 sps:$4 sm:$0xff]  }
 0x276   :  { %7485 = vmatprep.subr.bf16.mxu0 %v8636_v25  ;;  %5876 = vmatprep.subr.bf16.mxu1 %v8639_v26  ;;  %v8711_v25 = vld [vmem:[%s11632_s3 + $0x264] ss:$8 sps:$4 sm:$0xff]  }
 0x277   :  { %4800 = vmatprep.mubr.bf16.mxu0 %v9104_v49  ;;  %v8649_v49 = vld [vmem:[%s11632_s3 + $0x1b4] ss:$8 sps:$4 sm:$0xff]  }
 0x279   :  { %7486 = vmatpush3.bf16.msra.mxu0 %v8640_v31  ;;  %5877 = vmatpush1.bf16.msra.mxu1 %v8637_v30  ;;  %v8684_v31 = vld [vmem:[%s11630_s1 + $0xad0] ss:$36 sps:$4 sm:$0xff]  }
 0x27a   :  { %7487 = vmatprep.subr.bf16.mxu0 %v8641_v20  ;;  %5878 = vmatprep.subr.bf16.mxu1 %v8644_v32  ;;  %v8685_v32 = vld [vmem:[%s11630_s1 + $0xd58] ss:$36 sps:$4 sm:$0xff]  }
 0x27d   :  { %7488 = vmatpush3.bf16.msra.mxu0 %v8645_v35  ;;  %5879 = vmatpush1.bf16.msra.mxu1 %v8642_v33  ;;  %v8709_v33 = vld [vmem:[%s11632_s3 + $0x260] ss:$8 sps:$4 sm:$0xff]   ;;  %v8714_v35 = vld [vmem:[%s11632_s3 + $0x274] ss:$8 sps:$4 sm:$0xff]  }
 0x27e   :  { %7489 = vmatprep.subr.bf16.mxu0 %v8646_v36  ;;  %5880 = vmatprep.subr.bf16.mxu1 %v8649_v49  ;;  %v8686_v36 = vld [vmem:[%s11630_s1 + $0xb18] ss:$36 sps:$4 sm:$0xff]  }
 0x27f   :  { %v8712_v49 = vld [vmem:[%s11632_s3 + $0x270] ss:$8 sps:$4 sm:$0xff]  }
 0x281   :  { %7490 = vmatpush3.bf16.msra.mxu0 %v8650_v63  ;;  %5881 = vmatpush1.bf16.msra.mxu1 %v8647_v40  ;;  %v8717_v40 = vld [vmem:[%s11632_s3 + $0x284] ss:$8 sps:$4 sm:$0xff]  }
 0x282   :  { %7491 = vmatprep.subr.bf16.mxu0 %v8651_v52  ;;  %5882 = vmatprep.subr.bf16.mxu1 %v8654_v43  ;;  %v8687_v63 = vld [vmem:[%s11630_s1 + $0x1220] ss:$36 sps:$4 sm:$0xff]   ;;  %v8894_v52 = vmov 0.0  }
 0x283   :  { %v8715_v43 = vld [vmem:[%s11632_s3 + $0x280] ss:$8 sps:$4 sm:$0xff]  }
 0x285   :  { %7492 = vmatpush3.bf16.msra.mxu0 %v8655_v45  ;;  %5883 = vmatpush1.bf16.msra.mxu1 %v8652_v44  ;;  %v8720_v44 = vld [vmem:[%s11632_s3 + $0x294] ss:$8 sps:$4 sm:$0xff]   ;;  %v8688_v45 = vld [vmem:[%s11630_s1 + $0x1268] ss:$36 sps:$4 sm:$0xff]  }
 0x286   :  { %7493 = vmatprep.subr.bf16.mxu0 %v8656_v46  ;;  %5884 = vmatprep.subr.bf16.mxu1 %v8659_v21  ;;  %v8718_v46 = vld [vmem:[%s11632_s3 + $0x290] ss:$8 sps:$4 sm:$0xff]   ;;  %v8723_v21 = vld [vmem:[%s11632_s3 + $0x2a4] ss:$8 sps:$4 sm:$0xff]  }
 0x289   :  { %7494 = vmatpush3.bf16.msra.mxu0 %v8660_v54  ;;  %5885 = vmatpush1.bf16.msra.mxu1 %v8657_v47  ;;  %v8721_v47 = vld [vmem:[%s11632_s3 + $0x2a0] ss:$8 sps:$4 sm:$0xff]   ;;  %v8726_v54 = vld [vmem:[%s11632_s3 + $0x2b4] ss:$8 sps:$4 sm:$0xff]  }
 0x28a   :  { %7495 = vmatprep.subr.bf16.mxu0 %v8661_v48  ;;  %5886 = vmatprep.subr.bf16.mxu1 %v8664_v50  ;;  %v8690_v48 = vld [vmem:[%s11630_s1 + $0x12f8] ss:$36 sps:$4 sm:$0xff]  }
 0x28b   :  { %v8724_v50 = vld [vmem:[%s11632_s3 + $0x2b0] ss:$8 sps:$4 sm:$0xff]  }
 0x28d   :  { %7496 = vmatpush3.bf16.msra.mxu0 %v8665_v53  ;;  %5887 = vmatpush1.bf16.msra.mxu1 %v8662_v51  ;;  %v8729_v51 = vld [vmem:[%s11632_s3 + $0x2c4] ss:$8 sps:$4 sm:$0xff]   ;;  %v8727_v53 = vld [vmem:[%s11632_s3 + $0x2c0] ss:$8 sps:$4 sm:$0xff]  }
 0x28e   :  { %7497 = vmatprep.subr.bf16.mxu0 %v8666_v29  ;;  %5888 = vmatprep.subr.bf16.mxu1 %v8669_v55  ;;  %v8730_v29 = vld [vmem:[%s11632_s3 + $0x2d0] ss:$8 sps:$4 sm:$0xff]  }
 0x291   :  { %7498 = vmatpush3.bf16.msra.mxu0 %v8670_v38  ;;  %5889 = vmatpush1.bf16.msra.mxu1 %v8667_v56  ;;  %v8735_v56 = vld [vmem:[%s11632_s3 + $0x2e4] ss:$8 sps:$4 sm:$0xff]  }
 0x292   :  { %7527 = vmatprep.subr.bf16.mxu0 %v8671_v59  ;;  %5899 = vmatprep.subr.bf16.mxu1 %v8693_v60 }
 0x294   :  { %4801 = vmatmul.mubr.bf16.vlgmr.msra.gmra.mrb[16].mxu0 %v9170_v7  ;;  %5891 = vmatmul.mubr.bf16.vlgmr.msra.gmra.mrb[16].mxu1 %v4979_v62  ;;  %v8699_v7 = vld [vmem:[%s11632_s3 + $0x224] ss:$8 sps:$4 sm:$0xff]   ;;  %v8736_v62 = vld [vmem:[%s11632_s3 + $0x2f0] ss:$8 sps:$4 sm:$0xff]  }
 0x295   :  { %7528 = vmatpush3.bf16.msra.mxu0 %v8672_v61  ;;  %4880 = vmatprep.mubr.bf16.mxu0 %v9265_v37  ;;  %v8676_v37 = vld [vmem:[%s11630_s1 + $0x9b0] ss:$36 sps:$4 sm:$0xff]  }
 0x296   :  { %7529 = vmatprep.subr.bf16.mxu0 %v8673_v1  ;;  %5900 = vmatpush1.bf16.msra.mxu1 %v8691_v0  ;;  %v8738_v61 = vld [vmem:[%s11632_s3 + $0x2f4] ss:$8 sps:$4 sm:$0xff]   ;;  %v8741_v1 = vld [vmem:[%s11632_s3 + $0x304] ss:$8 sps:$4 sm:$0xff]  }
 0x297   :  { %5901 = vmatprep.subr.bf16.mxu1 %v8696_v2 }
 0x299   :  { %7530 = vmatpush3.bf16.msra.mxu0 %v8674_v3 }
 0x29a   :  { %7531 = vmatprep.subr.bf16.mxu0 %v8675_v4  ;;  %5902 = vmatpush1.bf16.msra.mxu1 %v8694_v5 }
 0x29b   :  { %5903 = vmatprep.subr.bf16.mxu1 %v8699_v7  ;;  %v8799_v7 = vld [vmem:[%s11634_s5] ss:$8 sps:$4 sm:$0xff]  }
 0x29d   :  { %7532 = vmatpush3.bf16.msra.mxu0 %v8676_v37  ;;  %v8801_v37 = vld [vmem:[%s11634_s5 + $0x4] ss:$8 sps:$4 sm:$0xff]  }
 0x29e   :  { %7533 = vmatprep.subr.bf16.mxu0 %v8677_v6  ;;  %5904 = vmatpush1.bf16.msra.mxu1 %v8697_v9  ;;  %v8804_v6 = vld [vmem:[%s11634_s5 + $0x14] ss:$8 sps:$4 sm:$0xff]   ;;  %v8802_v9 = vld [vmem:[%s11634_s5 + $0x10] ss:$8 sps:$4 sm:$0xff]  }
 0x29f   :  { %5905 = vmatprep.subr.bf16.mxu1 %v8702_v10  ;;  %v8807_v10 = vld [vmem:[%s11634_s5 + $0x24] ss:$8 sps:$4 sm:$0xff]  }
 0x2a1   :  { %7534 = vmatpush3.bf16.msra.mxu0 %v8678_v11  ;;  %v8805_v11 = vld [vmem:[%s11634_s5 + $0x20] ss:$8 sps:$4 sm:$0xff]  }
 0x2a2   :  { %7535 = vmatprep.subr.bf16.mxu0 %v8679_v28  ;;  %5906 = vmatpush1.bf16.msra.mxu1 %v8700_v12  ;;  %v8810_v28 = vld [vmem:[%s11634_s5 + $0x34] ss:$8 sps:$4 sm:$0xff]   ;;  %v8808_v12 = vld [vmem:[%s11634_s5 + $0x30] ss:$8 sps:$4 sm:$0xff]  }
 0x2a3   :  { %5907 = vmatprep.subr.bf16.mxu1 %v8705_v13  ;;  %v8813_v13 = vld [vmem:[%s11634_s5 + $0x44] ss:$8 sps:$4 sm:$0xff]  }
 0x2a5   :  { %7536 = vmatpush3.bf16.msra.mxu0 %v8680_v14  ;;  %v8811_v14 = vld [vmem:[%s11634_s5 + $0x40] ss:$8 sps:$4 sm:$0xff]  }
 0x2a6   :  { %7537 = vmatprep.subr.bf16.mxu0 %v8681_v15  ;;  %5908 = vmatpush1.bf16.msra.mxu1 %v8703_v16  ;;  %v8816_v15 = vld [vmem:[%s11634_s5 + $0x54] ss:$8 sps:$4 sm:$0xff]   ;;  %v8814_v16 = vld [vmem:[%s11634_s5 + $0x50] ss:$8 sps:$4 sm:$0xff]  }
 0x2a7   :  { %v11150_v24 = vpop.f32.mrb[4].mxu1  ;;  %5909 = vmatprep.subr.bf16.mxu1 %v8708_v18  ;;  %v8819_v18 = vld [vmem:[%s11634_s5 + $0x64] ss:$8 sps:$4 sm:$0xff]  }
 0x2a8   :  { %v11155_v26 = vpop.f32.mrb[5].mxu1 }
 0x2a9   :  { %v4765_v30 = vpop.f32.mrb[6].mxu1  ;;  %7538 = vmatpush3.bf16.msra.mxu0 %v8682_v22  ;;  %v8817_v22 = vld [vmem:[%s11634_s5 + $0x60] ss:$8 sps:$4 sm:$0xff]  }
 0x2aa   :  { %v4766_v20 = vpop.f32.mrb[7].mxu1  ;;  %7539 = vmatprep.subr.bf16.mxu0 %v8683_v8  ;;  %5910 = vmatpush1.bf16.msra.mxu1 %v8706_v23  ;;  %v8822_v8 = vld [vmem:[%s11634_s5 + $0x74] ss:$8 sps:$4 sm:$0xff]   ;;  %v8820_v23 = vld [vmem:[%s11634_s5 + $0x70] ss:$8 sps:$4 sm:$0xff]   ;;  %v770_v30 = vsub.s32 7, %v10597_v34 }
 0x2ab   :  { %5911 = vmatprep.subr.bf16.mxu1 %v8711_v25  ;;  %v8825_v25 = vld [vmem:[%s11634_s5 + $0x84] ss:$8 sps:$4 sm:$0xff]   ;;  %v758_v20 = vsub.s32 4, %v10597_v34 }
 0x2ad   :  { %7540 = vmatpush3.bf16.msra.mxu0 %v8684_v31  ;;  %v8823_v31 = vld [vmem:[%s11634_s5 + $0x80] ss:$8 sps:$4 sm:$0xff]  }
 0x2ae   :  { %7541 = vmatprep.subr.bf16.mxu0 %v8685_v32  ;;  %5912 = vmatpush1.bf16.msra.mxu1 %v8709_v33  ;;  %v8828_v32 = vld [vmem:[%s11634_s5 + $0x94] ss:$8 sps:$4 sm:$0xff]   ;;  %v762_v33 = vsub.s32 5, %v10597_v34 }
 0x2af   :  { %5913 = vmatprep.subr.bf16.mxu1 %v8714_v35  ;;  %v771_v35 = vrot.slane %v10617_v42, %v770_v30 }
 0x2b1   :  { %7542 = vmatpush3.bf16.msra.mxu0 %v8686_v36  ;;  %v8826_v36 = vld [vmem:[%s11634_s5 + $0x90] ss:$8 sps:$4 sm:$0xff]  }
 0x2b2   :  { %7598 = vmatprep.subr.bf16.mxu0 %v8894_v52  ;;  %5914 = vmatpush1.bf16.msra.mxu1 %v8712_v49  ;;  %v759_v49 = vrot.slane %v10617_v42, %v758_v20 }
 0x2b3   :  { %5915 = vmatprep.subr.bf16.mxu1 %v8717_v40  ;;  %v8831_v40 = vld [vmem:[%s11634_s5 + $0xa4] ss:$8 sps:$4 sm:$0xff]  }
 0x2b4   :  { %4881 = vmatmul.mubr.bf16.vlgmr.msra.gmra.mrb[20].mxu0 %v9387_v17  ;;  %v8689_v17 = vld [vmem:[%s11630_s1 + $0x12b0] ss:$36 sps:$4 sm:$0xff]  }
 0x2b5   :  { %7599 = vmatpush3.bf16.msra.mxu0 %v8687_v63  ;;  %7606 = vmatprep.mubr.msk.bf16.mxu0 %vm8895_vm1, %v8894_v52  ;;  %v763_v63 = vrot.slane %v10617_v42, %v762_v33  ;;  %v8829_v42 = vld [vmem:[%s11634_s5 + $0xa0] ss:$8 sps:$4 sm:$0xff]   ;;  %v8766_v33 = vld [vmem:[%s11632_s3 + $0x390] ss:$8 sps:$4 sm:$0xff]  }
 0x2b6   :  { %7600 = vmatprep.subr.bf16.mxu0 %v8894_v52  ;;  %5916 = vmatpush1.bf16.msra.mxu1 %v8715_v43 }
 0x2b7   :  { %5917 = vmatprep.subr.bf16.mxu1 %v8720_v44  ;;  %v11320_v44 = vld [vmem:[%s11629_s0 + $0x18] sm:$0xff] }
 0x2b9   :  { %7601 = vmatpush3.bf16.msra.mxu0 %v8688_v45  ;;  %v54_v45 = vunpack.c.h.bf16 %v11320_v44 }
 0x2ba   :  { %7602 = vmatprep.subr.bf16.mxu0 %v8894_v52  ;;  %5918 = vmatpush1.bf16.msra.mxu1 %v8718_v46  ;;  %v7621_v46 = vadd.f32 %v11155_v26, %v771_v35  ;;  %v8771_v35 = vld [vmem:[%s11632_s3 + $0x3a4] ss:$8 sps:$4 sm:$0xff]  }
 0x2bb   :  { %5919 = vmatprep.subr.bf16.mxu1 %v8723_v21 }
 0x2bd   :  { %7603 = vmatpush3.bf16.msra.mxu0 %v8689_v17 }
 0x2be   :  { %7604 = vmatprep.subr.bf16.mxu0 %v8894_v52  ;;  %5920 = vmatpush1.bf16.msra.mxu1 %v8721_v47  ;;  %v8865_v52 = vld [vmem:[%s11629_s0 + $0x10] sm:$0xff] }
 0x2bf   :  { %5921 = vmatprep.subr.bf16.mxu1 %v8726_v54  ;;  %v51_v43 = vunpack.c.l.bf16 %v8865_v52  ;;  %v52_v17 = vunpack.c.h.bf16 %v8865_v52  ;;  %v766_v52 = vsub.s32 6, %v10597_v34  ;;  %v8783_v34 = vld [vmem:[%s11632_s3 + $0x3e4] ss:$8 sps:$4 sm:$0xff]  }
 0x2c1   :  { %7605 = vmatpush3.bf16.msra.mxu0 %v8690_v48  ;;  %v8834_v48 = vld [vmem:[%s11634_s5 + $0xb4] ss:$8 sps:$4 sm:$0xff]  }
 0x2c2   :  { %5922 = vmatpush1.bf16.msra.mxu1 %v8724_v50  ;;  %6234 = vmatprep.subr.bf16.mxu0 %v8801_v37  ;;  %v8748_v37 = vld [vmem:[%s11632_s3 + $0x330] ss:$8 sps:$4 sm:$0xff]  }
 0x2c3   :  { %5923 = vmatprep.subr.bf16.mxu1 %v8729_v51 }
 0x2c4   :  { %7607 = vmatmul.mubr.msk.bf16.vlgmr.msra.gmra.mrb[24].mxu0 %vm3944_vm0, %v9844_v57  ;;  %v8733_v57 = vld [vmem:[%s11632_s3 + $0x2e0] ss:$8 sps:$4 sm:$0xff]  }
 0x2c5   :  { %6235 = vmatpush1.bf16.msra.mxu0 %v8799_v7  ;;  %v8750_v7 = vld [vmem:[%s11632_s3 + $0x334] ss:$8 sps:$4 sm:$0xff]  }
 0x2c6   :  { %5924 = vmatpush1.bf16.msra.mxu1 %v8727_v53  ;;  %6236 = vmatprep.subr.bf16.mxu0 %v8804_v6  ;;  %v8753_v6 = vld [vmem:[%s11632_s3 + $0x344] ss:$8 sps:$4 sm:$0xff]  }
 0x2c7   :  { %v7521_v55 = vpop.f32.mrb[8].mxu1  ;;  %5925 = vmatprep.subr.bf16.mxu1 %v8732_v27 }
 0x2c8   :  { %v7522_v38 = vpop.f32.mrb[9].mxu1 }
 0x2c9   :  { %v11229_v58 = vadd.f32 %v7522_v38, %v7521_v55  ;;  %v7524_v59 = vpop.f32.mrb[10].mxu1  ;;  %6237 = vmatpush1.bf16.msra.mxu0 %v8802_v9  ;;  %v8832_v55 = vld [vmem:[%s11634_s5 + $0xb0] ss:$8 sps:$4 sm:$0xff]   ;;  %v8751_v9 = vld [vmem:[%s11632_s3 + $0x340] ss:$8 sps:$4 sm:$0xff]  }
 0x2ca   :  { %v7525_v60 = vpop.f32.mrb[11].mxu1  ;;  %5926 = vmatpush1.bf16.msra.mxu1 %v8730_v29  ;;  %6238 = vmatprep.subr.bf16.mxu0 %v8807_v10  ;;  %v4975_v29 = vmul.f32 %v7621_v46, %v54_v45  ;;  %v8739_v59 = vld [vmem:[%s11632_s3 + $0x300] ss:$8 sps:$4 sm:$0xff]   ;;  %v8756_v10 = vld [vmem:[%s11632_s3 + $0x354] ss:$8 sps:$4 sm:$0xff]  }
 0x2cb   :  { %5927 = vmatprep.subr.bf16.mxu1 %v8735_v56  ;;  %v8837_v56 = vld [vmem:[%s11634_s5 + $0xc4] ss:$8 sps:$4 sm:$0xff]   ;;  %v8778_v45 = vld [vmem:[%s11632_s3 + $0x3d0] ss:$8 sps:$4 sm:$0xff]  }
 0x2cc   :  { %v8867_v46 = vld [vmem:[%s11631_s2] sm:$0xff] }
 0x2cd   :  { %6239 = vmatpush1.bf16.msra.mxu0 %v8805_v11  ;;  %v8754_v11 = vld [vmem:[%s11632_s3 + $0x350] ss:$8 sps:$4 sm:$0xff]  }
 0x2ce   :  { %5928 = vmatpush1.bf16.msra.mxu1 %v8733_v57  ;;  %6240 = vmatprep.subr.bf16.mxu0 %v8810_v28  ;;  %v8744_v57 = vld [vmem:[%s11632_s3 + $0x314] ss:$8 sps:$4 sm:$0xff]   ;;  %v8759_v28 = vld [vmem:[%s11632_s3 + $0x364] ss:$8 sps:$4 sm:$0xff]  }
 0x2cf   :  { %5929 = vmatprep.subr.bf16.mxu1 %v8738_v61  ;;  %v4984_v61 = vpack.c.bf16 %v4975_v29, %v4975_v29 }
 0x2d1   :  { %6241 = vmatpush1.bf16.msra.mxu0 %v8808_v12  ;;  %v8757_v12 = vld [vmem:[%s11632_s3 + $0x360] ss:$8 sps:$4 sm:$0xff]  }
 0x2d2   :  { %5930 = vmatpush1.bf16.msra.mxu1 %v8736_v62  ;;  %6242 = vmatprep.subr.bf16.mxu0 %v8813_v13  ;;  %v8835_v62 = vld [vmem:[%s11634_s5 + $0xc0] ss:$8 sps:$4 sm:$0xff]   ;;  %v8762_v13 = vld [vmem:[%s11632_s3 + $0x374] ss:$8 sps:$4 sm:$0xff]  }
 0x2d3   :  { %5940 = vmatprep.subr.bf16.mxu1 %v8741_v1  ;;  %v8840_v1 = vld [vmem:[%s11634_s5 + $0xd4] ss:$8 sps:$4 sm:$0xff]  }
 0x2d5   :  { %6243 = vmatpush1.bf16.msra.mxu0 %v8811_v14 }
 0x2d6   :  { %6244 = vmatprep.subr.bf16.mxu0 %v8816_v15  ;;  %v6670_v15 = vld [vmem:[%s11631_s2 + $0x8] ss:$0 sm:$0xff] }
 0x2d9   :  { %6245 = vmatpush1.bf16.msra.mxu0 %v8814_v16 }
 0x2da   :  { %6246 = vmatprep.subr.bf16.mxu0 %v8819_v18 }
 0x2dd   :  { %6247 = vmatpush1.bf16.msra.mxu0 %v8817_v22 }
 0x2de   :  { %6248 = vmatprep.subr.bf16.mxu0 %v8822_v8  ;;  %v8760_v8 = vld [vmem:[%s11632_s3 + $0x370] ss:$8 sps:$4 sm:$0xff]  }
 0x2e1   :  { %6249 = vmatpush1.bf16.msra.mxu0 %v8820_v23 }
 0x2e2   :  { %6250 = vmatprep.subr.bf16.mxu0 %v8825_v25  ;;  %v8765_v25 = vld [vmem:[%s11632_s3 + $0x384] ss:$8 sps:$4 sm:$0xff]  }
 0x2e5   :  { %6251 = vmatpush1.bf16.msra.mxu0 %v8823_v31  ;;  %v8763_v31 = vld [vmem:[%s11632_s3 + $0x380] ss:$8 sps:$4 sm:$0xff]  }
 0x2e6   :  { %6252 = vmatprep.subr.bf16.mxu0 %v8828_v32  ;;  %v8768_v32 = vld [vmem:[%s11632_s3 + $0x394] ss:$8 sps:$4 sm:$0xff]  }
 0x2e7   :  { %v7565_v0 = vpop.f32.mrb[12].mxu1 }
 0x2e8   :  { %v7566_v2 = vpop.f32.mrb[13].mxu1 }
 0x2e9   :  { %v11243_v3 = vadd.f32 %v7566_v2, %v7565_v0  ;;  %v7568_v4 = vpop.f32.mrb[14].mxu1  ;;  %6253 = vmatpush1.bf16.msra.mxu0 %v8826_v36  ;;  %v8742_v0 = vld [vmem:[%s11632_s3 + $0x310] ss:$8 sps:$4 sm:$0xff]   ;;  %v8747_v2 = vld [vmem:[%s11632_s3 + $0x324] ss:$8 sps:$4 sm:$0xff]  }
 0x2ea   :  { %v7569_v5 = vpop.f32.mrb[15].mxu1  ;;  %6254 = vmatprep.subr.bf16.mxu0 %v8831_v40  ;;  %v8838_v4 = vld [vmem:[%s11634_s5 + $0xd0] ss:$8 sps:$4 sm:$0xff]   ;;  %v8774_v36 = vld [vmem:[%s11632_s3 + $0x3b4] ss:$8 sps:$4 sm:$0xff]  }
 0x2eb   :  { %v8745_v5 = vld [vmem:[%s11632_s3 + $0x320] ss:$8 sps:$4 sm:$0xff]   ;;  %v8777_v40 = vld [vmem:[%s11632_s3 + $0x3c4] ss:$8 sps:$4 sm:$0xff]  }
 0x2ed   :  { %6255 = vmatpush1.bf16.msra.mxu0 %v8829_v42  ;;  %v53_v42 = vunpack.c.l.bf16 %v11320_v44 }
 0x2ee   :  { %6256 = vmatprep.subr.bf16.mxu0 %v8834_v48 }
 0x2f1   :  { %6257 = vmatpush1.bf16.msra.mxu0 %v8832_v55  ;;  %v8787_v55 = vld [vmem:[%s11632_s3 + $0x400] ss:$8 sps:$4 sm:$0xff]  }
 0x2f2   :  { %6258 = vmatprep.subr.bf16.mxu0 %v8837_v56 }
 0x2f5   :  { %6259 = vmatpush1.bf16.msra.mxu0 %v8835_v62 }
 0x2f6   :  { %6260 = vmatprep.subr.bf16.mxu0 %v8840_v1  ;;  %v8798_v1 = vld [vmem:[%s11632_s3 + $0x434] ss:$8 sps:$4 sm:$0xff]  }
 0x2f9   :  { %6261 = vmatpush1.bf16.msra.mxu0 %v8838_v4 }
 0x347   :  { %v4556_v21 = vpop.f32.mrb[12].mxu0 }
 0x348   :  { %v7618_v47 = vadd.f32 %v4556_v21, %v759_v49  ;;  %v4558_v54 = vpop.f32.mrb[13].mxu0  ;;  %v8772_v49 = vld [vmem:[%s11632_s3 + $0x3b0] ss:$8 sps:$4 sm:$0xff]   ;;  %v767_v21 = vrot.slane %v8867_v46, %v766_v52  ;;  %v8855_v46 = vld [vmem:[%s11636_s7 + $0x60] sm:$0xff]  }
 0x349   :  { %v7619_v50 = vadd.f32 %v4558_v54, %v763_v63  ;;  %v4560_v51 = vpop.f32.mrb[14].mxu0  ;;  %v8775_v63 = vld [vmem:[%s11632_s3 + $0x3c0] ss:$8 sps:$4 sm:$0xff]   ;;  %v8786_v54 = vld [vmem:[%s11632_s3 + $0x3f4] ss:$8 sps:$4 sm:$0xff]  }
 0x34a   :  { %v4972_v53 = vmul.f32 %v7618_v47, %v51_v43  ;;  %v4561_v27 = vpop.f32.mrb[15].mxu0  ;;  %v8780_v43 = vld [vmem:[%s11632_s3 + $0x3d4] ss:$8 sps:$4 sm:$0xff]   ;;  %v7620_v47 = vadd.f32 %v11150_v24, %v767_v21  ;;  %v8789_v24 = vld [vmem:[%s11632_s3 + $0x404] ss:$8 sps:$4 sm:$0xff]  }
 0x34b   :  { %v4973_v26 = vmul.f32 %v7619_v50, %v52_v17  ;;  %v8781_v17 = vld [vmem:[%s11632_s3 + $0x3e0] ss:$8 sps:$4 sm:$0xff]   ;;  %v8784_v27 = vld [vmem:[%s11632_s3 + $0x3f0] ss:$8 sps:$4 sm:$0xff]  }
 0x34c   :  { %v4981_v60 = vpack.c.bf16 %v4972_v53, %v4972_v53  ;;  %v4974_v29 = vmul.f32 %v7620_v47, %v53_v42  ;;  %v8852_v52 = vld [vmem:[%s11636_s7 + $0x10] sm:$0xff]   ;;  %v8856_v21 = vld [vmem:[%s11636_s7 + $0x20] sm:$0xff]  }
 0x34d   :  { %v4982_v38 = vpack.c.bf16 %v4973_v26, %v4973_v26  ;;  %v8859_v42 = vld [vmem:[%s11636_s7 + $0x70] sm:$0xff]  }
 0x34e   :  { %v8860_v47 = vld [vmem:[%s11636_s7 + $0x30] sm:$0xff]  }
 0x34f   :  { %5931 = vmatprep.mubr.bf16.mxu1 %v4982_v38  ;;  %v4983_v38 = vpack.c.bf16 %v4974_v29, %v4974_v29 }
 0x350   :  { %5932 = vmatmul.mubr.bf16.vlgmr.msra.gmra.mrb[16].mxu1 %v4981_v60  ;;  %v8790_v60 = vld [vmem:[%s11632_s3 + $0x410] ss:$8 sps:$4 sm:$0xff]  }
 0x351   :  { %5941 = vmatpush1.bf16.msra.mxu1 %v8739_v59  ;;  %5972 = vmatprep.mubr.bf16.mxu1 %v4984_v61  ;;  %v8792_v59 = vld [vmem:[%s11632_s3 + $0x414] ss:$8 sps:$4 sm:$0xff]   ;;  %v8868_v61 = vld [vmem:[%s11629_s0 + $0x20] sm:$0xf] }
 0x352   :  { %5942 = vmatprep.subr.bf16.mxu1 %v8744_v57  ;;  %v8795_v57 = vld [vmem:[%s11632_s3 + $0x424] ss:$8 sps:$4 sm:$0xff]   ;;  %v55_v62 = vunpack.c.l.bf16 %v8868_v61  ;;  %v6495_v61 = vld [vmem:[%s11638_s9 + $0x10] sm:$0xff] }
 0x355   :  { %5943 = vmatpush1.bf16.msra.mxu1 %v8742_v0 }
 0x356   :  { %5944 = vmatprep.subr.bf16.mxu1 %v8747_v2 }
 0x359   :  { %5945 = vmatpush1.bf16.msra.mxu1 %v8745_v5 }
 0x35a   :  { %5946 = vmatprep.subr.bf16.mxu1 %v8750_v7  ;;  %v8796_v7 = vld [vmem:[%s11632_s3 + $0x430] ss:$8 sps:$4 sm:$0xff]  }
 0x35d   :  { %5947 = vmatpush1.bf16.msra.mxu1 %v8748_v37 }
 0x35e   :  { %5948 = vmatprep.subr.bf16.mxu1 %v8753_v6 }
 0x361   :  { %5949 = vmatpush1.bf16.msra.mxu1 %v8751_v9 }
 0x362   :  { %5950 = vmatprep.subr.bf16.mxu1 %v8756_v10  ;;  %v8843_v10 = vld [vmem:[%s11634_s5 + $0xe4] ss:$8 sps:$4 sm:$0xff]  }
 0x363   :  { %6262 = vmatprep.subr.bf16.mxu0 %v8843_v10  ;;  %v6506_v10 = vld [vmem:[%s11638_s9 + $0x68] sm:$0xff] }
 0x365   :  { %5951 = vmatpush1.bf16.msra.mxu1 %v8754_v11  ;;  %v8841_v11 = vld [vmem:[%s11634_s5 + $0xe0] ss:$8 sps:$4 sm:$0xff]  }
 0x366   :  { %5952 = vmatprep.subr.bf16.mxu1 %v8759_v28  ;;  %6263 = vmatpush1.bf16.msra.mxu0 %v8841_v11  ;;  %v8846_v28 = vld [vmem:[%s11634_s5 + $0xf4] ss:$8 sps:$4 sm:$0xff]  }
 0x367   :  { %v7499_v14 = vpop.f32.mrb[16].mxu0  ;;  %6264 = vmatprep.subr.bf16.mxu0 %v8846_v28  ;;  %v6507_v11 = vld [vmem:[%s11638_s9 + $0x70] sm:$0xff]  ;;  %v6508_v28 = vld [vmem:[%s11638_s9 + $0x78] sm:$0xff] }
 0x368   :  { %v7500_v16 = vpop.f32.mrb[17].mxu0 }
 0x369   :  { %v7501_v18 = vadd.f32 %v7500_v16, %v7499_v14  ;;  %5953 = vmatpush1.bf16.msra.mxu1 %v8757_v12  ;;  %v7502_v22 = vpop.f32.mrb[18].mxu0  ;;  %v8844_v12 = vld [vmem:[%s11634_s5 + $0xf0] ss:$8 sps:$4 sm:$0xff]   ;;  %v5122_v14 = vld [vmem:[%s11633_s4] sm:$0x3] }
 0x36a   :  { %v7503_v23 = vpop.f32.mrb[19].mxu0  ;;  %5954 = vmatprep.subr.bf16.mxu1 %v8762_v13  ;;  %6265 = vmatpush1.bf16.msra.mxu0 %v8844_v12  ;;  %v8847_v13 = vld [vmem:[%s11636_s7 + $0x40] sm:$0xff]   ;;  %v5131_v16 = vrot.slane %v5122_v14, %v10612_v41 }
 0x36b   :  { %v4803_v30 = vadd.f32 %v7501_v18, %v6670_v15  ;;  %7576 = vmatprep.subr.bf16.mxu0 %v8847_v13  ;;  %v5127_v15 = vrot.slane %v5122_v14, %v10826_v19  ;;  %v6643_v12 = vld [vmem:[#allocation2] sm:$0x1] }
 0x36c   :  { %v7466_v14 = vld [vmem:[%s11637_s8] ss:$0 sm:$0xff]  ;;  %s8896_s8 = smov [#allocation3]  }
 0x36d   :  { %5955 = vmatpush1.bf16.msra.mxu1 %v8760_v8  ;;  %v4843_v20 = vadd.f32 %v11229_v58, %v4803_v30  ;;  %v8769_v58 = vld [vmem:[%s11632_s3 + $0x3a0] ss:$8 sps:$4 sm:$0xff]  }
 0x36e   :  { %5956 = vmatprep.subr.bf16.mxu1 %v8765_v25 }
 0x371   :  { %5957 = vmatpush1.bf16.msra.mxu1 %v8763_v31 }
 0x372   :  { %5958 = vmatprep.subr.bf16.mxu1 %v8768_v32 }
 0x375   :  { %5959 = vmatpush1.bf16.msra.mxu1 %v8766_v33 }
 0x376   :  { %5960 = vmatprep.subr.bf16.mxu1 %v8771_v35 }
 0x379   :  { %5961 = vmatpush1.bf16.msra.mxu1 %v8769_v58  ;;  %v8848_v58 = vld [vmem:[%s11636_s7] sm:$0xff]  }
 0x37a   :  { %5962 = vmatprep.subr.bf16.mxu1 %v8774_v36 }
 0x37d   :  { %5963 = vmatpush1.bf16.msra.mxu1 %v8772_v49  ;;  %v8849_v49 = vld [vmem:[%s11636_s7 + $0x48] sm:$0xff]  }
 0x37e   :  { %5964 = vmatprep.subr.bf16.mxu1 %v8777_v40  ;;  %v8850_v40 = vld [vmem:[%s11636_s7 + $0x8] sm:$0xff]  }
 0x381   :  { %5965 = vmatpush1.bf16.msra.mxu1 %v8775_v63  ;;  %v8851_v63 = vld [vmem:[%s11636_s7 + $0x50] sm:$0xff]  }
 0x382   :  { %5966 = vmatprep.subr.bf16.mxu1 %v8780_v43  ;;  %v8853_v43 = vld [vmem:[%s11636_s7 + $0x58] sm:$0xff]  }
 0x385   :  { %5967 = vmatpush1.bf16.msra.mxu1 %v8778_v45  ;;  %v8854_v45 = vld [vmem:[%s11636_s7 + $0x18] sm:$0xff]  }
 0x386   :  { %5968 = vmatprep.subr.bf16.mxu1 %v8783_v34  ;;  %v8857_v34 = vld [vmem:[%s11636_s7 + $0x68] sm:$0xff]  }
 0x387   :  { %v7543_v48 = vpop.f32.mrb[20].mxu0 }
 0x388   :  { %v7544_v50 = vpop.f32.mrb[21].mxu0 }
 0x389   :  { %v7545_v51 = vadd.f32 %v7544_v50, %v7543_v48  ;;  %5969 = vmatpush1.bf16.msra.mxu1 %v8781_v17  ;;  %v7546_v53 = vpop.f32.mrb[22].mxu0  ;;  %v8858_v17 = vld [vmem:[%s11636_s7 + $0x28] sm:$0xff]   ;;  %v8862_v48 = vld [vmem:[%s11636_s7 + $0x38] sm:$0xff]   ;;  %v6062_v50 = vld [vmem:[%s11635_s6] sm:$0x3] }
 0x38a   :  { %v7547_v26 = vpop.f32.mrb[23].mxu0  ;;  %5970 = vmatprep.subr.bf16.mxu1 %v8786_v54  ;;  %v8861_v54 = vld [vmem:[%s11636_s7 + $0x78] sm:$0xff]   ;;  %v6071_v53 = vrot.slane %v6062_v50, %v10612_v41  ;;  %v6494_v41 = vld [vmem:[%s11638_s9 + $0x8] sm:$0xff] }
 0x38b   :  { %v4883_v44 = vadd.f32 %v7545_v51, %v4843_v20  ;;  %v6067_v51 = vrot.slane %v6062_v50, %v10826_v19  ;;  %6516 = vperm.xlu1 %7701, %v6494_v41  }
 0x38d   :  { %5971 = vmatpush1.bf16.msra.mxu1 %v8784_v27  ;;  %v4923_v56 = vadd.f32 %v11243_v3, %v4883_v44  ;;  %v8793_v3 = vld [vmem:[%s11632_s3 + $0x420] ss:$8 sps:$4 sm:$0xff]  }
 0x38e   :  { %5981 = vmatprep.subr.bf16.mxu1 %v8789_v24 }
 0x38f   :  { %6521 = vperm.xlu1 %7701, %v6495_v61  }
 0x390   :  { %5973 = vmatmul.mubr.bf16.vlgmr.msra.gmra.mrb[16].mxu1 %v4983_v38 }
 0x391   :  { %5982 = vmatpush1.bf16.msra.mxu1 %v8787_v55  ;;  %6013 = vmatprep.mubr.bf16.mxu1 %v8893_v39 }
 0x392   :  { %5983 = vmatprep.subr.bf16.mxu1 %v8792_v59 }
 0x395   :  { %5984 = vmatpush1.bf16.msra.mxu1 %v8790_v60 }
 0x396   :  { %5985 = vmatprep.subr.bf16.mxu1 %v8795_v57 }
 0x397   :  { %v4962_v0 = vpop.f32.mrb[24].mxu0 }
 0x398   :  { %v4963_v2 = vadd.f32 %v4962_v0, %v4923_v56  ;;  %v7608_v4 = vpop.f32.mrb[25].mxu0  ;;  %v6498_v0 = vld [vmem:[%s11638_s9 + $0x28] sm:$0xff] }
 0x399   :  { %5986 = vmatpush1.bf16.msra.mxu1 %v8793_v3  ;;  %v4965_v5 = vpop.f32.mrb[26].mxu0  ;;  %v6500_v4 = vld [vmem:[%s11638_s9 + $0x38] sm:$0xff] }
 0x39a   :  { %v4976_v37 = vmul.f32 %v4963_v2, %v55_v62  ;;  %v7609_v6 = vpop.f32.mrb[27].mxu0  ;;  %5987 = vmatprep.subr.bf16.mxu1 %v8798_v1  ;;  %v6496_v62 = vld [vmem:[%s11638_s9 + $0x18] sm:$0xff]  ;;  %v6497_v1 = vld [vmem:[%s11638_s9 + $0x20] sm:$0xff]  ;;  %v6499_v2 = vld [vmem:[%s11638_s9 + $0x30] sm:$0xff] }
 0x39b   :  { %6526 = vperm.xlu1 %7701, %v6496_v62   ;;  %v6501_v5 = vld [vmem:[%s11638_s9 + $0x40] sm:$0xff]  ;;  %v6504_v6 = vld [vmem:[%s11638_s9 + $0x58] sm:$0xff] }
 0x39c   :  { %v4985_v9 = vpack.c.bf16 %v4976_v37, %v4976_v37  ;;  %v6503_v37 = vld [vmem:[%s11638_s9 + $0x50] sm:$0xff] }
 0x39d   :  { %5988 = vmatpush1.bf16.msra.mxu1 %v8796_v7  ;;  %v6502_v7 = vld [vmem:[%s11638_s9 + $0x48] sm:$0xff] }
 0x39f   :  { %6531 = vperm.xlu1 %7701, %v6497_v1  }
 0x3a0   :  { %7433 = vmatmul.mubr.msk.bf16.vlgmr.msra.gmra.mrb[16].mxu1 %vm3944_vm0, %v4985_v9  ;;  %v6505_v9 = vld [vmem:[%s11638_s9 + $0x60] sm:$0xff] }
 0x3a3   :  { %6536 = vperm.xlu1 %7701, %v6498_v0  }
 0x3a7   :  { %6541 = vperm.xlu1 %7701, %v6499_v2  }
 0x3ab   :  { %6546 = vperm.xlu1 %7701, %v6500_v4  }
 0x3af   :  { %6551 = vperm.xlu1 %7701, %v6501_v5  }
 0x3b3   :  { %6556 = vperm.xlu1 %7701, %v6502_v7  }
 0x3b7   :  { %6561 = vperm.xlu1 %7701, %v6503_v37  }
 0x3bb   :  { %6566 = vperm.xlu1 %7701, %v6504_v6  }
 0x3bf   :  { %6571 = vperm.xlu1 %7701, %v6505_v9  }
 0x3c3   :  { %6576 = vperm.xlu1 %7701, %v6506_v10  }
 0x3c7   :  { %6581 = vperm.xlu1 %7701, %v6507_v11  }
 0x3cb   :  { %6586 = vperm.xlu1 %7701, %v6508_v28  }
 0x3cf   :  { %6646 = vperm.xlu1 %7701, %v6643_v12  }
 0x473   :  { %v6015_v18 = vpop.f32.mrb[16].mxu1 }
 0x474   :  { %v7622_v22 = vadd.f32 %v6015_v18, %v5127_v15  ;;  %v6017_v8 = vpop.f32.mrb[17].mxu1 }
 0x475   :  { %v7623_v23 = vadd.f32 %v6017_v8, %v5131_v16  ;;  %v6019_v25 = vpop.f32.mrb[18].mxu1 }
 0x476   :  { %vm6022_vm2 = vcmp.ge.f32.partialorder %v7622_v22, 0.0  ;;  %v6024_v30 = vmul.f32 0.01, %v7622_v22  ;;  %v6020_v31 = vpop.f32.mrb[19].mxu1 }
 0x477   :  { %vm6023_vm3 = vcmp.ge.f32.partialorder %v7623_v23, 0.0  ;;  %v6025_v20 = vmul.f32 0.01, %v7623_v23 }
 0x478   :  { %v6026_v32 = vsel %vm6022_vm2, %v7622_v22, %v6024_v30  ;;  %v6493_v30 = vld [vmem:[%s11638_s9] sm:$0xff]  ;;  %s6662_s9 = sshll.u32 %s8896_s8, 4  ;;  %s6663_s9 = int_to_ptr.vmem [resolvable:$true] %s6662_s9 }
 0x479   :  { %v6027_v33 = vsel %vm6023_vm3, %v7623_v23, %v6025_v20  ;;  %v6028_v36 = vpack.c.bf16 %v6026_v32, %v6026_v32  ;;  %s8869_s24 = scalar_lea.vmem %s6663_s9, 16  ;;  %s8873_s25 = scalar_lea.vmem %s6663_s9, 32 }
 0x47a   :  { %v6029_v35 = vpack.c.bf16 %v6027_v33, %v6027_v33  ;;  %p8870_p0 = scmp.ne.s32.totalorder %s6663_s9, %s8869_s24  ;;  %p8874_p1 = scmp.lt.s32.totalorder %s6663_s9, %s6663_s9 }
 0x47b   :  { %p8875_p2 = scmp.lt.s32.totalorder %s8873_s25, %s8869_s24 }
 0x47c   :  { %6266 = vmatprep.mubr.bf16.mxu0 %v6029_v35 }
 0x47d   :  { %6267 = vmatmul.mubr.bf16.vlgmr.msra.gmra.mrb[28].mxu0 %v6028_v36  ;;  %v6517_v36 = vpop.permute.xlu1 %6516  ;;  %p8876_p3 = por %p8875_p2, %p8874_p1 }
 0x47e   :  { %7577 = vmatpush3.bf16.msra.mxu0 %v8848_v58 }
 0x47f   :  { %7578 = vmatprep.subr.bf16.mxu0 %v8849_v49  ;;  %p8877_p4 = pnand %p8876_p3, %p8870_p0 }
 0x482   :  { %7579 = vmatpush3.bf16.msra.mxu0 %v8850_v40  ;;  %v6522_v40 = vpop.permute.xlu1 %6521 }
 0x483   :  { %7580 = vmatprep.subr.bf16.mxu0 %v8851_v63 }
 0x486   :  { %7581 = vmatpush3.bf16.msra.mxu0 %v8852_v52  ;;  %v6527_v52 = vpop.permute.xlu1 %6526 }
 0x487   :  { %7582 = vmatprep.subr.bf16.mxu0 %v8853_v43 }
 0x48a   :  { %7583 = vmatpush3.bf16.msra.mxu0 %v8854_v45  ;;  %v6532_v45 = vpop.permute.xlu1 %6531 }
 0x48b   :  { %7584 = vmatprep.subr.bf16.mxu0 %v8855_v46 }
 0x48e   :  { %7585 = vmatpush3.bf16.msra.mxu0 %v8856_v21 }
 0x48f   :  { %7586 = vmatprep.subr.bf16.mxu0 %v8857_v34 }
 0x492   :  { %7587 = vmatpush3.bf16.msra.mxu0 %v8858_v17 }
 0x493   :  { %7588 = vmatprep.subr.bf16.mxu0 %v8859_v42 }
 0x496   :  { %7589 = vmatpush3.bf16.msra.mxu0 %v8860_v47 }
 0x497   :  { %7590 = vmatprep.subr.bf16.mxu0 %v8861_v54 }
 0x49a   :  { %7591 = vmatpush3.bf16.msra.mxu0 %v8862_v48 }
 0x550   :  { %v6268_v27 = vpop.f32.mrb[28].mxu0 }
 0x551   :  { %v6269_v29 = vadd.f32 %v6268_v27, %v6067_v51  ;;  %v6270_v26 = vpop.f32.mrb[29].mxu0 }
 0x552   :  { %v6271_v24 = vadd.f32 %v6270_v26, %v6071_v53  ;;  %v6272_v44 = vpop.f32.mrb[30].mxu0 }
 0x553   :  { %vm6275_vm4 = vcmp.ge.f32.partialorder %v6269_v29, 0.0  ;;  %v6277_v55 = vmul.f32 0.01, %v6269_v29  ;;  %v6273_v56 = vpop.f32.mrb[31].mxu0 }
 0x554   :  { %vm6276_vm5 = vcmp.ge.f32.partialorder %v6271_v24, 0.0  ;;  %v6278_v38 = vmul.f32 0.01, %v6271_v24 }
 0x555   :  { %v6279_v59 = vsel %vm6275_vm4, %v6269_v29, %v6277_v55 }
 0x556   :  { %v6280_v60 = vsel %vm6276_vm5, %v6271_v24, %v6278_v38  ;;  %v6281_v3 = vpack.c.bf16 %v6279_v59, %v6279_v59 }
 0x557   :  { %v6282_v57 = vpack.c.bf16 %v6280_v60, %v6280_v60 }
 0x559   :  { %6450 = vmatprep.mubr.bf16.mxu0 %v6282_v57 }
 0x55a   :  { %6451 = vmatmul.mubr.bf16.vlgmr.msra.gmra.mrb[32].mxu0 %v6281_v3 }
 0x62d   :  { %v7592_v13 = vpop.f32.mrb[32].mxu0 }
 0x62e   :  { %v7593_v15 = vpop.f32.mrb[33].mxu0 }
 0x62f   :  { %v7594_v16 = vadd.f32 %v7593_v15, %v7592_v13  ;;  %v7595_v18 = vpop.f32.mrb[34].mxu0 }
 0x630   :  { %v7596_v22 = vpop.f32.mrb[35].mxu0 }
 0x631   :  { %v6453_v8 = vadd.f32 %v7594_v16, %v7466_v14 }
 0x633   :  { %vm6458_vm6 = vcmp.ge.f32.partialorder %v6453_v8, 0.0  ;;  %v6459_v23 = vmul.f32 0.01, %v6453_v8 }
 0x635   :  { %v6460_v25 = vsel %vm6458_vm6, %v6453_v8, %v6459_v23 }
 0x636   :  { %6461 = vxpose.xlu0.b32.start.end [1/1] (short) %v6460_v25, 128 }
 0x65f   :  { %7700 = vset.pattern.permute.xlu0 %v8893_v39  ;;  %v6537_v39 = vpop.permute.xlu1 %6536 }
 0x663   :  { %v6542_v34 = vpop.permute.xlu1 %6541 }
 0x667   :  { %v6547_v42 = vpop.permute.xlu1 %6546 }
 0x66b   :  { %v6552_v54 = vpop.permute.xlu1 %6551 }
 0x66f   :  { %v6557_v50 = vpop.permute.xlu1 %6556 }
 0x673   :  { %v6562_v53 = vpop.permute.xlu1 %6561 }
 0x677   :  { %v6567_v55 = vpop.permute.xlu1 %6566 }
 0x67b   :  { %v6572_v1 = vpop.permute.xlu1 %6571 }
 0x67f   :  { %v6577_v11 = vpop.permute.xlu1 %6576 }
 0x683   :  { %v6582_v23 = vpop.permute.xlu1 %6581 }
 0x69b   :  { %6511 = vperm.xlu0 %7700, %v6493_v30  }
 0x6b6   :  { %v6477_v31 = vpop.trf.xlu0 }
 0x6ba   :  { %v6478_v20 = vpop.trf.xlu0 }
 0x6bb   :  { %v6590_v29 = vmul.f32 %v6517_v36, %v6478_v20 }
 0x6bd   :  { %v6607_v56 = vsel %vm6605_vm7, %v6590_v29, 0.0 }
 0x6be   :  { %v6479_v32 = vpop.trf.xlu0 }
 0x6bf   :  { %v6591_v24 = vmul.f32 %v6522_v40, %v6479_v32 }
 0x6c1   :  { %v6609_v57 = vsel %vm6605_vm7, %v6591_v24, 0.0 }
 0x6c2   :  { %v6480_v33 = vpop.trf.xlu0 }
 0x6c3   :  { %v6592_v38 = vmul.f32 %v6527_v52, %v6480_v33 }
 0x6c5   :  { %v6611_v61 = vsel %vm6605_vm7, %v6592_v38, 0.0 }
 0x6c6   :  { %v6481_v35 = vpop.trf.xlu0 }
 0x6c7   :  { %v6593_v3 = vmul.f32 %v6532_v45, %v6481_v35 }
 0x6c9   :  { %v6613_v2 = vsel %vm6605_vm7, %v6593_v3, 0.0 }
 0x6ca   :  { %v6482_v58 = vpop.trf.xlu0 }
 0x6cb   :  { %v6594_v62 = vmul.f32 %v6537_v39, %v6482_v58 }
 0x6cd   :  { %v6615_v7 = vsel %vm6605_vm7, %v6594_v62, 0.0 }
 0x6ce   :  { %v6483_v49 = vpop.trf.xlu0 }
 0x6cf   :  { %v6595_v4 = vmul.f32 %v6542_v34, %v6483_v49  ;;  %v6587_v49 = vpop.permute.xlu1 %6586 }
 0x6d1   :  { %v6617_v9 = vsel %vm6605_vm7, %v6595_v4, 0.0 }
 0x6d2   :  { %v6484_v63 = vpop.trf.xlu0 }
 0x6d3   :  { %v6596_v37 = vmul.f32 %v6547_v42, %v6484_v63 }
 0x6d5   :  { %v6619_v12 = vsel %vm6605_vm7, %v6596_v37, 0.0 }
 0x6d6   :  { %v6485_v43 = vpop.trf.xlu0 }
 0x6d7   :  { %v6597_v10 = vmul.f32 %v6552_v54, %v6485_v43  ;;  %v6647_v54 = vpop.permute.xlu1 %6646 }
 0x6d9   :  { %v6621_v15 = vsel %vm6605_vm7, %v6597_v10, 0.0 }
 0x6da   :  { %v6486_v46 = vpop.trf.xlu0 }
 0x6db   :  { %v6598_v13 = vmul.f32 %v6557_v50, %v6486_v46  ;;  %v6652_v50 = vrot.slane %v6647_v54, %v10826_v19 }
 0x6dd   :  { %v6623_v22 = vsel %vm6605_vm7, %v6598_v13, 0.0 }
 0x6de   :  { %v6487_v21 = vpop.trf.xlu0 }
 0x6df   :  { %v6599_v16 = vmul.f32 %v6562_v53, %v6487_v21 }
 0x6e1   :  { %v6625_v30 = vsel %vm6605_vm7, %v6599_v16, 0.0 }
 0x6e2   :  { %v6488_v17 = vpop.trf.xlu0 }
 0x6e3   :  { %v6600_v8 = vmul.f32 %v6567_v55, %v6488_v17 }
 0x6e5   :  { %v6627_v32 = vsel %vm6605_vm7, %v6600_v8, 0.0 }
 0x6e6   :  { %v6489_v47 = vpop.trf.xlu0 }
 0x6ea   :  { %v6490_v48 = vpop.trf.xlu0 }
 0x6eb   :  { %v6602_v33 = vmul.f32 %v6577_v11, %v6490_v48 }
 0x6ed   :  { %v6631_v63 = vsel %vm6605_vm7, %v6602_v33, 0.0 }
 0x6ee   :  { %v6491_v51 = vpop.trf.xlu0 }
 0x6ef   :  { %v6603_v36 = vmul.f32 %v6582_v23, %v6491_v51 }
 0x6f1   :  { %v6633_v45 = vsel %vm6605_vm7, %v6603_v36, 0.0 }
 0x6f2   :  { %v6492_v27 = vpop.trf.xlu0 }
 0x6f3   :  { %v6604_v52 = vmul.f32 %v6587_v49, %v6492_v27 }
 0x6f5   :  { %v6635_v39 = vsel %vm6605_vm7, %v6604_v52, 0.0 }
 0x71a   :  { %v6512_v26 = vpop.permute.xlu0 %6511 }
 0x71b   :  { %v6589_v44 = vmul.f32 %v6512_v26, %v6477_v31  ;;  %v6601_v31 = vmul.f32 %v6572_v1, %v6489_v47 }
 0x71d   :  { %v6606_v59 = vsel %vm6605_vm7, %v6589_v44, 0.0  ;;  %v6629_v58 = vsel %vm6605_vm7, %v6601_v31, 0.0 }
 0x71e   :  { %v6608_v60 = vadd.f32 %v6607_v56, %v6606_v59 }
 0x720   :  { %v6610_v41 = vadd.f32 %v6609_v57, %v6608_v60 }
 0x722   :  { %v6612_v0 = vadd.f32 %v6611_v61, %v6610_v41 }
 0x724   :  { %v6614_v5 = vadd.f32 %v6613_v2, %v6612_v0 }
 0x726   :  { %v6616_v6 = vadd.f32 %v6615_v7, %v6614_v5 }
 0x728   :  { %v6618_v28 = vadd.f32 %v6617_v9, %v6616_v6 }
 0x72a   :  { %v6620_v14 = vadd.f32 %v6619_v12, %v6618_v28 }
 0x72c   :  { %v6622_v18 = vadd.f32 %v6621_v15, %v6620_v14 }
 0x72e   :  { %v6624_v25 = vadd.f32 %v6623_v22, %v6622_v18 }
 0x730   :  { %v6626_v20 = vadd.f32 %v6625_v30, %v6624_v25 }
 0x732   :  { %v6628_v35 = vadd.f32 %v6627_v32, %v6626_v20 }
 0x734   :  { %v6630_v40 = vadd.f32 %v6629_v58, %v6628_v35 }
 0x736   :  { %v6632_v43 = vadd.f32 %v6631_v63, %v6630_v40 }
 0x738   :  { %v6634_v46 = vadd.f32 %v6633_v45, %v6632_v43 }
 0x73a   :  { %v6636_v21 = vadd.f32 %v6635_v39, %v6634_v46 }
 0x73c   :  { %v6637_v34 = vrot.slane %v6636_v21, 4 }
 0x73e   :  { %v6638_v17 = vadd.f32 %v6637_v34, %v6636_v21 }
 0x740   :  { %v6639_v42 = vrot.slane %v6638_v17, 2 }
 0x742   :  { %v6640_v47 = vadd.f32 %v6639_v42, %v6638_v17 }
 0x744   :  { %v6641_v48 = vrot.slane %v6640_v47, 1 }
 0x746   :  { %v6642_v51 = vadd.f32 %v6641_v48, %v6640_v47 }
 0x748   :  { %v6653_v53 = vadd.f32 %v6652_v50, %v6642_v51 }
 0x74a   :  { %6655 = vst.msk [vmem:[#allocation3] sm:$0x1] %vm6654_vm8, %v6653_v53 }
 0x74b   :  { %8880 = shalt.err (!%p8877_p4)
}
 0x74c   :  { %s8881_s0 = scalar_lea.hbm %s11640_s11, 16 }
 0x74d   :  { %p8882_p5 = scmp.ne.s32.totalorder %s11640_s11, %s8881_s0  ;;  %p8885_p6 = scmp.lt.u32.totalorder %s8881_s0, %s11640_s11 }
 0x74f   :  { %p8887_p7 = pnand %p8885_p6, %p8882_p5 }
 0x751   :  { %8890 = shalt.err (!%p8887_p7)
}
 0x752   :  { %6665 = dma.vmem_to_hbm [thread:$0]  %s6663_s9, 16, %s11640_s11, [#allocation4]  }
 0x753   :  { %8891 = dma.done.wait [#allocation4], 16  }
 0x754   :  { %8892 = vsyncadd [#allocation4], 4294967280 }
 0x755   :  { %6669 = vsyncpa [#allocation4], 1 }

</bundles_post_ra>
